<compile_context>
chip_gen: v7x
topology: tpu7x:2x2x1
jax: 0.10.0
libtpu: 0.0.40
codegen_flags: <defaults>
</compile_context>

<pallas_src>
import math
import functools

import jax
import jax.numpy as jnp
from jax import lax
from jax.experimental import pallas as pl
from jax.experimental.pallas import tpu as pltpu

# ----------------------------- model configuration -----------------------------
SEQ_LEN = 32        # configs.seq_len
PRED_LEN = 16       # configs.pred_len
ENC_IN = 4          # configs.enc_in  (number of series N)
PATCH_SIZE = 8      # configs.patch_size
STRIDE = 8          # configs.stride
D_MODEL = 32        # configs.d_model
E_LAYERS = 2        # configs.e_layers
D_STATE = 8         # configs.d_state (Mamba)
D_CONV = 4          # configs.d_conv  (Mamba)
EXPAND = 2          # Mamba default expand
D_INNER = EXPAND * D_MODEL                                  # 64
DT_RANK = math.ceil(D_MODEL / 16)                           # 2
PATCH_NUM = int((SEQ_LEN - PATCH_SIZE) / STRIDE + 1) + 1    # 5
S_ATTN = 512        # TemporalExternalAttn S
SDI = D_STATE * D_INNER                                     # 512
LN_EPS = 1e-5
REV_EPS = 1e-5
PACK_ROWS = 16      # small-weight pack rows (padded to a sublane multiple)


# ----------------------------- in-kernel helpers --------------------------------
def _recip(x):
    # EUP reciprocal + one Newton step (~f32 accurate); keeps divides off the VPU.
    r = pl.reciprocal(x, approx=True)
    return r * (2.0 - x * r)


def _erf(x):
    # TODO(synk): Mosaic has no erf primitive; nn.GELU()'s erf is approximated with the
    # Abramowitz&Stegun 7.1.26 polynomial (|abs err| < 1.5e-7, i.e. f32-exact).
    a1, a2, a3, a4, a5 = 0.254829592, -0.284496736, 1.421413741, -1.453152027, 1.061405429
    p = 0.3275911
    s = jnp.where(x >= 0.0, 1.0, -1.0)
    ax = jnp.abs(x)
    t = _recip(1.0 + p * ax)
    poly = ((((a5 * t + a4) * t + a3) * t + a2) * t + a1) * t
    return s * (1.0 - poly * jnp.exp(-ax * ax))


def _gelu(x):  # PyTorch nn.GELU() (erf formulation)
    return 0.5 * x * (1.0 + _erf(x * 0.7071067811865476))


def _sigmoid(x):
    e = jnp.exp(-jnp.abs(x))
    pos = _recip(1.0 + e)
    return jnp.where(x >= 0.0, pos, 1.0 - pos)


def _silu(x):
    return x * _sigmoid(x)


def _softplus(x):
    return jnp.maximum(x, 0.0) + jnp.log1p(jnp.exp(-jnp.abs(x)))


# ----------------------------- fused forward kernel ------------------------------
def _fused_forward_kernel(block_b,
                          x_ref, pack_ref, w1_ref, wk_ref, wv_ref, wxz_ref,
                          wscan_ref, wexp_ref, wsum_ref, wout_ref, w2_ref, w3_ref,
                          out_ref):
    T = SEQ_LEN
    R = block_b * ENC_IN            # rows per timestep == lanes of per-(b,n) statistics
    TOK = PATCH_NUM * R             # tokens handled by this grid step (time-major rows)

    # ---- unpack the small-weight slab (all slices start at lane 0: no lane shifts) ----
    pack = pack_ref[...]
    rev_w = pack[0:1, 0:R]
    rev_b = pack[1:2, 0:R]
    b1 = pack[2:3, 0:D_MODEL]
    ln_g = pack[3:4, 0:D_MODEL]
    ln_b = pack[4:5, 0:D_MODEL]
    conv_b = pack[5:6, 0:D_INNER]
    b_dt = pack[6:7, 0:D_INNER]
    d_row = pack[7:8, 0:D_INNER]
    b2 = pack[8:9, 0:2 * PRED_LEN]
    b3 = pack[9:10, 0:PRED_LEN]
    conv_w = pack[10:10 + D_CONV, 0:D_INNER]

    # ---- lane-pack the batch block: column = b*ENC_IN + n ----
    xcat = jnp.concatenate([x_ref[b] for b in range(block_b)], axis=1)      # (T, R)

    # ---- RevIN 'norm' ----
    mean = jnp.mean(xcat, axis=0, keepdims=True)                            # (1, R)
    var = jnp.mean((xcat - mean) ** 2, axis=0, keepdims=True)               # unbiased=False
    std = jnp.sqrt(var + REV_EPS)
    xn = (xcat - mean) * _recip(std) * rev_w + rev_b                        # (T, R)

    # ---- ReplicationPad1d((0, stride)) + unfold + mlp1 (time-major tokens) ----
    xpad = jnp.concatenate(
        [xn, jnp.broadcast_to(xn[T - 1:T, :], (STRIDE, R))], axis=0)        # (T+STRIDE, R)
    toks = []
    for p in range(PATCH_NUM):
        slab = xpad[p * STRIDE: p * STRIDE + PATCH_SIZE, :]                 # (PS, R)
        toks.append(lax.dot_general(slab, w1_ref[...], (((0,), (0,)), ((), ())),
                                    preferred_element_type=jnp.float32) + b1)
    x2 = jnp.concatenate(toks, axis=0)                                      # (TOK, D_MODEL)

    # ---- TemporalExternalAttn (bf16 MXU) -> LayerNorm -> GELU -> residual ----
    attn = jnp.dot(x2.astype(jnp.bfloat16), wk_ref[...],
                   preferred_element_type=jnp.float32)                      # (TOK, S_ATTN)
    attn = attn - jnp.max(attn, axis=-1, keepdims=True)
    e = jnp.exp(attn)
    attn = e * pl.reciprocal(jnp.sum(e, axis=-1, keepdims=True), approx=True)
    av = jnp.dot(attn.astype(jnp.bfloat16), wv_ref[...],
                 preferred_element_type=jnp.float32)                        # (TOK, D_MODEL)
    mu = jnp.mean(av, axis=-1, keepdims=True)
    v2 = jnp.mean((av - mu) ** 2, axis=-1, keepdims=True)
    av = (av - mu) * lax.rsqrt(v2 + LN_EPS) * ln_g + ln_b
    xo = _gelu(av) + x2                                                     # (TOK, D_MODEL)

    # ---- Mamba: fused in_proj (x | z) ----
    xz = jnp.dot(xo, wxz_ref[...], preferred_element_type=jnp.float32)      # (TOK, 2*Di)
    xl = xz[:, 0:D_INNER]
    z = xz[:, D_INNER:2 * D_INNER]

    # causal depthwise conv1d: a time shift of k is a row shift of k*R -> 8-aligned slabs
    xlp = jnp.concatenate(
        [jnp.zeros(((D_CONV - 1) * R, D_INNER), jnp.float32), xl], axis=0)
    xc = conv_b + xlp[0:TOK, :] * conv_w[0:1, :]
    for k in range(1, D_CONV):
        xc = xc + xlp[k * R: k * R + TOK, :] * conv_w[k:k + 1, :]
    xc = _silu(xc)

    # fused x_proj ∘ {B-lane-expand | C-lane-expand | dt_proj}: one lane-dense matmul
    post = jnp.dot(xc, wscan_ref[...], preferred_element_type=jnp.float32)  # (TOK, 2*SDI+Di)
    bb = post[:, 0:SDI]                        # B[r, s] replicated across the 64 d-lanes
    cc = post[:, SDI:2 * SDI]                  # C[r, s] replicated across the 64 d-lanes
    dt = _softplus(post[:, 2 * SDI:2 * SDI + D_INNER] + b_dt)               # (TOK, Di)

    # hoisted scan precompute: block-diag matmul gives [dt⊗A | (dt*x)⊗1] in one pass
    lhs = jnp.concatenate([dt, dt * xc], axis=1)                            # (TOK, 2*Di)
    rep = jnp.dot(lhs, wexp_ref[...], preferred_element_type=jnp.float32)   # (TOK, 2*SDI)
    dA = jnp.exp(rep[:, 0:SDI])                                             # exp(dt*A)
    dBx = bb * rep[:, SDI:2 * SDI]                                          # B * dt * x

    # selective scan: pure VPU FMAs over 8-aligned row slabs, flat state (R, SDI)
    h = jnp.zeros((R, SDI), jnp.float32)
    ch_blocks = []
    for t in range(PATCH_NUM):
        r0 = t * R
        h = dA[r0:r0 + R, :] * h + dBx[r0:r0 + R, :]
        ch_blocks.append(cc[r0:r0 + R, :] * h)
    ch_all = jnp.concatenate(ch_blocks, axis=0)                             # (TOK, SDI)
    y = xc * d_row + jnp.dot(ch_all, wsum_ref[...],
                             preferred_element_type=jnp.float32)            # Σ_s on the MXU

    y = y * _silu(z)                                                        # gate
    xm = jnp.dot(y, wout_ref[...], preferred_element_type=jnp.float32)      # (TOK, D_MODEL)

    # ---- head: flatten(patch, d) -> mlp2 -> GELU -> mlp3 ----
    acc = jnp.dot(xm[0:R, :], w2_ref[0:D_MODEL, :],
                  preferred_element_type=jnp.float32) + b2
    for p in range(1, PATCH_NUM):
        acc = acc + jnp.dot(xm[p * R:(p + 1) * R, :],
                            w2_ref[p * D_MODEL:(p + 1) * D_MODEL, :],
                            preferred_element_type=jnp.float32)
    acc = _gelu(acc)                                                        # (R, 2*PRED)
    pred = jnp.dot(acc, w3_ref[...], preferred_element_type=jnp.float32) + b3  # (R, PRED)

    # transpose (R, PRED) -> (PRED, R) on the MXU via an identity contraction
    ii = lax.broadcasted_iota(jnp.int32, (R, R), 0)
    jj = lax.broadcasted_iota(jnp.int32, (R, R), 1)
    eye_r = (ii == jj).astype(jnp.float32)
    predT = lax.dot_general(pred, eye_r, (((0,), (0,)), ((), ())),
                            preferred_element_type=jnp.float32)             # (PRED, R)

    # ---- RevIN 'denorm' fused in-kernel ----
    predT = (predT - rev_b) * _recip(rev_w + REV_EPS * REV_EPS) * std + mean

    for b in range(block_b):
        out_ref[b] = predT[:, b * ENC_IN:(b + 1) * ENC_IN]                  # (PRED, N)


# ----------------------------- parameters ----------------------------------------
def init_params(key):
    ks = iter(jax.random.split(key, 64))

    def uni(shape, fan_in):
        b = 1.0 / math.sqrt(fan_in)
        return jax.random.uniform(next(ks), shape, jnp.float32, -b, b)

    params = {
        "rev_w": jnp.ones((ENC_IN,), jnp.float32),      # RevIN affine_weight
        "rev_b": jnp.zeros((ENC_IN,), jnp.float32),     # RevIN affine_bias
        "w1": uni((PATCH_SIZE, D_MODEL), PATCH_SIZE),   # mlp1
        "b1": uni((1, D_MODEL), PATCH_SIZE),
        "w2": uni((D_MODEL * PATCH_NUM, 2 * PRED_LEN), D_MODEL * PATCH_NUM),
        "b2": uni((1, 2 * PRED_LEN), D_MODEL * PATCH_NUM),
        "w3": uni((2 * PRED_LEN, PRED_LEN), 2 * PRED_LEN),
        "b3": uni((1, PRED_LEN), 2 * PRED_LEN),
    }
    layers = []
    for _ in range(E_LAYERS):
        lp = {
            "wk": uni((D_MODEL, S_ATTN), D_MODEL),      # TemporalExternalAttn.mk (no bias)
            "wv": uni((S_ATTN, D_MODEL), S_ATTN),       # TemporalExternalAttn.mv (no bias)
            "ln_g": jnp.ones((1, D_MODEL), jnp.float32),
            "ln_b": jnp.zeros((1, D_MODEL), jnp.float32),
            # Mamba(d_model, d_state, d_conv), expand=2, dt_rank=ceil(d_model/16)
            "wx": uni((D_MODEL, D_INNER), D_MODEL),     # in_proj x-half (no bias)
            "wz": uni((D_MODEL, D_INNER), D_MODEL),     # in_proj z-half (no bias)
            "conv_w": uni((D_CONV, D_INNER), D_CONV),   # depthwise conv [k, channel]
            "conv_b": uni((1, D_INNER), D_CONV),
            "w_dt_in": uni((D_INNER, DT_RANK), D_INNER),  # x_proj dt part
            "w_B": uni((D_INNER, D_STATE), D_INNER),      # x_proj B part
            "w_C": uni((D_INNER, D_STATE), D_INNER),      # x_proj C part
        }
        dt_std = DT_RANK ** -0.5
        lp["w_dt"] = jax.random.uniform(next(ks), (DT_RANK, D_INNER), jnp.float32,
                                        -dt_std, dt_std)
        dt = jnp.exp(jax.random.uniform(next(ks), (1, D_INNER), jnp.float32)
                     * (math.log(0.1) - math.log(0.001)) + math.log(0.001))
        dt = jnp.maximum(dt, 1e-4)
        lp["b_dt"] = dt + jnp.log(-jnp.expm1(-dt))        # inverse-softplus init
        lp["A_log"] = jnp.log(jnp.broadcast_to(
            jnp.arange(1, D_STATE + 1, dtype=jnp.float32)[None, :], (D_INNER, D_STATE)))
        lp["D_row"] = jnp.ones((1, D_INNER), jnp.float32)
        lp["w_out"] = uni((D_INNER, D_MODEL), D_INNER)    # out_proj (no bias)
        layers.append(lp)
    params["layers"] = layers
    return params


# ----------------------------- wrapper --------------------------------------------
def _build_small_pack(params, lp, block_b):
    """Pack every sub-(8,128) weight into one (PACK_ROWS, 128) VMEM slab."""
    def row(v):
        v = jnp.asarray(v, jnp.float32).reshape(1, -1)
        return jnp.pad(v, ((0, 0), (0, 128 - v.shape[1])))

    rows = [
        row(jnp.tile(params["rev_w"], block_b)),   # lane order b*ENC_IN + n
        row(jnp.tile(params["rev_b"], block_b)),
        row(params["b1"]), row(lp["ln_g"]), row(lp["ln_b"]),
        row(lp["conv_b"]), row(lp["b_dt"]), row(lp["D_row"]),
        row(params["b2"]), row(params["b3"]),
    ]
    conv_w = jnp.pad(lp["conv_w"].astype(jnp.float32), ((0, 0), (0, 128 - D_INNER)))
    pack = jnp.concatenate(rows + [conv_w], axis=0)
    return jnp.pad(pack, ((0, PACK_ROWS - pack.shape[0]), (0, 0)))


def model_forward(x, params, block_b=2):
    B, T, N = x.shape
    assert T == SEQ_LEN and N == ENC_IN
    assert block_b * ENC_IN <= 128
    # pad batch to a multiple of block_b; block_b even keeps per-timestep slabs 8-aligned
    pad_b = (-B) % block_b
    if pad_b:
        x = jnp.concatenate([x, jnp.zeros((pad_b, T, N), x.dtype)], axis=0)
    bp = B + pad_b

    # NOTE: in the reference, every encoder block consumes the same mlp1 output and only
    # the LAST block's result reaches the head, so earlier blocks are dead compute.
    lp = params["layers"][-1]

    # ---- compose / fuse the tiny projections into lane-dense matmul weights ----
    wxz = jnp.concatenate([lp["wx"], lp["wz"]], axis=1)                      # (32, 128)
    expand_s = jnp.repeat(jnp.eye(D_STATE, dtype=jnp.float32), D_INNER, axis=1)   # (8, 512)
    w_scan = jnp.concatenate([lp["w_B"] @ expand_s,                          # (64, 1088)
                              lp["w_C"] @ expand_s,
                              lp["w_dt_in"] @ lp["w_dt"]], axis=1)
    A = -jnp.exp(lp["A_log"])                                                # (Di, S)
    tile_A = jnp.concatenate([jnp.diag(A[:, s]) for s in range(D_STATE)], axis=1)  # (Di, SDI)
    tile_1 = jnp.tile(jnp.eye(D_INNER, dtype=jnp.float32), (1, D_STATE))            # (Di, SDI)
    zblk = jnp.zeros((D_INNER, SDI), jnp.float32)
    w_exp = jnp.concatenate(
        [jnp.concatenate([tile_A, zblk], axis=1),
         jnp.concatenate([zblk, tile_1], axis=1)], axis=0)                   # (128, 1024)
    w_sum = jnp.tile(jnp.eye(D_INNER, dtype=jnp.float32), (D_STATE, 1))      # (SDI, Di)
    pack = _build_small_pack(params, lp, block_b)

    weights = (pack, params["w1"],
               lp["wk"].astype(jnp.bfloat16), lp["wv"].astype(jnp.bfloat16),
               wxz, w_scan, w_exp, w_sum, lp["w_out"], params["w2"], params["w3"])

    out = pl.pallas_call(
        functools.partial(_fused_forward_kernel, block_b),
        out_shape=jax.ShapeDtypeStruct((bp, PRED_LEN, N), jnp.float32),
        grid=(bp // block_b,),
        in_specs=[pl.BlockSpec((block_b, T, N), lambda i: (i, 0, 0))]
                 + [pl.BlockSpec(w.shape, lambda i: (0, 0)) for w in weights],
        out_specs=pl.BlockSpec((block_b, PRED_LEN, N), lambda i: (i, 0, 0)),
        compiler_params=pltpu.CompilerParams(
            dimension_semantics=("parallel",),
            # weights + activations << 8 MiB per step even double-buffered; raise this
            # (on v5e/v6e up to ~100 MiB) if block_b is grown to fill the MXU further.
            vmem_limit_bytes=32 * 1024 * 1024),
    )(x, *weights)
    return out[:B]


if __name__ == "__main__":
    key = jax.random.PRNGKey(0)
    pkey, xkey = jax.random.split(key)
    params = init_params(pkey)
    B = 4                                                       # 2 grid steps of block_b=2
    x = jax.random.normal(xkey, (B, SEQ_LEN, ENC_IN), jnp.float32)   # (B, T, N)
    fwd = jax.jit(functools.partial(model_forward, block_b=2))
    y = fwd(x, params)
    jax.block_until_ready(y)
    assert y.shape == (B, PRED_LEN, ENC_IN), y.shape
    assert bool(jnp.all(jnp.isfinite(y)))
    print("KERNEL_OK")
</pallas_src>

<mosaic_0001>
module attributes {stable_mosaic.version = 11 : i64} {
  func.func @_fused_forward_kernel(%arg0: i32, %arg1: memref<2x32x4xf32, #tpu.memory_space<vmem>>, %arg2: memref<16x128xf32, #tpu.memory_space<vmem>>, %arg3: memref<8x32xf32, #tpu.memory_space<vmem>>, %arg4: memref<32x512xbf16, #tpu.memory_space<vmem>>, %arg5: memref<512x32xbf16, #tpu.memory_space<vmem>>, %arg6: memref<32x128xf32, #tpu.memory_space<vmem>>, %arg7: memref<64x1088xf32, #tpu.memory_space<vmem>>, %arg8: memref<128x1024xf32, #tpu.memory_space<vmem>>, %arg9: memref<512x64xf32, #tpu.memory_space<vmem>>, %arg10: memref<64x32xf32, #tpu.memory_space<vmem>>, %arg11: memref<160x32xf32, #tpu.memory_space<vmem>>, %arg12: memref<32x16xf32, #tpu.memory_space<vmem>>, %arg13: memref<2x16x4xf32, #tpu.memory_space<vmem>>) attributes {dimension_semantics = [#tpu.dimension_semantics<parallel>], iteration_bounds = array<i64: 2>, scalar_prefetch = 0 : i64, scratch_operands = 0 : i64, tpu.core_type = #tpu.core_type<tc>, window_params = [{transform_indices = @transform_0, window_bounds = array<i64: 2, 32, 4>}, {pipeline_mode = #tpu.pipeline_mode<synchronous>, transform_indices = @transform_1, window_bounds = array<i64: 16, 128>}, {pipeline_mode = #tpu.pipeline_mode<synchronous>, transform_indices = @transform_2, window_bounds = array<i64: 8, 32>}, {pipeline_mode = #tpu.pipeline_mode<synchronous>, transform_indices = @transform_3, window_bounds = array<i64: 32, 512>}, {pipeline_mode = #tpu.pipeline_mode<synchronous>, transform_indices = @transform_4, window_bounds = array<i64: 512, 32>}, {pipeline_mode = #tpu.pipeline_mode<synchronous>, transform_indices = @transform_5, window_bounds = array<i64: 32, 128>}, {pipeline_mode = #tpu.pipeline_mode<synchronous>, transform_indices = @transform_6, window_bounds = array<i64: 64, 1088>}, {pipeline_mode = #tpu.pipeline_mode<synchronous>, transform_indices = @transform_7, window_bounds = array<i64: 128, 1024>}, {pipeline_mode = #tpu.pipeline_mode<synchronous>, transform_indices = @transform_8, window_bounds = array<i64: 512, 64>}, {pipeline_mode = #tpu.pipeline_mode<synchronous>, transform_indices = @transform_9, window_bounds = array<i64: 64, 32>}, {pipeline_mode = #tpu.pipeline_mode<synchronous>, transform_indices = @transform_10, window_bounds = array<i64: 160, 32>}, {pipeline_mode = #tpu.pipeline_mode<synchronous>, transform_indices = @transform_11, window_bounds = array<i64: 32, 16>}, {transform_indices = @transform_12, window_bounds = array<i64: 2, 16, 4>}]} {
    %c0 = arith.constant 0 : index
    %c0_0 = arith.constant 0 : index
    %0 = vector.load %arg2[%c0, %c0_0] : memref<16x128xf32, #tpu.memory_space<vmem>>, vector<16x128xf32>
    %1 = vector.extract_strided_slice %0 {offsets = [0, 0], sizes = [1, 8], strides = [1, 1]} : vector<16x128xf32> to vector<1x8xf32>
    %2 = vector.extract_strided_slice %0 {offsets = [1, 0], sizes = [1, 8], strides = [1, 1]} : vector<16x128xf32> to vector<1x8xf32>
    %3 = vector.extract_strided_slice %0 {offsets = [2, 0], sizes = [1, 32], strides = [1, 1]} : vector<16x128xf32> to vector<1x32xf32>
    %4 = vector.extract_strided_slice %0 {offsets = [3, 0], sizes = [1, 32], strides = [1, 1]} : vector<16x128xf32> to vector<1x32xf32>
    %5 = vector.extract_strided_slice %0 {offsets = [4, 0], sizes = [1, 32], strides = [1, 1]} : vector<16x128xf32> to vector<1x32xf32>
    %6 = vector.extract_strided_slice %0 {offsets = [5, 0], sizes = [1, 64], strides = [1, 1]} : vector<16x128xf32> to vector<1x64xf32>
    %7 = vector.extract_strided_slice %0 {offsets = [6, 0], sizes = [1, 64], strides = [1, 1]} : vector<16x128xf32> to vector<1x64xf32>
    %8 = vector.extract_strided_slice %0 {offsets = [7, 0], sizes = [1, 64], strides = [1, 1]} : vector<16x128xf32> to vector<1x64xf32>
    %9 = vector.extract_strided_slice %0 {offsets = [8, 0], sizes = [1, 32], strides = [1, 1]} : vector<16x128xf32> to vector<1x32xf32>
    %10 = vector.extract_strided_slice %0 {offsets = [9, 0], sizes = [1, 16], strides = [1, 1]} : vector<16x128xf32> to vector<1x16xf32>
    %11 = vector.extract_strided_slice %0 {offsets = [10, 0], sizes = [4, 64], strides = [1, 1]} : vector<16x128xf32> to vector<4x64xf32>
    %c0_1 = arith.constant 0 : index
    %c0_2 = arith.constant 0 : index
    %c0_3 = arith.constant 0 : index
    %12 = vector.load %arg1[%c0_1, %c0_2, %c0_3] : memref<2x32x4xf32, #tpu.memory_space<vmem>>, vector<1x32x4xf32>
    %13 = vector.shape_cast %12 : vector<1x32x4xf32> to vector<32x4xf32>
    %c1 = arith.constant 1 : index
    %c0_4 = arith.constant 0 : index
    %c0_5 = arith.constant 0 : index
    %14 = vector.load %arg1[%c1, %c0_4, %c0_5] : memref<2x32x4xf32, #tpu.memory_space<vmem>>, vector<1x32x4xf32>
    %15 = vector.shape_cast %14 : vector<1x32x4xf32> to vector<32x4xf32>
    %16 = tpu.concatenate %13, %15 in 1 : vector<32x4xf32>, vector<32x4xf32> -> vector<32x8xf32>
    %cst = arith.constant dense<0.000000e+00> : vector<8xf32>
    %17 = vector.multi_reduction <add>, %16, %cst [0] : vector<32x8xf32> to vector<8xf32>
    %18 = vector.shape_cast %17 : vector<8xf32> to vector<1x8xf32>
    %cst_6 = arith.constant 3.200000e+01 : f32
    %19 = vector.broadcast %cst_6 : f32 to vector<1x8xf32>
    %20 = arith.divf %18, %19 : vector<1x8xf32>
    %21 = vector.broadcast %20 : vector<1x8xf32> to vector<32x8xf32>
    %22 = arith.subf %16, %21 : vector<32x8xf32>
    %23 = arith.mulf %22, %22 : vector<32x8xf32>
    %cst_7 = arith.constant dense<0.000000e+00> : vector<8xf32>
    %24 = vector.multi_reduction <add>, %23, %cst_7 [0] : vector<32x8xf32> to vector<8xf32>
    %25 = vector.shape_cast %24 : vector<8xf32> to vector<1x8xf32>
    %cst_8 = arith.constant 3.200000e+01 : f32
    %26 = vector.broadcast %cst_8 : f32 to vector<1x8xf32>
    %27 = arith.divf %25, %26 : vector<1x8xf32>
    %cst_9 = arith.constant 9.99999974E-6 : f32
    %28 = vector.broadcast %cst_9 : f32 to vector<1x8xf32>
    %29 = arith.addf %27, %28 : vector<1x8xf32>
    %30 = math.sqrt %29 : vector<1x8xf32>
    %31 = vector.broadcast %20 : vector<1x8xf32> to vector<32x8xf32>
    %32 = arith.subf %16, %31 : vector<32x8xf32>
    %33 = tpu.reciprocal %30 {approx = true} : vector<1x8xf32> -> vector<1x8xf32>
    %34 = arith.mulf %30, %33 : vector<1x8xf32>
    %cst_10 = arith.constant 2.000000e+00 : f32
    %35 = vector.broadcast %cst_10 : f32 to vector<1x8xf32>
    %36 = arith.subf %35, %34 : vector<1x8xf32>
    %37 = arith.mulf %33, %36 : vector<1x8xf32>
    %38 = vector.broadcast %37 : vector<1x8xf32> to vector<32x8xf32>
    %39 = arith.mulf %32, %38 : vector<32x8xf32>
    %40 = vector.broadcast %1 : vector<1x8xf32> to vector<32x8xf32>
    %41 = arith.mulf %39, %40 : vector<32x8xf32>
    %42 = vector.broadcast %2 : vector<1x8xf32> to vector<32x8xf32>
    %43 = arith.addf %41, %42 : vector<32x8xf32>
    %44 = vector.extract_strided_slice %43 {offsets = [31, 0], sizes = [1, 8], strides = [1, 1]} : vector<32x8xf32> to vector<1x8xf32>
    %45 = vector.shape_cast %44 : vector<1x8xf32> to vector<1x8xf32>
    %46 = vector.broadcast %45 : vector<1x8xf32> to vector<8x8xf32>
    %47 = tpu.concatenate %43, %46 in 0 : vector<32x8xf32>, vector<8x8xf32> -> vector<40x8xf32>
    %48 = vector.extract_strided_slice %47 {offsets = [0, 0], sizes = [8, 8], strides = [1, 1]} : vector<40x8xf32> to vector<8x8xf32>
    %c0_11 = arith.constant 0 : index
    %c0_12 = arith.constant 0 : index
    %49 = vector.load %arg3[%c0_11, %c0_12] : memref<8x32xf32, #tpu.memory_space<vmem>>, vector<8x32xf32>
    %cst_13 = arith.constant dense<0.000000e+00> : vector<8x32xf32>
    %50 = tpu.matmul %48, %49, %cst_13 {dimension_numbers = #tpu.dot_dimension_numbers<[0], [0], [1], [1], [0, 1, 1, 1], [], []>} : vector<8x8xf32>, vector<8x32xf32>, vector<8x32xf32> -> vector<8x32xf32>
    %51 = vector.broadcast %3 : vector<1x32xf32> to vector<8x32xf32>
    %52 = arith.addf %50, %51 : vector<8x32xf32>
    %53 = vector.extract_strided_slice %47 {offsets = [8, 0], sizes = [8, 8], strides = [1, 1]} : vector<40x8xf32> to vector<8x8xf32>
    %c0_14 = arith.constant 0 : index
    %c0_15 = arith.constant 0 : index
    %54 = vector.load %arg3[%c0_14, %c0_15] : memref<8x32xf32, #tpu.memory_space<vmem>>, vector<8x32xf32>
    %cst_16 = arith.constant dense<0.000000e+00> : vector<8x32xf32>
    %55 = tpu.matmul %53, %54, %cst_16 {dimension_numbers = #tpu.dot_dimension_numbers<[0], [0], [1], [1], [0, 1, 1, 1], [], []>} : vector<8x8xf32>, vector<8x32xf32>, vector<8x32xf32> -> vector<8x32xf32>
    %56 = vector.broadcast %3 : vector<1x32xf32> to vector<8x32xf32>
    %57 = arith.addf %55, %56 : vector<8x32xf32>
    %58 = vector.extract_strided_slice %47 {offsets = [16, 0], sizes = [8, 8], strides = [1, 1]} : vector<40x8xf32> to vector<8x8xf32>
    %c0_17 = arith.constant 0 : index
    %c0_18 = arith.constant 0 : index
    %59 = vector.load %arg3[%c0_17, %c0_18] : memref<8x32xf32, #tpu.memory_space<vmem>>, vector<8x32xf32>
    %cst_19 = arith.constant dense<0.000000e+00> : vector<8x32xf32>
    %60 = tpu.matmul %58, %59, %cst_19 {dimension_numbers = #tpu.dot_dimension_numbers<[0], [0], [1], [1], [0, 1, 1, 1], [], []>} : vector<8x8xf32>, vector<8x32xf32>, vector<8x32xf32> -> vector<8x32xf32>
    %61 = vector.broadcast %3 : vector<1x32xf32> to vector<8x32xf32>
    %62 = arith.addf %60, %61 : vector<8x32xf32>
    %63 = vector.extract_strided_slice %47 {offsets = [24, 0], sizes = [8, 8], strides = [1, 1]} : vector<40x8xf32> to vector<8x8xf32>
    %c0_20 = arith.constant 0 : index
    %c0_21 = arith.constant 0 : index
    %64 = vector.load %arg3[%c0_20, %c0_21] : memref<8x32xf32, #tpu.memory_space<vmem>>, vector<8x32xf32>
    %cst_22 = arith.constant dense<0.000000e+00> : vector<8x32xf32>
    %65 = tpu.matmul %63, %64, %cst_22 {dimension_numbers = #tpu.dot_dimension_numbers<[0], [0], [1], [1], [0, 1, 1, 1], [], []>} : vector<8x8xf32>, vector<8x32xf32>, vector<8x32xf32> -> vector<8x32xf32>
    %66 = vector.broadcast %3 : vector<1x32xf32> to vector<8x32xf32>
    %67 = arith.addf %65, %66 : vector<8x32xf32>
    %68 = vector.extract_strided_slice %47 {offsets = [32, 0], sizes = [8, 8], strides = [1, 1]} : vector<40x8xf32> to vector<8x8xf32>
    %c0_23 = arith.constant 0 : index
    %c0_24 = arith.constant 0 : index
    %69 = vector.load %arg3[%c0_23, %c0_24] : memref<8x32xf32, #tpu.memory_space<vmem>>, vector<8x32xf32>
    %cst_25 = arith.constant dense<0.000000e+00> : vector<8x32xf32>
    %70 = tpu.matmul %68, %69, %cst_25 {dimension_numbers = #tpu.dot_dimension_numbers<[0], [0], [1], [1], [0, 1, 1, 1], [], []>} : vector<8x8xf32>, vector<8x32xf32>, vector<8x32xf32> -> vector<8x32xf32>
    %71 = vector.broadcast %3 : vector<1x32xf32> to vector<8x32xf32>
    %72 = arith.addf %70, %71 : vector<8x32xf32>
    %73 = tpu.concatenate %52, %57, %62, %67, %72 in 0 : vector<8x32xf32>, vector<8x32xf32>, vector<8x32xf32>, vector<8x32xf32>, vector<8x32xf32> -> vector<40x32xf32>
    %74 = arith.truncf %73 : vector<40x32xf32> to vector<40x32xbf16>
    %c0_26 = arith.constant 0 : index
    %c0_27 = arith.constant 0 : index
    %75 = vector.load %arg4[%c0_26, %c0_27] : memref<32x512xbf16, #tpu.memory_space<vmem>>, vector<32x512xbf16>
    %cst_28 = arith.constant dense<0.000000e+00> : vector<40x512xf32>
    %76 = tpu.matmul %74, %75, %cst_28 {dimension_numbers = #tpu.dot_dimension_numbers<[1], [0], [0], [1], [0, 0, 1, 1], [], []>} : vector<40x32xbf16>, vector<32x512xbf16>, vector<40x512xf32> -> vector<40x512xf32>
    %cst_29 = arith.constant dense<0xFF800000> : vector<40xf32>
    %77 = vector.multi_reduction <maximumf>, %76, %cst_29 [1] : vector<40x512xf32> to vector<40xf32>
    %78 = vector.shape_cast %77 : vector<40xf32> to vector<40x1xf32>
    %79 = vector.broadcast %78 : vector<40x1xf32> to vector<40x512xf32>
    %80 = arith.subf %76, %79 : vector<40x512xf32>
    %81 = math.exp %80 : vector<40x512xf32>
    %cst_30 = arith.constant dense<0.000000e+00> : vector<40xf32>
    %82 = vector.multi_reduction <add>, %81, %cst_30 [1] : vector<40x512xf32> to vector<40xf32>
    %83 = vector.shape_cast %82 : vector<40xf32> to vector<40x1xf32>
    %84 = tpu.reciprocal %83 {approx = true} : vector<40x1xf32> -> vector<40x1xf32>
    %85 = vector.broadcast %84 : vector<40x1xf32> to vector<40x512xf32>
    %86 = arith.mulf %81, %85 : vector<40x512xf32>
    %87 = arith.truncf %86 : vector<40x512xf32> to vector<40x512xbf16>
    %c0_31 = arith.constant 0 : index
    %c0_32 = arith.constant 0 : index
    %88 = vector.load %arg5[%c0_31, %c0_32] : memref<512x32xbf16, #tpu.memory_space<vmem>>, vector<512x32xbf16>
    %cst_33 = arith.constant dense<0.000000e+00> : vector<40x32xf32>
    %89 = tpu.matmul %87, %88, %cst_33 {dimension_numbers = #tpu.dot_dimension_numbers<[1], [0], [0], [1], [0, 0, 1, 1], [], []>} : vector<40x512xbf16>, vector<512x32xbf16>, vector<40x32xf32> -> vector<40x32xf32>
    %cst_34 = arith.constant dense<0.000000e+00> : vector<40xf32>
    %90 = vector.multi_reduction <add>, %89, %cst_34 [1] : vector<40x32xf32> to vector<40xf32>
    %91 = vector.shape_cast %90 : vector<40xf32> to vector<40x1xf32>
    %cst_35 = arith.constant 3.200000e+01 : f32
    %92 = vector.broadcast %cst_35 : f32 to vector<40x1xf32>
    %93 = arith.divf %91, %92 : vector<40x1xf32>
    %94 = vector.broadcast %93 : vector<40x1xf32> to vector<40x32xf32>
    %95 = arith.subf %89, %94 : vector<40x32xf32>
    %96 = arith.mulf %95, %95 : vector<40x32xf32>
    %cst_36 = arith.constant dense<0.000000e+00> : vector<40xf32>
    %97 = vector.multi_reduction <add>, %96, %cst_36 [1] : vector<40x32xf32> to vector<40xf32>
    %98 = vector.shape_cast %97 : vector<40xf32> to vector<40x1xf32>
    %cst_37 = arith.constant 3.200000e+01 : f32
    %99 = vector.broadcast %cst_37 : f32 to vector<40x1xf32>
    %100 = arith.divf %98, %99 : vector<40x1xf32>
    %101 = vector.broadcast %93 : vector<40x1xf32> to vector<40x32xf32>
    %102 = arith.subf %89, %101 : vector<40x32xf32>
    %cst_38 = arith.constant 9.99999974E-6 : f32
    %103 = vector.broadcast %cst_38 : f32 to vector<40x1xf32>
    %104 = arith.addf %100, %103 : vector<40x1xf32>
    %105 = math.rsqrt %104 : vector<40x1xf32>
    %106 = vector.broadcast %105 : vector<40x1xf32> to vector<40x32xf32>
    %107 = arith.mulf %102, %106 : vector<40x32xf32>
    %108 = vector.broadcast %4 : vector<1x32xf32> to vector<40x32xf32>
    %109 = arith.mulf %107, %108 : vector<40x32xf32>
    %110 = vector.broadcast %5 : vector<1x32xf32> to vector<40x32xf32>
    %111 = arith.addf %109, %110 : vector<40x32xf32>
    %cst_39 = arith.constant 5.000000e-01 : f32
    %112 = vector.broadcast %cst_39 : f32 to vector<40x32xf32>
    %113 = arith.mulf %112, %111 : vector<40x32xf32>
    %cst_40 = arith.constant 0.707106769 : f32
    %114 = vector.broadcast %cst_40 : f32 to vector<40x32xf32>
    %115 = arith.mulf %111, %114 : vector<40x32xf32>
    %cst_41 = arith.constant 0.000000e+00 : f32
    %116 = vector.broadcast %cst_41 : f32 to vector<40x32xf32>
    %117 = arith.cmpf oge, %115, %116 : vector<40x32xf32>
    %cst_42 = arith.constant 1.000000e+00 : f32
    %cst_43 = arith.constant -1.000000e+00 : f32
    %118 = vector.broadcast %cst_42 : f32 to vector<40x32xf32>
    %119 = vector.broadcast %cst_43 : f32 to vector<40x32xf32>
    %120 = arith.select %117, %118, %119 : vector<40x32xi1>, vector<40x32xf32>
    %121 = math.absf %115 : vector<40x32xf32>
    %cst_44 = arith.constant 0.327591091 : f32
    %122 = vector.broadcast %cst_44 : f32 to vector<40x32xf32>
    %123 = arith.mulf %122, %121 : vector<40x32xf32>
    %cst_45 = arith.constant 1.000000e+00 : f32
    %124 = vector.broadcast %cst_45 : f32 to vector<40x32xf32>
    %125 = arith.addf %124, %123 : vector<40x32xf32>
    %126 = tpu.reciprocal %125 {approx = true} : vector<40x32xf32> -> vector<40x32xf32>
    %127 = arith.mulf %125, %126 : vector<40x32xf32>
    %cst_46 = arith.constant 2.000000e+00 : f32
    %128 = vector.broadcast %cst_46 : f32 to vector<40x32xf32>
    %129 = arith.subf %128, %127 : vector<40x32xf32>
    %130 = arith.mulf %126, %129 : vector<40x32xf32>
    %cst_47 = arith.constant 1.06140542 : f32
    %131 = vector.broadcast %cst_47 : f32 to vector<40x32xf32>
    %132 = arith.mulf %131, %130 : vector<40x32xf32>
    %cst_48 = arith.constant -1.45315206 : f32
    %133 = vector.broadcast %cst_48 : f32 to vector<40x32xf32>
    %134 = arith.addf %132, %133 : vector<40x32xf32>
    %135 = arith.mulf %134, %130 : vector<40x32xf32>
    %cst_49 = arith.constant 1.42141378 : f32
    %136 = vector.broadcast %cst_49 : f32 to vector<40x32xf32>
    %137 = arith.addf %135, %136 : vector<40x32xf32>
    %138 = arith.mulf %137, %130 : vector<40x32xf32>
    %cst_50 = arith.constant -0.284496725 : f32
    %139 = vector.broadcast %cst_50 : f32 to vector<40x32xf32>
    %140 = arith.addf %138, %139 : vector<40x32xf32>
    %141 = arith.mulf %140, %130 : vector<40x32xf32>
    %cst_51 = arith.constant 0.254829586 : f32
    %142 = vector.broadcast %cst_51 : f32 to vector<40x32xf32>
    %143 = arith.addf %141, %142 : vector<40x32xf32>
    %144 = arith.mulf %143, %130 : vector<40x32xf32>
    %cst_52 = arith.constant 0.000000e+00 : f32
    %145 = vector.broadcast %cst_52 : f32 to vector<40x32xf32>
    %146 = arith.subf %145, %121 : vector<40x32xf32>
    %147 = arith.mulf %146, %121 : vector<40x32xf32>
    %148 = math.exp %147 : vector<40x32xf32>
    %149 = arith.mulf %144, %148 : vector<40x32xf32>
    %cst_53 = arith.constant 1.000000e+00 : f32
    %150 = vector.broadcast %cst_53 : f32 to vector<40x32xf32>
    %151 = arith.subf %150, %149 : vector<40x32xf32>
    %152 = arith.mulf %120, %151 : vector<40x32xf32>
    %cst_54 = arith.constant 1.000000e+00 : f32
    %153 = vector.broadcast %cst_54 : f32 to vector<40x32xf32>
    %154 = arith.addf %153, %152 : vector<40x32xf32>
    %155 = arith.mulf %113, %154 : vector<40x32xf32>
    %156 = arith.addf %155, %73 : vector<40x32xf32>
    %c0_55 = arith.constant 0 : index
    %c0_56 = arith.constant 0 : index
    %157 = vector.load %arg6[%c0_55, %c0_56] : memref<32x128xf32, #tpu.memory_space<vmem>>, vector<32x128xf32>
    %cst_57 = arith.constant dense<0.000000e+00> : vector<40x128xf32>
    %158 = tpu.matmul %156, %157, %cst_57 {dimension_numbers = #tpu.dot_dimension_numbers<[1], [0], [0], [1], [0, 0, 1, 1], [], []>} : vector<40x32xf32>, vector<32x128xf32>, vector<40x128xf32> -> vector<40x128xf32>
    %159 = vector.extract_strided_slice %158 {offsets = [0, 0], sizes = [40, 64], strides = [1, 1]} : vector<40x128xf32> to vector<40x64xf32>
    %160 = vector.extract_strided_slice %158 {offsets = [0, 64], sizes = [40, 64], strides = [1, 1]} : vector<40x128xf32> to vector<40x64xf32>
    %cst_58 = arith.constant 0.000000e+00 : f32
    %161 = vector.broadcast %cst_58 : f32 to vector<24x64xf32>
    %162 = tpu.concatenate %161, %159 in 0 : vector<24x64xf32>, vector<40x64xf32> -> vector<64x64xf32>
    %163 = vector.extract_strided_slice %162 {offsets = [0, 0], sizes = [40, 64], strides = [1, 1]} : vector<64x64xf32> to vector<40x64xf32>
    %164 = vector.extract_strided_slice %11 {offsets = [0, 0], sizes = [1, 64], strides = [1, 1]} : vector<4x64xf32> to vector<1x64xf32>
    %165 = vector.broadcast %164 : vector<1x64xf32> to vector<40x64xf32>
    %166 = arith.mulf %163, %165 : vector<40x64xf32>
    %167 = vector.broadcast %6 : vector<1x64xf32> to vector<40x64xf32>
    %168 = arith.addf %167, %166 : vector<40x64xf32>
    %169 = vector.extract_strided_slice %162 {offsets = [8, 0], sizes = [40, 64], strides = [1, 1]} : vector<64x64xf32> to vector<40x64xf32>
    %170 = vector.extract_strided_slice %11 {offsets = [1, 0], sizes = [1, 64], strides = [1, 1]} : vector<4x64xf32> to vector<1x64xf32>
    %171 = vector.broadcast %170 : vector<1x64xf32> to vector<40x64xf32>
    %172 = arith.mulf %169, %171 : vector<40x64xf32>
    %173 = arith.addf %168, %172 : vector<40x64xf32>
    %174 = vector.extract_strided_slice %162 {offsets = [16, 0], sizes = [40, 64], strides = [1, 1]} : vector<64x64xf32> to vector<40x64xf32>
    %175 = vector.extract_strided_slice %11 {offsets = [2, 0], sizes = [1, 64], strides = [1, 1]} : vector<4x64xf32> to vector<1x64xf32>
    %176 = vector.broadcast %175 : vector<1x64xf32> to vector<40x64xf32>
    %177 = arith.mulf %174, %176 : vector<40x64xf32>
    %178 = arith.addf %173, %177 : vector<40x64xf32>
    %179 = vector.extract_strided_slice %162 {offsets = [24, 0], sizes = [40, 64], strides = [1, 1]} : vector<64x64xf32> to vector<40x64xf32>
    %180 = vector.extract_strided_slice %11 {offsets = [3, 0], sizes = [1, 64], strides = [1, 1]} : vector<4x64xf32> to vector<1x64xf32>
    %181 = vector.broadcast %180 : vector<1x64xf32> to vector<40x64xf32>
    %182 = arith.mulf %179, %181 : vector<40x64xf32>
    %183 = arith.addf %178, %182 : vector<40x64xf32>
    %184 = math.absf %183 : vector<40x64xf32>
    %cst_59 = arith.constant 0.000000e+00 : f32
    %185 = vector.broadcast %cst_59 : f32 to vector<40x64xf32>
    %186 = arith.subf %185, %184 : vector<40x64xf32>
    %187 = math.exp %186 : vector<40x64xf32>
    %cst_60 = arith.constant 1.000000e+00 : f32
    %188 = vector.broadcast %cst_60 : f32 to vector<40x64xf32>
    %189 = arith.addf %188, %187 : vector<40x64xf32>
    %190 = tpu.reciprocal %189 {approx = true} : vector<40x64xf32> -> vector<40x64xf32>
    %191 = arith.mulf %189, %190 : vector<40x64xf32>
    %cst_61 = arith.constant 2.000000e+00 : f32
    %192 = vector.broadcast %cst_61 : f32 to vector<40x64xf32>
    %193 = arith.subf %192, %191 : vector<40x64xf32>
    %194 = arith.mulf %190, %193 : vector<40x64xf32>
    %cst_62 = arith.constant 0.000000e+00 : f32
    %195 = vector.broadcast %cst_62 : f32 to vector<40x64xf32>
    %196 = arith.cmpf oge, %183, %195 : vector<40x64xf32>
    %cst_63 = arith.constant 1.000000e+00 : f32
    %197 = vector.broadcast %cst_63 : f32 to vector<40x64xf32>
    %198 = arith.subf %197, %194 : vector<40x64xf32>
    %199 = arith.select %196, %194, %198 : vector<40x64xi1>, vector<40x64xf32>
    %200 = arith.mulf %183, %199 : vector<40x64xf32>
    %c0_64 = arith.constant 0 : index
    %c0_65 = arith.constant 0 : index
    %201 = vector.load %arg7[%c0_64, %c0_65] : memref<64x1088xf32, #tpu.memory_space<vmem>>, vector<64x1088xf32>
    %cst_66 = arith.constant dense<0.000000e+00> : vector<40x1088xf32>
    %202 = tpu.matmul %200, %201, %cst_66 {dimension_numbers = #tpu.dot_dimension_numbers<[1], [0], [0], [1], [0, 0, 1, 1], [], []>} : vector<40x64xf32>, vector<64x1088xf32>, vector<40x1088xf32> -> vector<40x1088xf32>
    %203 = vector.extract_strided_slice %202 {offsets = [0, 0], sizes = [40, 512], strides = [1, 1]} : vector<40x1088xf32> to vector<40x512xf32>
    %204 = vector.extract_strided_slice %202 {offsets = [0, 512], sizes = [40, 512], strides = [1, 1]} : vector<40x1088xf32> to vector<40x512xf32>
    %205 = vector.extract_strided_slice %202 {offsets = [0, 1024], sizes = [40, 64], strides = [1, 1]} : vector<40x1088xf32> to vector<40x64xf32>
    %206 = vector.broadcast %7 : vector<1x64xf32> to vector<40x64xf32>
    %207 = arith.addf %205, %206 : vector<40x64xf32>
    %cst_67 = arith.constant 0.000000e+00 : f32
    %208 = vector.broadcast %cst_67 : f32 to vector<40x64xf32>
    %209 = arith.maximumf %207, %208 : vector<40x64xf32>
    %210 = math.absf %207 : vector<40x64xf32>
    %cst_68 = arith.constant 0.000000e+00 : f32
    %211 = vector.broadcast %cst_68 : f32 to vector<40x64xf32>
    %212 = arith.subf %211, %210 : vector<40x64xf32>
    %213 = math.exp %212 : vector<40x64xf32>
    %214 = math.log1p %213 : vector<40x64xf32>
    %215 = arith.addf %209, %214 : vector<40x64xf32>
    %216 = arith.mulf %215, %200 : vector<40x64xf32>
    %217 = tpu.concatenate %215, %216 in 1 : vector<40x64xf32>, vector<40x64xf32> -> vector<40x128xf32>
    %c0_69 = arith.constant 0 : index
    %c0_70 = arith.constant 0 : index
    %218 = vector.load %arg8[%c0_69, %c0_70] : memref<128x1024xf32, #tpu.memory_space<vmem>>, vector<128x1024xf32>
    %cst_71 = arith.constant dense<0.000000e+00> : vector<40x1024xf32>
    %219 = tpu.matmul %217, %218, %cst_71 {dimension_numbers = #tpu.dot_dimension_numbers<[1], [0], [0], [1], [0, 0, 1, 1], [], []>} : vector<40x128xf32>, vector<128x1024xf32>, vector<40x1024xf32> -> vector<40x1024xf32>
    %220 = vector.extract_strided_slice %219 {offsets = [0, 0], sizes = [40, 512], strides = [1, 1]} : vector<40x1024xf32> to vector<40x512xf32>
    %221 = math.exp %220 : vector<40x512xf32>
    %222 = vector.extract_strided_slice %219 {offsets = [0, 512], sizes = [40, 512], strides = [1, 1]} : vector<40x1024xf32> to vector<40x512xf32>
    %223 = arith.mulf %203, %222 : vector<40x512xf32>
    %cst_72 = arith.constant 0.000000e+00 : f32
    %224 = vector.broadcast %cst_72 : f32 to vector<8x512xf32>
    %225 = vector.extract_strided_slice %221 {offsets = [0, 0], sizes = [8, 512], strides = [1, 1]} : vector<40x512xf32> to vector<8x512xf32>
    %226 = arith.mulf %225, %224 : vector<8x512xf32>
    %227 = vector.extract_strided_slice %223 {offsets = [0, 0], sizes = [8, 512], strides = [1, 1]} : vector<40x512xf32> to vector<8x512xf32>
    %228 = arith.addf %226, %227 : vector<8x512xf32>
    %229 = vector.extract_strided_slice %204 {offsets = [0, 0], sizes = [8, 512], strides = [1, 1]} : vector<40x512xf32> to vector<8x512xf32>
    %230 = arith.mulf %229, %228 : vector<8x512xf32>
    %231 = vector.extract_strided_slice %221 {offsets = [8, 0], sizes = [8, 512], strides = [1, 1]} : vector<40x512xf32> to vector<8x512xf32>
    %232 = arith.mulf %231, %228 : vector<8x512xf32>
    %233 = vector.extract_strided_slice %223 {offsets = [8, 0], sizes = [8, 512], strides = [1, 1]} : vector<40x512xf32> to vector<8x512xf32>
    %234 = arith.addf %232, %233 : vector<8x512xf32>
    %235 = vector.extract_strided_slice %204 {offsets = [8, 0], sizes = [8, 512], strides = [1, 1]} : vector<40x512xf32> to vector<8x512xf32>
    %236 = arith.mulf %235, %234 : vector<8x512xf32>
    %237 = vector.extract_strided_slice %221 {offsets = [16, 0], sizes = [8, 512], strides = [1, 1]} : vector<40x512xf32> to vector<8x512xf32>
    %238 = arith.mulf %237, %234 : vector<8x512xf32>
    %239 = vector.extract_strided_slice %223 {offsets = [16, 0], sizes = [8, 512], strides = [1, 1]} : vector<40x512xf32> to vector<8x512xf32>
    %240 = arith.addf %238, %239 : vector<8x512xf32>
    %241 = vector.extract_strided_slice %204 {offsets = [16, 0], sizes = [8, 512], strides = [1, 1]} : vector<40x512xf32> to vector<8x512xf32>
    %242 = arith.mulf %241, %240 : vector<8x512xf32>
    %243 = vector.extract_strided_slice %221 {offsets = [24, 0], sizes = [8, 512], strides = [1, 1]} : vector<40x512xf32> to vector<8x512xf32>
    %244 = arith.mulf %243, %240 : vector<8x512xf32>
    %245 = vector.extract_strided_slice %223 {offsets = [24, 0], sizes = [8, 512], strides = [1, 1]} : vector<40x512xf32> to vector<8x512xf32>
    %246 = arith.addf %244, %245 : vector<8x512xf32>
    %247 = vector.extract_strided_slice %204 {offsets = [24, 0], sizes = [8, 512], strides = [1, 1]} : vector<40x512xf32> to vector<8x512xf32>
    %248 = arith.mulf %247, %246 : vector<8x512xf32>
    %249 = vector.extract_strided_slice %221 {offsets = [32, 0], sizes = [8, 512], strides = [1, 1]} : vector<40x512xf32> to vector<8x512xf32>
    %250 = arith.mulf %249, %246 : vector<8x512xf32>
    %251 = vector.extract_strided_slice %223 {offsets = [32, 0], sizes = [8, 512], strides = [1, 1]} : vector<40x512xf32> to vector<8x512xf32>
    %252 = arith.addf %250, %251 : vector<8x512xf32>
    %253 = vector.extract_strided_slice %204 {offsets = [32, 0], sizes = [8, 512], strides = [1, 1]} : vector<40x512xf32> to vector<8x512xf32>
    %254 = arith.mulf %253, %252 : vector<8x512xf32>
    %255 = tpu.concatenate %230, %236, %242, %248, %254 in 0 : vector<8x512xf32>, vector<8x512xf32>, vector<8x512xf32>, vector<8x512xf32>, vector<8x512xf32> -> vector<40x512xf32>
    %256 = vector.broadcast %8 : vector<1x64xf32> to vector<40x64xf32>
    %257 = arith.mulf %200, %256 : vector<40x64xf32>
    %c0_73 = arith.constant 0 : index
    %c0_74 = arith.constant 0 : index
    %258 = vector.load %arg9[%c0_73, %c0_74] : memref<512x64xf32, #tpu.memory_space<vmem>>, vector<512x64xf32>
    %cst_75 = arith.constant dense<0.000000e+00> : vector<40x64xf32>
    %259 = tpu.matmul %255, %258, %cst_75 {dimension_numbers = #tpu.dot_dimension_numbers<[1], [0], [0], [1], [0, 0, 1, 1], [], []>} : vector<40x512xf32>, vector<512x64xf32>, vector<40x64xf32> -> vector<40x64xf32>
    %260 = arith.addf %257, %259 : vector<40x64xf32>
    %261 = math.absf %160 : vector<40x64xf32>
    %cst_76 = arith.constant 0.000000e+00 : f32
    %262 = vector.broadcast %cst_76 : f32 to vector<40x64xf32>
    %263 = arith.subf %262, %261 : vector<40x64xf32>
    %264 = math.exp %263 : vector<40x64xf32>
    %cst_77 = arith.constant 1.000000e+00 : f32
    %265 = vector.broadcast %cst_77 : f32 to vector<40x64xf32>
    %266 = arith.addf %265, %264 : vector<40x64xf32>
    %267 = tpu.reciprocal %266 {approx = true} : vector<40x64xf32> -> vector<40x64xf32>
    %268 = arith.mulf %266, %267 : vector<40x64xf32>
    %cst_78 = arith.constant 2.000000e+00 : f32
    %269 = vector.broadcast %cst_78 : f32 to vector<40x64xf32>
    %270 = arith.subf %269, %268 : vector<40x64xf32>
    %271 = arith.mulf %267, %270 : vector<40x64xf32>
    %cst_79 = arith.constant 0.000000e+00 : f32
    %272 = vector.broadcast %cst_79 : f32 to vector<40x64xf32>
    %273 = arith.cmpf oge, %160, %272 : vector<40x64xf32>
    %cst_80 = arith.constant 1.000000e+00 : f32
    %274 = vector.broadcast %cst_80 : f32 to vector<40x64xf32>
    %275 = arith.subf %274, %271 : vector<40x64xf32>
    %276 = arith.select %273, %271, %275 : vector<40x64xi1>, vector<40x64xf32>
    %277 = arith.mulf %160, %276 : vector<40x64xf32>
    %278 = arith.mulf %260, %277 : vector<40x64xf32>
    %c0_81 = arith.constant 0 : index
    %c0_82 = arith.constant 0 : index
    %279 = vector.load %arg10[%c0_81, %c0_82] : memref<64x32xf32, #tpu.memory_space<vmem>>, vector<64x32xf32>
    %cst_83 = arith.constant dense<0.000000e+00> : vector<40x32xf32>
    %280 = tpu.matmul %278, %279, %cst_83 {dimension_numbers = #tpu.dot_dimension_numbers<[1], [0], [0], [1], [0, 0, 1, 1], [], []>} : vector<40x64xf32>, vector<64x32xf32>, vector<40x32xf32> -> vector<40x32xf32>
    %281 = vector.extract_strided_slice %280 {offsets = [0, 0], sizes = [8, 32], strides = [1, 1]} : vector<40x32xf32> to vector<8x32xf32>
    %c0_84 = arith.constant 0 : index
    %c0_85 = arith.constant 0 : index
    %282 = vector.load %arg11[%c0_84, %c0_85] : memref<160x32xf32, #tpu.memory_space<vmem>>, vector<32x32xf32>
    %cst_86 = arith.constant dense<0.000000e+00> : vector<8x32xf32>
    %283 = tpu.matmul %281, %282, %cst_86 {dimension_numbers = #tpu.dot_dimension_numbers<[1], [0], [0], [1], [0, 0, 1, 1], [], []>} : vector<8x32xf32>, vector<32x32xf32>, vector<8x32xf32> -> vector<8x32xf32>
    %284 = vector.broadcast %9 : vector<1x32xf32> to vector<8x32xf32>
    %285 = arith.addf %283, %284 : vector<8x32xf32>
    %286 = vector.extract_strided_slice %280 {offsets = [8, 0], sizes = [8, 32], strides = [1, 1]} : vector<40x32xf32> to vector<8x32xf32>
    %c32 = arith.constant 32 : index
    %c0_87 = arith.constant 0 : index
    %287 = vector.load %arg11[%c32, %c0_87] : memref<160x32xf32, #tpu.memory_space<vmem>>, vector<32x32xf32>
    %cst_88 = arith.constant dense<0.000000e+00> : vector<8x32xf32>
    %288 = tpu.matmul %286, %287, %cst_88 {dimension_numbers = #tpu.dot_dimension_numbers<[1], [0], [0], [1], [0, 0, 1, 1], [], []>} : vector<8x32xf32>, vector<32x32xf32>, vector<8x32xf32> -> vector<8x32xf32>
    %289 = arith.addf %285, %288 : vector<8x32xf32>
    %290 = vector.extract_strided_slice %280 {offsets = [16, 0], sizes = [8, 32], strides = [1, 1]} : vector<40x32xf32> to vector<8x32xf32>
    %c64 = arith.constant 64 : index
    %c0_89 = arith.constant 0 : index
    %291 = vector.load %arg11[%c64, %c0_89] : memref<160x32xf32, #tpu.memory_space<vmem>>, vector<32x32xf32>
    %cst_90 = arith.constant dense<0.000000e+00> : vector<8x32xf32>
    %292 = tpu.matmul %290, %291, %cst_90 {dimension_numbers = #tpu.dot_dimension_numbers<[1], [0], [0], [1], [0, 0, 1, 1], [], []>} : vector<8x32xf32>, vector<32x32xf32>, vector<8x32xf32> -> vector<8x32xf32>
    %293 = arith.addf %289, %292 : vector<8x32xf32>
    %294 = vector.extract_strided_slice %280 {offsets = [24, 0], sizes = [8, 32], strides = [1, 1]} : vector<40x32xf32> to vector<8x32xf32>
    %c96 = arith.constant 96 : index
    %c0_91 = arith.constant 0 : index
    %295 = vector.load %arg11[%c96, %c0_91] : memref<160x32xf32, #tpu.memory_space<vmem>>, vector<32x32xf32>
    %cst_92 = arith.constant dense<0.000000e+00> : vector<8x32xf32>
    %296 = tpu.matmul %294, %295, %cst_92 {dimension_numbers = #tpu.dot_dimension_numbers<[1], [0], [0], [1], [0, 0, 1, 1], [], []>} : vector<8x32xf32>, vector<32x32xf32>, vector<8x32xf32> -> vector<8x32xf32>
    %297 = arith.addf %293, %296 : vector<8x32xf32>
    %298 = vector.extract_strided_slice %280 {offsets = [32, 0], sizes = [8, 32], strides = [1, 1]} : vector<40x32xf32> to vector<8x32xf32>
    %c128 = arith.constant 128 : index
    %c0_93 = arith.constant 0 : index
    %299 = vector.load %arg11[%c128, %c0_93] : memref<160x32xf32, #tpu.memory_space<vmem>>, vector<32x32xf32>
    %cst_94 = arith.constant dense<0.000000e+00> : vector<8x32xf32>
    %300 = tpu.matmul %298, %299, %cst_94 {dimension_numbers = #tpu.dot_dimension_numbers<[1], [0], [0], [1], [0, 0, 1, 1], [], []>} : vector<8x32xf32>, vector<32x32xf32>, vector<8x32xf32> -> vector<8x32xf32>
    %301 = arith.addf %297, %300 : vector<8x32xf32>
    %cst_95 = arith.constant 5.000000e-01 : f32
    %302 = vector.broadcast %cst_95 : f32 to vector<8x32xf32>
    %303 = arith.mulf %302, %301 : vector<8x32xf32>
    %cst_96 = arith.constant 0.707106769 : f32
    %304 = vector.broadcast %cst_96 : f32 to vector<8x32xf32>
    %305 = arith.mulf %301, %304 : vector<8x32xf32>
    %cst_97 = arith.constant 0.000000e+00 : f32
    %306 = vector.broadcast %cst_97 : f32 to vector<8x32xf32>
    %307 = arith.cmpf oge, %305, %306 : vector<8x32xf32>
    %cst_98 = arith.constant 1.000000e+00 : f32
    %cst_99 = arith.constant -1.000000e+00 : f32
    %308 = vector.broadcast %cst_98 : f32 to vector<8x32xf32>
    %309 = vector.broadcast %cst_99 : f32 to vector<8x32xf32>
    %310 = arith.select %307, %308, %309 : vector<8x32xi1>, vector<8x32xf32>
    %311 = math.absf %305 : vector<8x32xf32>
    %cst_100 = arith.constant 0.327591091 : f32
    %312 = vector.broadcast %cst_100 : f32 to vector<8x32xf32>
    %313 = arith.mulf %312, %311 : vector<8x32xf32>
    %cst_101 = arith.constant 1.000000e+00 : f32
    %314 = vector.broadcast %cst_101 : f32 to vector<8x32xf32>
    %315 = arith.addf %314, %313 : vector<8x32xf32>
    %316 = tpu.reciprocal %315 {approx = true} : vector<8x32xf32> -> vector<8x32xf32>
    %317 = arith.mulf %315, %316 : vector<8x32xf32>
    %cst_102 = arith.constant 2.000000e+00 : f32
    %318 = vector.broadcast %cst_102 : f32 to vector<8x32xf32>
    %319 = arith.subf %318, %317 : vector<8x32xf32>
    %320 = arith.mulf %316, %319 : vector<8x32xf32>
    %cst_103 = arith.constant 1.06140542 : f32
    %321 = vector.broadcast %cst_103 : f32 to vector<8x32xf32>
    %322 = arith.mulf %321, %320 : vector<8x32xf32>
    %cst_104 = arith.constant -1.45315206 : f32
    %323 = vector.broadcast %cst_104 : f32 to vector<8x32xf32>
    %324 = arith.addf %322, %323 : vector<8x32xf32>
    %325 = arith.mulf %324, %320 : vector<8x32xf32>
    %cst_105 = arith.constant 1.42141378 : f32
    %326 = vector.broadcast %cst_105 : f32 to vector<8x32xf32>
    %327 = arith.addf %325, %326 : vector<8x32xf32>
    %328 = arith.mulf %327, %320 : vector<8x32xf32>
    %cst_106 = arith.constant -0.284496725 : f32
    %329 = vector.broadcast %cst_106 : f32 to vector<8x32xf32>
    %330 = arith.addf %328, %329 : vector<8x32xf32>
    %331 = arith.mulf %330, %320 : vector<8x32xf32>
    %cst_107 = arith.constant 0.254829586 : f32
    %332 = vector.broadcast %cst_107 : f32 to vector<8x32xf32>
    %333 = arith.addf %331, %332 : vector<8x32xf32>
    %334 = arith.mulf %333, %320 : vector<8x32xf32>
    %cst_108 = arith.constant 0.000000e+00 : f32
    %335 = vector.broadcast %cst_108 : f32 to vector<8x32xf32>
    %336 = arith.subf %335, %311 : vector<8x32xf32>
    %337 = arith.mulf %336, %311 : vector<8x32xf32>
    %338 = math.exp %337 : vector<8x32xf32>
    %339 = arith.mulf %334, %338 : vector<8x32xf32>
    %cst_109 = arith.constant 1.000000e+00 : f32
    %340 = vector.broadcast %cst_109 : f32 to vector<8x32xf32>
    %341 = arith.subf %340, %339 : vector<8x32xf32>
    %342 = arith.mulf %310, %341 : vector<8x32xf32>
    %cst_110 = arith.constant 1.000000e+00 : f32
    %343 = vector.broadcast %cst_110 : f32 to vector<8x32xf32>
    %344 = arith.addf %343, %342 : vector<8x32xf32>
    %345 = arith.mulf %303, %344 : vector<8x32xf32>
    %c0_111 = arith.constant 0 : index
    %c0_112 = arith.constant 0 : index
    %346 = vector.load %arg12[%c0_111, %c0_112] : memref<32x16xf32, #tpu.memory_space<vmem>>, vector<32x16xf32>
    %cst_113 = arith.constant dense<0.000000e+00> : vector<8x16xf32>
    %347 = tpu.matmul %345, %346, %cst_113 {dimension_numbers = #tpu.dot_dimension_numbers<[1], [0], [0], [1], [0, 0, 1, 1], [], []>} : vector<8x32xf32>, vector<32x16xf32>, vector<8x16xf32> -> vector<8x16xf32>
    %348 = vector.broadcast %10 : vector<1x16xf32> to vector<8x16xf32>
    %349 = arith.addf %347, %348 : vector<8x16xf32>
    %350 = tpu.iota {dimensions = array<i32: 0>} : vector<8x8xi32>
    %351 = tpu.iota {dimensions = array<i32: 1>} : vector<8x8xi32>
    %352 = arith.cmpi eq, %350, %351 : vector<8x8xi32>
    %353 = arith.extui %352 : vector<8x8xi1> to vector<8x8xi32>
    %354 = arith.sitofp %353 : vector<8x8xi32> to vector<8x8xf32>
    %cst_114 = arith.constant dense<0.000000e+00> : vector<16x8xf32>
    %355 = tpu.matmul %349, %354, %cst_114 {dimension_numbers = #tpu.dot_dimension_numbers<[0], [0], [1], [1], [0, 1, 1, 1], [], []>} : vector<8x16xf32>, vector<8x8xf32>, vector<16x8xf32> -> vector<16x8xf32>
    %356 = vector.broadcast %2 : vector<1x8xf32> to vector<16x8xf32>
    %357 = arith.subf %355, %356 : vector<16x8xf32>
    %cst_115 = arith.constant 1.000000e-10 : f32
    %358 = vector.broadcast %cst_115 : f32 to vector<1x8xf32>
    %359 = arith.addf %1, %358 : vector<1x8xf32>
    %360 = tpu.reciprocal %359 {approx = true} : vector<1x8xf32> -> vector<1x8xf32>
    %361 = arith.mulf %359, %360 : vector<1x8xf32>
    %cst_116 = arith.constant 2.000000e+00 : f32
    %362 = vector.broadcast %cst_116 : f32 to vector<1x8xf32>
    %363 = arith.subf %362, %361 : vector<1x8xf32>
    %364 = arith.mulf %360, %363 : vector<1x8xf32>
    %365 = vector.broadcast %364 : vector<1x8xf32> to vector<16x8xf32>
    %366 = arith.mulf %357, %365 : vector<16x8xf32>
    %367 = vector.broadcast %30 : vector<1x8xf32> to vector<16x8xf32>
    %368 = arith.mulf %366, %367 : vector<16x8xf32>
    %369 = vector.broadcast %20 : vector<1x8xf32> to vector<16x8xf32>
    %370 = arith.addf %368, %369 : vector<16x8xf32>
    %371 = vector.extract_strided_slice %370 {offsets = [0, 0], sizes = [16, 4], strides = [1, 1]} : vector<16x8xf32> to vector<16x4xf32>
    %c0_117 = arith.constant 0 : index
    %c0_118 = arith.constant 0 : index
    %c0_119 = arith.constant 0 : index
    %372 = vector.load %arg13[%c0_117, %c0_118, %c0_119] : memref<2x16x4xf32, #tpu.memory_space<vmem>>, vector<1x16x4xf32>
    %373 = vector.shape_cast %372 : vector<1x16x4xf32> to vector<16x4xf32>
    %374 = vector.shape_cast %371 : vector<16x4xf32> to vector<1x16x4xf32>
    tpu.vector_store %arg13[%c0_117, %c0_118, %c0_119], %374 {strides = array<i32>} : memref<2x16x4xf32, #tpu.memory_space<vmem>>, vector<1x16x4xf32>,
    %375 = vector.extract_strided_slice %370 {offsets = [0, 4], sizes = [16, 4], strides = [1, 1]} : vector<16x8xf32> to vector<16x4xf32>
    %c1_120 = arith.constant 1 : index
    %c0_121 = arith.constant 0 : index
    %c0_122 = arith.constant 0 : index
    %376 = vector.load %arg13[%c1_120, %c0_121, %c0_122] : memref<2x16x4xf32, #tpu.memory_space<vmem>>, vector<1x16x4xf32>
    %377 = vector.shape_cast %376 : vector<1x16x4xf32> to vector<16x4xf32>
    %378 = vector.shape_cast %375 : vector<16x4xf32> to vector<1x16x4xf32>
    tpu.vector_store %arg13[%c1_120, %c0_121, %c0_122], %378 {strides = array<i32>} : memref<2x16x4xf32, #tpu.memory_space<vmem>>, vector<1x16x4xf32>,
    return
  }
  func.func @transform_0(%arg0: i32) -> (i32, i32, i32) {
    %c0_i32 = arith.constant 0 : i32
    %c0_i32_0 = arith.constant 0 : i32
    %c0_i32_1 = arith.constant 0 : i32
    return %arg0, %c0_i32, %c0_i32_0 : i32, i32, i32
  }
  func.func @transform_1(%arg0: i32) -> (i32, i32) {
    %c0_i32 = arith.constant 0 : i32
    %c0_i32_0 = arith.constant 0 : i32
    %c0_i32_1 = arith.constant 0 : i32
    return %c0_i32, %c0_i32_0 : i32, i32
  }
  func.func @transform_2(%arg0: i32) -> (i32, i32) {
    %c0_i32 = arith.constant 0 : i32
    %c0_i32_0 = arith.constant 0 : i32
    %c0_i32_1 = arith.constant 0 : i32
    return %c0_i32, %c0_i32_0 : i32, i32
  }
  func.func @transform_3(%arg0: i32) -> (i32, i32) {
    %c0_i32 = arith.constant 0 : i32
    %c0_i32_0 = arith.constant 0 : i32
    %c0_i32_1 = arith.constant 0 : i32
    return %c0_i32, %c0_i32_0 : i32, i32
  }
  func.func @transform_4(%arg0: i32) -> (i32, i32) {
    %c0_i32 = arith.constant 0 : i32
    %c0_i32_0 = arith.constant 0 : i32
    %c0_i32_1 = arith.constant 0 : i32
    return %c0_i32, %c0_i32_0 : i32, i32
  }
  func.func @transform_5(%arg0: i32) -> (i32, i32) {
    %c0_i32 = arith.constant 0 : i32
    %c0_i32_0 = arith.constant 0 : i32
    %c0_i32_1 = arith.constant 0 : i32
    return %c0_i32, %c0_i32_0 : i32, i32
  }
  func.func @transform_6(%arg0: i32) -> (i32, i32) {
    %c0_i32 = arith.constant 0 : i32
    %c0_i32_0 = arith.constant 0 : i32
    %c0_i32_1 = arith.constant 0 : i32
    return %c0_i32, %c0_i32_0 : i32, i32
  }
  func.func @transform_7(%arg0: i32) -> (i32, i32) {
    %c0_i32 = arith.constant 0 : i32
    %c0_i32_0 = arith.constant 0 : i32
    %c0_i32_1 = arith.constant 0 : i32
    return %c0_i32, %c0_i32_0 : i32, i32
  }
  func.func @transform_8(%arg0: i32) -> (i32, i32) {
    %c0_i32 = arith.constant 0 : i32
    %c0_i32_0 = arith.constant 0 : i32
    %c0_i32_1 = arith.constant 0 : i32
    return %c0_i32, %c0_i32_0 : i32, i32
  }
  func.func @transform_9(%arg0: i32) -> (i32, i32) {
    %c0_i32 = arith.constant 0 : i32
    %c0_i32_0 = arith.constant 0 : i32
    %c0_i32_1 = arith.constant 0 : i32
    return %c0_i32, %c0_i32_0 : i32, i32
  }
  func.func @transform_10(%arg0: i32) -> (i32, i32) {
    %c0_i32 = arith.constant 0 : i32
    %c0_i32_0 = arith.constant 0 : i32
    %c0_i32_1 = arith.constant 0 : i32
    return %c0_i32, %c0_i32_0 : i32, i32
  }
  func.func @transform_11(%arg0: i32) -> (i32, i32) {
    %c0_i32 = arith.constant 0 : i32
    %c0_i32_0 = arith.constant 0 : i32
    %c0_i32_1 = arith.constant 0 : i32
    return %c0_i32, %c0_i32_0 : i32, i32
  }
  func.func @transform_12(%arg0: i32) -> (i32, i32, i32) {
    %c0_i32 = arith.constant 0 : i32
    %c0_i32_0 = arith.constant 0 : i32
    %c0_i32_1 = arith.constant 0 : i32
    return %arg0, %c0_i32, %c0_i32_0 : i32, i32, i32
  }
}

</mosaic_0001>

<bundles_post_ra>
// kernel: tile.24
= control target key start
LH: loop header
LB: loop body
LE: loop exit
PB: predicated region body
PF: predicated region fallthrough
CT: control target
= control target key end

     0   :  { %vm228_vm0 = vcmask 1047556   ;;  %s765_s14 = smov 64   ;;  %vm3_vm1 = vcmask 523264   ;;  %vm232_vm2 = vcmask 1048064   ;;  %s1512_s0 = inlined_call_operand.vmem [shape: f32[64,8,64], index: 0, kind: input, shape index: {}]   ;;  %s1513_s1 = inlined_call_operand.vmem [shape: f32[64,512], index: 1, kind: output, shape index: {}]  }
   0x1   :  { %v674_v0 = vld [vmem:[%s1512_s0 + $0x81] ss:$8 sm:$0xf]   ;;  %v695_v24 = vld [vmem:[%s1512_s0 + $0x43] ss:$8 sm:$0xf]  }
   0x2   :  { %v675_v1 = vld [vmem:[%s1512_s0 + $0x81] ss:$8 sm:$0xf0]   ;;  %v696_v25 = vld [vmem:[%s1512_s0 + $0x43] ss:$8 sm:$0xf0]  }
   0x3   :  { %v250_v2 = vsel %vm228_vm0, %v675_v1, %v674_v0  ;;  %v669_v3 = vld [vmem:[%s1512_s0 + $0x1] ss:$8 sm:$0xf]   ;;  %v692_v26 = vld [vmem:[%s1512_s0 + $0x3] ss:$8 sm:$0xf]   ;;  %v327_v28 = vsel %vm228_vm0, %v696_v25, %v695_v24 }
   0x4   :  { %v670_v4 = vld [vmem:[%s1512_s0 + $0x1] ss:$8 sm:$0xf0]   ;;  %251 = vrot.lane.b32.xlu1 %v250_v2, %s765_s14  ;;  %v693_v27 = vld [vmem:[%s1512_s0 + $0x3] ss:$8 sm:$0xf0]  }
   0x5   :  { %v229_v5 = vsel %vm228_vm0, %v670_v4, %v669_v3  ;;  %v677_v6 = vld [vmem:[%s1512_s0 + $0xc1] ss:$8 sm:$0xf]   ;;  %v316_v29 = vsel %vm228_vm0, %v693_v27, %v692_v26  ;;  %v701_v30 = vld [vmem:[%s1512_s0 + $0xc3] ss:$8 sm:$0xf]  }
   0x6   :  { %v678_v7 = vld [vmem:[%s1512_s0 + $0xc1] ss:$8 sm:$0xf0]   ;;  %230 = vrot.lane.b32.xlu0 %v229_v5, %s765_s14  ;;  %v702_v31 = vld [vmem:[%s1512_s0 + $0xc3] ss:$8 sm:$0xf0]  }
   0x7   :  { %v261_v8 = vsel %vm228_vm0, %v678_v7, %v677_v6  ;;  %v671_v9 = vld [vmem:[%s1512_s0 + $0x41] ss:$8 sm:$0xf]   ;;  %v698_v32 = vld [vmem:[%s1512_s0 + $0x83] ss:$8 sm:$0xf]   ;;  %v349_v34 = vsel %vm228_vm0, %v702_v31, %v701_v30 }
   0x8   :  { %v672_v10 = vld [vmem:[%s1512_s0 + $0x41] ss:$8 sm:$0xf0]   ;;  %262 = vrot.lane.b32.xlu1 %v261_v8, %s765_s14  ;;  %v699_v33 = vld [vmem:[%s1512_s0 + $0x83] ss:$8 sm:$0xf0]  }
   0x9   :  { %v239_v11 = vsel %vm228_vm0, %v672_v10, %v671_v9  ;;  %v683_v12 = vld [vmem:[%s1512_s0 + $0x141] ss:$8 sm:$0xf]   ;;  %v338_v35 = vsel %vm228_vm0, %v699_v33, %v698_v32  ;;  %v707_v36 = vld [vmem:[%s1512_s0 + $0x143] ss:$8 sm:$0xf]  }
   0xa   :  { %v684_v13 = vld [vmem:[%s1512_s0 + $0x141] ss:$8 sm:$0xf0]   ;;  %240 = vrot.lane.b32.xlu0 %v239_v11, %s765_s14  ;;  %v708_v37 = vld [vmem:[%s1512_s0 + $0x143] ss:$8 sm:$0xf0]  }
   0xb   :  { %v680_v14 = vld [vmem:[%s1512_s0 + $0x101] ss:$8 sm:$0xf]   ;;  %v283_v16 = vsel %vm228_vm0, %v684_v13, %v683_v12  ;;  %v704_v38 = vld [vmem:[%s1512_s0 + $0x103] ss:$8 sm:$0xf]   ;;  %v371_v40 = vsel %vm228_vm0, %v708_v37, %v707_v36 }
   0xc   :  { %v681_v15 = vld [vmem:[%s1512_s0 + $0x101] ss:$8 sm:$0xf0]   ;;  %284 = vrot.lane.b32.xlu1 %v283_v16, %s765_s14  ;;  %v705_v39 = vld [vmem:[%s1512_s0 + $0x103] ss:$8 sm:$0xf0]  }
   0xd   :  { %v272_v17 = vsel %vm228_vm0, %v681_v15, %v680_v14  ;;  %v689_v18 = vld [vmem:[%s1512_s0 + $0x1c1] ss:$8 sm:$0xf]   ;;  %v360_v41 = vsel %vm228_vm0, %v705_v39, %v704_v38  ;;  %v713_v42 = vld [vmem:[%s1512_s0 + $0x1c3] ss:$8 sm:$0xf]  }
   0xe   :  { %v690_v19 = vld [vmem:[%s1512_s0 + $0x1c1] ss:$8 sm:$0xf0]   ;;  %273 = vrot.lane.b32.xlu0 %v272_v17, %s765_s14  ;;  %v714_v43 = vld [vmem:[%s1512_s0 + $0x1c3] ss:$8 sm:$0xf0]  }
   0xf   :  { %v686_v20 = vld [vmem:[%s1512_s0 + $0x181] ss:$8 sm:$0xf]   ;;  %v305_v22 = vsel %vm228_vm0, %v690_v19, %v689_v18  ;;  %v710_v44 = vld [vmem:[%s1512_s0 + $0x183] ss:$8 sm:$0xf]   ;;  %v393_v46 = vsel %vm228_vm0, %v714_v43, %v713_v42 }
  0x10   :  { %v687_v21 = vld [vmem:[%s1512_s0 + $0x181] ss:$8 sm:$0xf0]   ;;  %306 = vrot.lane.b32.xlu1 %v305_v22, %s765_s14  ;;  %v711_v45 = vld [vmem:[%s1512_s0 + $0x183] ss:$8 sm:$0xf0]  }
  0x11   :  { %v294_v23 = vsel %vm228_vm0, %v687_v21, %v686_v20  ;;  %v382_v47 = vsel %vm228_vm0, %v711_v45, %v710_v44  ;;  %v719_v48 = vld [vmem:[%s1512_s0 + $0x45] ss:$8 sm:$0xf]   ;;  %v597_v58 = vld [vmem:[%s1512_s0 + $0x80] ss:$2 sm:$0xff]  }
  0x12   :  { %295 = vrot.lane.b32.xlu0 %v294_v23, %s765_s14  ;;  %v720_v49 = vld [vmem:[%s1512_s0 + $0x45] ss:$8 sm:$0xf0]   ;;  %v600_v59 = vld [vmem:[%s1512_s0 + $0x90] ss:$2 sm:$0xff]  }
  0x13   :  { %v716_v50 = vld [vmem:[%s1512_s0 + $0x5] ss:$8 sm:$0xf]   ;;  %v415_v54 = vsel %vm228_vm0, %v720_v49, %v719_v48  ;;  %v603_v60 = vld [vmem:[%s1512_s0 + $0xa0] ss:$2 sm:$0xff]  }
  0x14   :  { %328 = vrot.lane.b32.xlu1 %v327_v28, %s765_s14  ;;  %v717_v51 = vld [vmem:[%s1512_s0 + $0x5] ss:$8 sm:$0xf0]   ;;  %598 = vst.msk [vmem:[%s1513_s1 + $0x40] ss:$8 sm:$0xf] %vm3_vm1, %v597_v58  }
  0x15   :  { %v725_v52 = vld [vmem:[%s1512_s0 + $0xc5] ss:$8 sm:$0xf]   ;;  %v404_v57 = vsel %vm228_vm0, %v717_v51, %v716_v50  ;;  %599 = vst.msk [vmem:[%s1513_s1 + $0x21] ss:$8 sm:$0xf0] %vm3_vm1, %v597_v58  }
  0x16   :  { %317 = vrot.lane.b32.xlu0 %v316_v29, %s765_s14  ;;  %v726_v53 = vld [vmem:[%s1512_s0 + $0xc5] ss:$8 sm:$0xf0]   ;;  %601 = vst.msk [vmem:[%s1513_s1 + $0x42] ss:$8 sm:$0xf] %vm3_vm1, %v600_v59  }
  0x17   :  { %v722_v55 = vld [vmem:[%s1512_s0 + $0x85] ss:$8 sm:$0xf]   ;;  %602 = vst.msk [vmem:[%s1513_s1 + $0x23] ss:$8 sm:$0xf0] %vm3_vm1, %v600_v59   ;;  %v437_v5 = vsel %vm228_vm0, %v726_v53, %v725_v52 }
  0x18   :  { %350 = vrot.lane.b32.xlu1 %v349_v34, %s765_s14  ;;  %v723_v56 = vld [vmem:[%s1512_s0 + $0x85] ss:$8 sm:$0xf0]   ;;  %604 = vst.msk [vmem:[%s1513_s1 + $0x44] ss:$8 sm:$0xf] %vm3_vm1, %v603_v60  }
  0x19   :  { %605 = vst.msk [vmem:[%s1513_s1 + $0x25] ss:$8 sm:$0xf0] %vm3_vm1, %v603_v60   ;;  %v606_v61 = vld [vmem:[%s1512_s0 + $0xb0] ss:$2 sm:$0xff]   ;;  %v426_v11 = vsel %vm228_vm0, %v723_v56, %v722_v55 }
  0x1a   :  { %339 = vrot.lane.b32.xlu0 %v338_v35, %s765_s14  ;;  %v2_v62 = vld [vmem:[%s1512_s0] ss:$2 sm:$0xff]   ;;  %v576_v63 = vld [vmem:[%s1512_s0 + $0x10] ss:$2 sm:$0xff]  }
  0x1b   :  { %v731_v0 = vld [vmem:[%s1512_s0 + $0x145] ss:$8 sm:$0xf]   ;;  %607 = vst.msk [vmem:[%s1513_s1 + $0x46] ss:$8 sm:$0xf] %vm3_vm1, %v606_v61  }
  0x1c   :  { %372 = vrot.lane.b32.xlu1 %v371_v40, %s765_s14  ;;  %v732_v1 = vld [vmem:[%s1512_s0 + $0x145] ss:$8 sm:$0xf0]   ;;  %608 = vst.msk [vmem:[%s1513_s1 + $0x27] ss:$8 sm:$0xf0] %vm3_vm1, %v606_v61  }
  0x1d   :  { %4 = vst.msk [vmem:[%s1513_s1] ss:$8 sm:$0xf] %vm3_vm1, %v2_v62   ;;  %575 = vst.msk [vmem:[%s1513_s1 - $0x1f] ss:$8 sm:$0xf0] %vm3_vm1, %v2_v62   ;;  %v459_v23 = vsel %vm228_vm0, %v732_v1, %v731_v0 }
  0x1e   :  { %361 = vrot.lane.b32.xlu0 %v360_v41, %s765_s14  ;;  %577 = vst.msk [vmem:[%s1513_s1 + $0x2] ss:$8 sm:$0xf] %vm3_vm1, %v576_v63   ;;  %578 = vst.msk [vmem:[%s1513_s1 - $0x1d] ss:$8 sm:$0xf0] %vm3_vm1, %v576_v63  }
  0x1f   :  { %v579_v2 = vld [vmem:[%s1512_s0 + $0x20] ss:$2 sm:$0xff]   ;;  %v582_v3 = vld [vmem:[%s1512_s0 + $0x30] ss:$2 sm:$0xff]  }
  0x20   :  { %394 = vrot.lane.b32.xlu1 %v393_v46, %s765_s14  ;;  %v609_v4 = vld [vmem:[%s1512_s0 + $0xc0] ss:$2 sm:$0xff]   ;;  %v728_v6 = vld [vmem:[%s1512_s0 + $0x105] ss:$8 sm:$0xf]  }
  0x21   :  { %v729_v7 = vld [vmem:[%s1512_s0 + $0x105] ss:$8 sm:$0xf0]   ;;  %580 = vst.msk [vmem:[%s1513_s1 + $0x4] ss:$8 sm:$0xf] %vm3_vm1, %v579_v2  }
  0x22   :  { %383 = vrot.lane.b32.xlu0 %v382_v47, %s765_s14  ;;  %581 = vst.msk [vmem:[%s1513_s1 - $0x1b] ss:$8 sm:$0xf0] %vm3_vm1, %v579_v2   ;;  %583 = vst.msk [vmem:[%s1513_s1 + $0x6] ss:$8 sm:$0xf] %vm3_vm1, %v582_v3   ;;  %v448_v29 = vsel %vm228_vm0, %v729_v7, %v728_v6 }
  0x23   :  { %584 = vst.msk [vmem:[%s1513_s1 - $0x19] ss:$8 sm:$0xf0] %vm3_vm1, %v582_v3   ;;  %610 = vst.msk [vmem:[%s1513_s1 + $0x60] ss:$8 sm:$0xf] %vm3_vm1, %v609_v4  }
  0x24   :  { %416 = vrot.lane.b32.xlu1 %v415_v54, %s765_s14  ;;  %611 = vst.msk [vmem:[%s1513_s1 + $0x41] ss:$8 sm:$0xf0] %vm3_vm1, %v609_v4   ;;  %v612_v8 = vld [vmem:[%s1512_s0 + $0xd0] ss:$2 sm:$0xff]  }
  0x25   :  { %v615_v9 = vld [vmem:[%s1512_s0 + $0xe0] ss:$2 sm:$0xff]   ;;  %v618_v10 = vld [vmem:[%s1512_s0 + $0xf0] ss:$2 sm:$0xff]  }
  0x26   :  { %405 = vrot.lane.b32.xlu0 %v404_v57, %s765_s14  ;;  %613 = vst.msk [vmem:[%s1513_s1 + $0x62] ss:$8 sm:$0xf] %vm3_vm1, %v612_v8   ;;  %614 = vst.msk [vmem:[%s1513_s1 + $0x43] ss:$8 sm:$0xf0] %vm3_vm1, %v612_v8  }
  0x27   :  { %616 = vst.msk [vmem:[%s1513_s1 + $0x64] ss:$8 sm:$0xf] %vm3_vm1, %v615_v9   ;;  %617 = vst.msk [vmem:[%s1513_s1 + $0x45] ss:$8 sm:$0xf0] %vm3_vm1, %v615_v9  }
  0x28   :  { %619 = vst.msk [vmem:[%s1513_s1 + $0x66] ss:$8 sm:$0xf] %vm3_vm1, %v618_v10   ;;  %620 = vst.msk [vmem:[%s1513_s1 + $0x47] ss:$8 sm:$0xf0] %vm3_vm1, %v618_v10   ;;  %438 = vrot.lane.b32.xlu1 %v437_v5, %s765_s14 }
  0x29   :  { %v585_v12 = vld [vmem:[%s1512_s0 + $0x40] ss:$2 sm:$0xff]   ;;  %v588_v13 = vld [vmem:[%s1512_s0 + $0x50] ss:$2 sm:$0xff]  }
  0x2a   :  { %v591_v14 = vld [vmem:[%s1512_s0 + $0x60] ss:$2 sm:$0xff]   ;;  %586 = vst.msk [vmem:[%s1513_s1 + $0x20] ss:$8 sm:$0xf] %vm3_vm1, %v585_v12   ;;  %427 = vrot.lane.b32.xlu0 %v426_v11, %s765_s14 }
  0x2b   :  { %587 = vst.msk [vmem:[%s1513_s1 + $0x1] ss:$8 sm:$0xf0] %vm3_vm1, %v585_v12   ;;  %589 = vst.msk [vmem:[%s1513_s1 + $0x22] ss:$8 sm:$0xf] %vm3_vm1, %v588_v13  }
  0x2c   :  { %590 = vst.msk [vmem:[%s1513_s1 + $0x3] ss:$8 sm:$0xf0] %vm3_vm1, %v588_v13   ;;  %592 = vst.msk [vmem:[%s1513_s1 + $0x24] ss:$8 sm:$0xf] %vm3_vm1, %v591_v14   ;;  %460 = vrot.lane.b32.xlu1 %v459_v23, %s765_s14 }
  0x2d   :  { %593 = vst.msk [vmem:[%s1513_s1 + $0x5] ss:$8 sm:$0xf0] %vm3_vm1, %v591_v14   ;;  %v594_v15 = vld [vmem:[%s1512_s0 + $0x70] ss:$2 sm:$0xff]  }
  0x2e   :  { %v633_v16 = vld [vmem:[%s1512_s0 + $0x140] ss:$2 sm:$0xff]   ;;  %v636_v17 = vld [vmem:[%s1512_s0 + $0x150] ss:$2 sm:$0xff]   ;;  %449 = vrot.lane.b32.xlu0 %v448_v29, %s765_s14 }
  0x2f   :  { %v737_v18 = vld [vmem:[%s1512_s0 + $0x1c5] ss:$8 sm:$0xf]   ;;  %595 = vst.msk [vmem:[%s1513_s1 + $0x26] ss:$8 sm:$0xf] %vm3_vm1, %v594_v15  }
  0x30   :  { %v738_v19 = vld [vmem:[%s1512_s0 + $0x1c5] ss:$8 sm:$0xf0]   ;;  %596 = vst.msk [vmem:[%s1513_s1 + $0x7] ss:$8 sm:$0xf0] %vm3_vm1, %v594_v15  }
  0x31   :  { %634 = vst.msk [vmem:[%s1513_s1 + $0xa0] ss:$8 sm:$0xf] %vm3_vm1, %v633_v16   ;;  %635 = vst.msk [vmem:[%s1513_s1 + $0x81] ss:$8 sm:$0xf0] %vm3_vm1, %v633_v16   ;;  %v481_v38 = vsel %vm228_vm0, %v738_v19, %v737_v18 }
  0x32   :  { %637 = vst.msk [vmem:[%s1513_s1 + $0xa2] ss:$8 sm:$0xf] %vm3_vm1, %v636_v17   ;;  %638 = vst.msk [vmem:[%s1513_s1 + $0x83] ss:$8 sm:$0xf0] %vm3_vm1, %v636_v17   ;;  %482 = vrot.lane.b32.xlu1 %v481_v38, %s765_s14 }
  0x33   :  { %v639_v20 = vld [vmem:[%s1512_s0 + $0x160] ss:$2 sm:$0xff]   ;;  %v642_v21 = vld [vmem:[%s1512_s0 + $0x170] ss:$2 sm:$0xff]  }
  0x34   :  { %v621_v22 = vld [vmem:[%s1512_s0 + $0x100] ss:$2 sm:$0xff]   ;;  %v734_v24 = vld [vmem:[%s1512_s0 + $0x185] ss:$8 sm:$0xf]  }
  0x35   :  { %v735_v25 = vld [vmem:[%s1512_s0 + $0x185] ss:$8 sm:$0xf0]   ;;  %640 = vst.msk [vmem:[%s1513_s1 + $0xa4] ss:$8 sm:$0xf] %vm3_vm1, %v639_v20  }
  0x36   :  { %641 = vst.msk [vmem:[%s1513_s1 + $0x85] ss:$8 sm:$0xf0] %vm3_vm1, %v639_v20   ;;  %643 = vst.msk [vmem:[%s1513_s1 + $0xa6] ss:$8 sm:$0xf] %vm3_vm1, %v642_v21   ;;  %v470_v39 = vsel %vm228_vm0, %v735_v25, %v734_v24 }
  0x37   :  { %644 = vst.msk [vmem:[%s1513_s1 + $0x87] ss:$8 sm:$0xf0] %vm3_vm1, %v642_v21   ;;  %622 = vst.msk [vmem:[%s1513_s1 + $0x80] ss:$8 sm:$0xf] %vm3_vm1, %v621_v22   ;;  %471 = vrot.lane.b32.xlu0 %v470_v39, %s765_s14 }
  0x38   :  { %623 = vst.msk [vmem:[%s1513_s1 + $0x61] ss:$8 sm:$0xf0] %vm3_vm1, %v621_v22   ;;  %v624_v26 = vld [vmem:[%s1512_s0 + $0x110] ss:$2 sm:$0xff]  }
  0x39   :  { %v627_v27 = vld [vmem:[%s1512_s0 + $0x120] ss:$2 sm:$0xff]   ;;  %v630_v28 = vld [vmem:[%s1512_s0 + $0x130] ss:$2 sm:$0xff]  }
  0x3a   :  { %625 = vst.msk [vmem:[%s1513_s1 + $0x82] ss:$8 sm:$0xf] %vm3_vm1, %v624_v26   ;;  %626 = vst.msk [vmem:[%s1513_s1 + $0x63] ss:$8 sm:$0xf0] %vm3_vm1, %v624_v26  }
  0x3b   :  { %628 = vst.msk [vmem:[%s1513_s1 + $0x84] ss:$8 sm:$0xf] %vm3_vm1, %v627_v27   ;;  %629 = vst.msk [vmem:[%s1513_s1 + $0x65] ss:$8 sm:$0xf0] %vm3_vm1, %v627_v27  }
  0x3c   :  { %631 = vst.msk [vmem:[%s1513_s1 + $0x86] ss:$8 sm:$0xf] %vm3_vm1, %v630_v28   ;;  %632 = vst.msk [vmem:[%s1513_s1 + $0x67] ss:$8 sm:$0xf0] %vm3_vm1, %v630_v28  }
  0x3d   :  { %v657_v30 = vld [vmem:[%s1512_s0 + $0x1c0] ss:$2 sm:$0xff]   ;;  %v660_v31 = vld [vmem:[%s1512_s0 + $0x1d0] ss:$2 sm:$0xff]  }
  0x3e   :  { %v663_v32 = vld [vmem:[%s1512_s0 + $0x1e0] ss:$2 sm:$0xff]   ;;  %658 = vst.msk [vmem:[%s1513_s1 + $0xe0] ss:$8 sm:$0xf] %vm3_vm1, %v657_v30  }
  0x3f   :  { %659 = vst.msk [vmem:[%s1513_s1 + $0xc1] ss:$8 sm:$0xf0] %vm3_vm1, %v657_v30   ;;  %661 = vst.msk [vmem:[%s1513_s1 + $0xe2] ss:$8 sm:$0xf] %vm3_vm1, %v660_v31  }
  0x40   :  { %662 = vst.msk [vmem:[%s1513_s1 + $0xc3] ss:$8 sm:$0xf0] %vm3_vm1, %v660_v31   ;;  %664 = vst.msk [vmem:[%s1513_s1 + $0xe4] ss:$8 sm:$0xf] %vm3_vm1, %v663_v32  }
  0x41   :  { %665 = vst.msk [vmem:[%s1513_s1 + $0xc5] ss:$8 sm:$0xf0] %vm3_vm1, %v663_v32   ;;  %v666_v33 = vld [vmem:[%s1512_s0 + $0x1f0] ss:$2 sm:$0xff]  }
  0x42   :  { %v645_v34 = vld [vmem:[%s1512_s0 + $0x180] ss:$2 sm:$0xff]   ;;  %v648_v35 = vld [vmem:[%s1512_s0 + $0x190] ss:$2 sm:$0xff]  }
  0x43   :  { %667 = vst.msk [vmem:[%s1513_s1 + $0xe6] ss:$8 sm:$0xf] %vm3_vm1, %v666_v33   ;;  %668 = vst.msk [vmem:[%s1513_s1 + $0xc7] ss:$8 sm:$0xf0] %vm3_vm1, %v666_v33  }
  0x44   :  { %646 = vst.msk [vmem:[%s1513_s1 + $0xc0] ss:$8 sm:$0xf] %vm3_vm1, %v645_v34   ;;  %647 = vst.msk [vmem:[%s1513_s1 + $0xa1] ss:$8 sm:$0xf0] %vm3_vm1, %v645_v34  }
  0x45   :  { %649 = vst.msk [vmem:[%s1513_s1 + $0xc2] ss:$8 sm:$0xf] %vm3_vm1, %v648_v35   ;;  %650 = vst.msk [vmem:[%s1513_s1 + $0xa3] ss:$8 sm:$0xf0] %vm3_vm1, %v648_v35  }
  0x46   :  { %v651_v36 = vld [vmem:[%s1512_s0 + $0x1a0] ss:$2 sm:$0xff]   ;;  %v654_v37 = vld [vmem:[%s1512_s0 + $0x1b0] ss:$2 sm:$0xff]  }
  0x47   :  { %652 = vst.msk [vmem:[%s1513_s1 + $0xc4] ss:$8 sm:$0xf] %vm3_vm1, %v651_v36   ;;  %653 = vst.msk [vmem:[%s1513_s1 + $0xa5] ss:$8 sm:$0xf0] %vm3_vm1, %v651_v36  }
  0x48   :  { %655 = vst.msk [vmem:[%s1513_s1 + $0xc6] ss:$8 sm:$0xf] %vm3_vm1, %v654_v37   ;;  %656 = vst.msk [vmem:[%s1513_s1 + $0xa7] ss:$8 sm:$0xf0] %vm3_vm1, %v654_v37  }
  0x49   :  { %v743_v40 = vld [vmem:[%s1512_s0 + $0x47] ss:$8 sm:$0xf]  }
  0x4a   :  { %v744_v41 = vld [vmem:[%s1512_s0 + $0x47] ss:$8 sm:$0xf0]  }
  0x4b   :  { %v740_v42 = vld [vmem:[%s1512_s0 + $0x7] ss:$8 sm:$0xf]   ;;  %v503_v44 = vsel %vm228_vm0, %v744_v41, %v743_v40 }
  0x4c   :  { %v741_v43 = vld [vmem:[%s1512_s0 + $0x7] ss:$8 sm:$0xf0]   ;;  %504 = vrot.lane.b32.xlu1 %v503_v44, %s765_s14 }
  0x4d   :  { %v492_v45 = vsel %vm228_vm0, %v741_v43, %v740_v42  ;;  %v749_v46 = vld [vmem:[%s1512_s0 + $0xc7] ss:$8 sm:$0xf]  }
  0x4e   :  { %v750_v47 = vld [vmem:[%s1512_s0 + $0xc7] ss:$8 sm:$0xf0]   ;;  %493 = vrot.lane.b32.xlu0 %v492_v45, %s765_s14 }
  0x4f   :  { %v746_v48 = vld [vmem:[%s1512_s0 + $0x87] ss:$8 sm:$0xf]   ;;  %v525_v50 = vsel %vm228_vm0, %v750_v47, %v749_v46 }
  0x50   :  { %v747_v49 = vld [vmem:[%s1512_s0 + $0x87] ss:$8 sm:$0xf0]   ;;  %526 = vrot.lane.b32.xlu1 %v525_v50, %s765_s14 }
  0x51   :  { %v514_v51 = vsel %vm228_vm0, %v747_v49, %v746_v48  ;;  %v755_v52 = vld [vmem:[%s1512_s0 + $0x147] ss:$8 sm:$0xf]  }
  0x52   :  { %v756_v53 = vld [vmem:[%s1512_s0 + $0x147] ss:$8 sm:$0xf0]   ;;  %515 = vrot.lane.b32.xlu0 %v514_v51, %s765_s14 }
  0x53   :  { %v752_v54 = vld [vmem:[%s1512_s0 + $0x107] ss:$8 sm:$0xf]   ;;  %v547_v56 = vsel %vm228_vm0, %v756_v53, %v755_v52 }
  0x54   :  { %v753_v55 = vld [vmem:[%s1512_s0 + $0x107] ss:$8 sm:$0xf0]   ;;  %548 = vrot.lane.b32.xlu1 %v547_v56, %s765_s14 }
  0x55   :  { %v536_v57 = vsel %vm228_vm0, %v753_v55, %v752_v54  ;;  %v761_v58 = vld [vmem:[%s1512_s0 + $0x1c7] ss:$8 sm:$0xf]  }
  0x56   :  { %v762_v59 = vld [vmem:[%s1512_s0 + $0x1c7] ss:$8 sm:$0xf0]   ;;  %537 = vrot.lane.b32.xlu0 %v536_v57, %s765_s14 }
  0x57   :  { %v758_v60 = vld [vmem:[%s1512_s0 + $0x187] ss:$8 sm:$0xf]   ;;  %v569_v62 = vsel %vm228_vm0, %v762_v59, %v761_v58 }
  0x58   :  { %v759_v61 = vld [vmem:[%s1512_s0 + $0x187] ss:$8 sm:$0xf0]   ;;  %570 = vrot.lane.b32.xlu1 %v569_v62, %s765_s14 }
  0x59   :  { %v558_v63 = vsel %vm228_vm0, %v759_v61, %v758_v60 }
  0x5a   :  { %559 = vrot.lane.b32.xlu0 %v558_v63, %s765_s14 }
  0x76   :  { %v252_v0 = vpop.permute.xlu1 %251  }
  0x77   :  { %676 = vst.msk [vmem:[%s1513_s1 + $0x40] sm:$0xff] %vm232_vm2, %v252_v0  }
  0x78   :  { %v231_v1 = vpop.permute.xlu0 %230  }
  0x79   :  { %233 = vst.msk [vmem:[%s1513_s1] sm:$0xff] %vm232_vm2, %v231_v1  }
  0x7a   :  { %v263_v2 = vpop.permute.xlu1 %262  }
  0x7b   :  { %679 = vst.msk [vmem:[%s1513_s1 + $0x60] sm:$0xff] %vm232_vm2, %v263_v2  }
  0x7c   :  { %v241_v3 = vpop.permute.xlu0 %240  }
  0x7d   :  { %673 = vst.msk [vmem:[%s1513_s1 + $0x20] sm:$0xff] %vm232_vm2, %v241_v3  }
  0x7e   :  { %v285_v4 = vpop.permute.xlu1 %284  }
  0x7f   :  { %685 = vst.msk [vmem:[%s1513_s1 + $0xa0] sm:$0xff] %vm232_vm2, %v285_v4  }
  0x80   :  { %v274_v5 = vpop.permute.xlu0 %273  }
  0x81   :  { %682 = vst.msk [vmem:[%s1513_s1 + $0x80] sm:$0xff] %vm232_vm2, %v274_v5  }
  0x82   :  { %v307_v6 = vpop.permute.xlu1 %306  }
  0x83   :  { %691 = vst.msk [vmem:[%s1513_s1 + $0xe0] sm:$0xff] %vm232_vm2, %v307_v6  }
  0x84   :  { %v296_v7 = vpop.permute.xlu0 %295  }
  0x85   :  { %688 = vst.msk [vmem:[%s1513_s1 + $0xc0] sm:$0xff] %vm232_vm2, %v296_v7  }
  0x86   :  { %v329_v8 = vpop.permute.xlu1 %328  }
  0x87   :  { %697 = vst.msk [vmem:[%s1513_s1 + $0x28] sm:$0xff] %vm232_vm2, %v329_v8  }
  0x88   :  { %v318_v9 = vpop.permute.xlu0 %317  }
  0x89   :  { %694 = vst.msk [vmem:[%s1513_s1 + $0x8] sm:$0xff] %vm232_vm2, %v318_v9  }
  0x8a   :  { %v351_v10 = vpop.permute.xlu1 %350  }
  0x8b   :  { %703 = vst.msk [vmem:[%s1513_s1 + $0x68] sm:$0xff] %vm232_vm2, %v351_v10  }
  0x8c   :  { %v340_v11 = vpop.permute.xlu0 %339  }
  0x8d   :  { %700 = vst.msk [vmem:[%s1513_s1 + $0x48] sm:$0xff] %vm232_vm2, %v340_v11  }
  0x8e   :  { %v373_v12 = vpop.permute.xlu1 %372  }
  0x8f   :  { %709 = vst.msk [vmem:[%s1513_s1 + $0xa8] sm:$0xff] %vm232_vm2, %v373_v12  }
  0x90   :  { %v362_v13 = vpop.permute.xlu0 %361  }
  0x91   :  { %706 = vst.msk [vmem:[%s1513_s1 + $0x88] sm:$0xff] %vm232_vm2, %v362_v13  }
  0x92   :  { %v395_v14 = vpop.permute.xlu1 %394  }
  0x93   :  { %715 = vst.msk [vmem:[%s1513_s1 + $0xe8] sm:$0xff] %vm232_vm2, %v395_v14  }
  0x94   :  { %v384_v15 = vpop.permute.xlu0 %383  }
  0x95   :  { %712 = vst.msk [vmem:[%s1513_s1 + $0xc8] sm:$0xff] %vm232_vm2, %v384_v15  }
  0x96   :  { %v417_v16 = vpop.permute.xlu1 %416  }
  0x97   :  { %721 = vst.msk [vmem:[%s1513_s1 + $0x30] sm:$0xff] %vm232_vm2, %v417_v16  }
  0x98   :  { %v406_v17 = vpop.permute.xlu0 %405  }
  0x99   :  { %718 = vst.msk [vmem:[%s1513_s1 + $0x10] sm:$0xff] %vm232_vm2, %v406_v17  }
  0x9a   :  { %v439_v18 = vpop.permute.xlu1 %438  }
  0x9b   :  { %727 = vst.msk [vmem:[%s1513_s1 + $0x70] sm:$0xff] %vm232_vm2, %v439_v18  }
  0x9c   :  { %v428_v19 = vpop.permute.xlu0 %427  }
  0x9d   :  { %724 = vst.msk [vmem:[%s1513_s1 + $0x50] sm:$0xff] %vm232_vm2, %v428_v19  }
  0x9e   :  { %v461_v20 = vpop.permute.xlu1 %460  }
  0x9f   :  { %733 = vst.msk [vmem:[%s1513_s1 + $0xb0] sm:$0xff] %vm232_vm2, %v461_v20  }
  0xa0   :  { %v450_v21 = vpop.permute.xlu0 %449  }
  0xa1   :  { %730 = vst.msk [vmem:[%s1513_s1 + $0x90] sm:$0xff] %vm232_vm2, %v450_v21  }
  0xa4   :  { %v483_v22 = vpop.permute.xlu1 %482  }
  0xa5   :  { %739 = vst.msk [vmem:[%s1513_s1 + $0xf0] sm:$0xff] %vm232_vm2, %v483_v22  }
  0xa9   :  { %v472_v23 = vpop.permute.xlu0 %471  }
  0xaa   :  { %736 = vst.msk [vmem:[%s1513_s1 + $0xd0] sm:$0xff] %vm232_vm2, %v472_v23  }
  0xbe   :  { %v505_v24 = vpop.permute.xlu1 %504  }
  0xbf   :  { %745 = vst.msk [vmem:[%s1513_s1 + $0x38] sm:$0xff] %vm232_vm2, %v505_v24  }
  0xc0   :  { %v494_v25 = vpop.permute.xlu0 %493  }
  0xc1   :  { %742 = vst.msk [vmem:[%s1513_s1 + $0x18] sm:$0xff] %vm232_vm2, %v494_v25  }
  0xc2   :  { %v527_v26 = vpop.permute.xlu1 %526  }
  0xc3   :  { %751 = vst.msk [vmem:[%s1513_s1 + $0x78] sm:$0xff] %vm232_vm2, %v527_v26  }
  0xc4   :  { %v516_v27 = vpop.permute.xlu0 %515  }
  0xc5   :  { %748 = vst.msk [vmem:[%s1513_s1 + $0x58] sm:$0xff] %vm232_vm2, %v516_v27  }
  0xc6   :  { %v549_v28 = vpop.permute.xlu1 %548  }
  0xc7   :  { %757 = vst.msk [vmem:[%s1513_s1 + $0xb8] sm:$0xff] %vm232_vm2, %v549_v28  }
  0xc8   :  { %v538_v29 = vpop.permute.xlu0 %537  }
  0xc9   :  { %754 = vst.msk [vmem:[%s1513_s1 + $0x98] sm:$0xff] %vm232_vm2, %v538_v29  }
  0xca   :  { %v571_v30 = vpop.permute.xlu1 %570  }
  0xcb   :  { %763 = vst.msk [vmem:[%s1513_s1 + $0xf8] sm:$0xff] %vm232_vm2, %v571_v30  }
  0xcc   :  { %v560_v31 = vpop.permute.xlu0 %559  }
  0xcd   :  { %760 = vst.msk [vmem:[%s1513_s1 + $0xd8] sm:$0xff] %vm232_vm2, %v560_v31  }

// kernel: tile.33
= control target key start
LH: loop header
LB: loop body
LE: loop exit
PB: predicated region body
PF: predicated region fallthrough
CT: control target
= control target key end

     0   :  { %s22_s0 = inlined_call_operand.vmem [shape: f32[4], index: 0, kind: input, shape index: {}]   ;;  %s23_s1 = inlined_call_operand.vmem [shape: f32[2,4], index: 1, kind: output, shape index: {}]  }
   0x1   :  { %v4_v0 = vld [vmem:[%s22_s0] ss:$0 sm:$0xff] }
   0x2   :  { %5 = vst [vmem:[%s23_s1] sm:$0x3] %v4_v0 }

// kernel: tile.34
= control target key start
LH: loop header
LB: loop body
LE: loop exit
PB: predicated region body
PF: predicated region fallthrough
CT: control target
= control target key end

     0   :  { %vm7_vm0 = vcmask 31744   ;;  %vm13_vm1 = vcmask 64544   ;;  %s39_s0 = inlined_call_operand.vmem [shape: f32[2,4], index: 0, kind: input, shape index: {}]   ;;  %s40_s1 = inlined_call_operand.vmem [shape: f32[1,8], index: 1, kind: output, shape index: {}]  }
   0x1   :  { %v4_v0 = vld [vmem:[%s39_s0] sm:$0x3]  ;;  %s22_s0 = smov 4  }
   0x2   :  { %5 = vst [vmem:[#allocation1] sm:$0x3] %v4_v0 }
   0x9   :  { %v10_v1 = vld [vmem:[#allocation1 + $0x1] sm:$0x1]   ;;  %v6_v2 = vld [vmem:[#allocation1] sm:$0x1]  }
   0xa   :  { %11 = vrot.lane.b32.xlu0 %v10_v1, %s22_s0  ;;  %8 = vst.msk [vmem:[#allocation0] sm:$0x1] %vm7_vm0, %v6_v2  }
  0x7c   :  { %v12_v3 = vpop.permute.xlu0 %11  }
  0x7d   :  { %14 = vst.msk [vmem:[#allocation0] sm:$0x1] %vm13_vm1, %v12_v3  }
  0x84   :  { %v18_v4 = vld [vmem:[#allocation0] sm:$0x1] }
  0x85   :  { %20 = vst [vmem:[%s40_s1] sm:$0x1] %v18_v4 }

// kernel: model_forward.1
= control target key start
LH: loop header
LB: loop body
LE: loop exit
PB: predicated region body
PF: predicated region fallthrough
CT: control target
= control target key end

     0   :  { %s5895_s21 = smov 0   ;;  %s7841_s0 = inlined_call_operand.vmem [shape: f32[4,32,4], index: 0, kind: input, shape index: {}]   ;;  %s7842_s1 = inlined_call_operand.vmem [shape: f32[16,128], index: 1, kind: input, shape index: {}]   ;;  %s7843_s2 = inlined_call_operand.vmem [shape: f32[8,32], index: 2, kind: input, shape index: {}]   ;;  %s7844_s3 = inlined_call_operand.vmem [shape: bf16[32,512], index: 3, kind: input, shape index: {}]   ;;  %s7845_s4 = inlined_call_operand.vmem [shape: bf16[512,32], index: 4, kind: input, shape index: {}]   ;;  %s7846_s5 = inlined_call_operand.vmem [shape: f32[32,128], index: 5, kind: input, shape index: {}]   ;;  %s7847_s6 = inlined_call_operand.vmem [shape: f32[64,1088], index: 6, kind: input, shape index: {}]   ;;  %s7848_s7 = inlined_call_operand.vmem [shape: f32[128,1024], index: 7, kind: input, shape index: {}]   ;;  %s7849_s8 = inlined_call_operand.vmem [shape: f32[512,64], index: 8, kind: input, shape index: {}]   ;;  %s7850_s9 = inlined_call_operand.vmem [shape: f32[64,32], index: 9, kind: input, shape index: {}]   ;;  %s7851_s10 = inlined_call_operand.vmem [shape: f32[160,32], index: 10, kind: input, shape index: {}]   ;;  %s7852_s11 = inlined_call_operand.vmem [shape: f32[32,16], index: 11, kind: input, shape index: {}]   ;;  %s7853_s12 = inlined_call_operand.vmem [shape: f32[4,16,4], index: 12, kind: output, shape index: {}]  }
   0x1 LB: > { %s4690_s22 = sadd.s32 4294967295, %s5819_s21   ;;  %p4694_p0 = scmp.ge.s32.totalorder %s5819_s21, 1  ;;  %s5819_s21 = sphi %s5895_s21, %s22_s21  }
   0x2   : > { %p364_p1 = scmp.lt.s32.totalorder %s5819_s21, 3 }
   0x4   : > { %p365_p2 = pnand %p4694_p0, %p364_p1 }
   0x6   : > { %368 = sbr.rel (%p365_p2) target bundleno = 4045 (0xfcd), region = 68 }
   0xd   : > { %s4695_s23 = sshll.u32 %s4690_s22, 1  ;;  %s5821_s28 = smov 4   ;;  %v5912_v4 = vld [vmem:[%s7843_s2] sm:$0xff]  ;;  %v7860_v5 = vmov 0.0   ;;  %vm5823_vm0 = vmmov 0   ;;  %vm450_vm1 = vcmask 31744   ;;  %v7855_v60 = vlaneseq }
   0xe   : > { %p409_p3 = scmp.lt.s32.totalorder %s4695_s23, 3  ;;  %5047 = vmatprep.subr.mxu1 %v7860_v5  ;;  %5049 = vmatprep.mubr.msk.f32.mxu1 %vm5823_vm0, %v7860_v5  ;;  %vm455_vm2 = vcmask 64512   ;;  %vm1110_vm5 = vcmask 261120   ;;  %vm2290_vm12 = vcmask 523264   ;;  %s5827_s19 = smov 64  }
   0xf   : > { %5048 = vmatpush3.msra.mxu1 %v5912_v4  ;;  %5057 = vmatprep.subr.mxu0 %v7860_v5  ;;  %v5946_v61 = vshrl.u32 %v7855_v60, 7  ;;  %s5829_s20 = smov 124  }
  0x10   : > { %s7935_s23 = smov (!%p409_p3, %s4695_s23), 3  ;;  %5052 = vmatprep.subr.mxu1 %v7860_v5  ;;  %5058 = vmatpush3.msra.mxu0 %v5912_v4 }
  0x11   : > { %s4805_s24 = sshll.u32 %s7935_s23, 5  ;;  %5059 = vmatprep.mubr.msk.f32.mxu0 %vm5823_vm0, %v7860_v5  ;;  %5067 = vmatprep.subr.mxu0 %v7860_v5  ;;  %7874 = vst [vmem:[#allocation4_spill] sm:$0xff] %v5946_v61  ;;  %s4806_s16 = sshll.u32 %s7935_s23, 4 }
  0x12   : > { %s413_s27 = scalar_lea.vmem %s7841_s0, %s4805_s24 }
  0x13   : > { %v4701_v0 = vld [vmem:[%s413_s27 + $0x20] sm:$0xff]  ;;  %v4703_v1 = vld [vmem:[%s413_s27 + $0x30] sm:$0xff]  ;;  %v4702_v2 = vld [vmem:[%s413_s27 + $0x28] sm:$0xff] }
  0x14   : > { %438 = vrot.lane.b32.xlu0 %v4701_v0, %s5821_s28  ;;  %442 = vrot.lane.b32.xlu1 %v4703_v1, %s5821_s28  ;;  %v4704_v3 = vld [vmem:[%s413_s27 + $0x38] sm:$0xff]  ;;  %v425_v7 = vld [vmem:[%s413_s27] sm:$0xff]  ;;  %v5950_v0 = vsub.s32 0, %v5946_v61 }
  0x15   : > { %v427_v9 = vld [vmem:[%s413_s27 + $0x10] sm:$0xff]  ;;  %v426_v10 = vld [vmem:[%s413_s27 + $0x8] sm:$0xff]  ;;  %v428_v11 = vld [vmem:[%s413_s27 + $0x18] sm:$0xff] }
  0x16   : > { %7875 = vst [vmem:[#allocation5_spill] sm:$0xff] %v5950_v0  ;;  %v5955_v1 = vld [vmem:[%s7842_s1] sm:$0xff] }
  0x18   : > { %440 = vrot.lane.b32.xlu0 %v4702_v2, %s5821_s28  ;;  %444 = vrot.lane.b32.xlu1 %v4704_v3, %s5821_s28  ;;  %v7854_v3 = vsub.s32 1, %v5946_v61 }
  0x86   : > { %v439_v6 = vpop.permute.xlu0 %438  ;;  %v443_v8 = vpop.permute.xlu1 %442 }
  0x87   : > { %v451_v12 = vsel %vm450_vm1, %v425_v7, %v439_v6  ;;  %v453_v15 = vsel %vm450_vm1, %v427_v9, %v443_v8  ;;  %v512_v7 = vrot.slane %v5955_v1, %v5950_v0  ;;  %v5963_v9 = vrot.slane %v5955_v1, %v7854_v3 }
  0x88   : > { %v456_v18 = vsel %vm455_vm2, %v451_v12, 0.0  ;;  %v459_v21 = vsel %vm455_vm2, %v453_v15, 0.0 }
  0x89   : > { %7876 = vst [vmem:[#allocation6_spill] sm:$0xff] %v5963_v9 }
  0x8a   : > { %v441_v13 = vpop.permute.xlu0 %440  ;;  %v445_v14 = vpop.permute.xlu1 %444 }
  0x8b   : > { %v452_v16 = vsel %vm450_vm1, %v426_v10, %v441_v13  ;;  %v454_v17 = vsel %vm450_vm1, %v428_v11, %v445_v14 }
  0x8c   : > { %v457_v19 = vsel %vm455_vm2, %v452_v16, 0.0  ;;  %v461_v22 = vsel %vm455_vm2, %v454_v17, 0.0 }
  0x8d   : > { %v458_v20 = vadd.f32 %v457_v19, %v456_v18 }
  0x8f   : > { %v460_v23 = vadd.f32 %v459_v21, %v458_v20  ;;  %v7857_v21 = vsub.s32 7, %v5946_v61 }
  0x91   : > { %v462_v24 = vadd.f32 %v461_v22, %v460_v23 }
  0x93   : > { %v463_v25 = vrot.slane %v462_v24, 4 }
  0x95   : > { %v464_v26 = vadd.f32 %v463_v25, %v462_v24 }
  0x97   : > { %v465_v27 = vrot.slane %v464_v26, 2 }
  0x99   : > { %v466_v28 = vadd.f32 %v465_v27, %v464_v26 }
  0x9b   : > { %v467_v29 = vrot.slane %v466_v28, 1 }
  0x9d   : > { %v468_v30 = vadd.f32 %v467_v29, %v466_v28  ;;  %v5578_v28 = vld [vmem:[%s7844_s3 + $0x4] ss:$16 sps:$4 sm:$0xff]   ;;  %v5581_v29 = vld [vmem:[%s7844_s3 + $0xc] ss:$16 sps:$4 sm:$0xff]  }
  0x9f   : > { %v5932_v31 = vmul.f32 0.03125, %v468_v30  ;;  %v5579_v30 = vld [vmem:[%s7844_s3 + $0x8] ss:$16 sps:$4 sm:$0xff]  }
  0xa1   : > { %7872 = vst [vmem:[#allocation2_spill] sm:$0xff] %v5932_v31  ;;  %v471_v32 = vsub.f32 %v451_v12, %v5932_v31  ;;  %v472_v33 = vsub.f32 %v452_v16, %v5932_v31  ;;  %v473_v34 = vsub.f32 %v453_v15, %v5932_v31  ;;  %v474_v35 = vsub.f32 %v454_v17, %v5932_v31 }
  0xa3   : > { %v475_v36 = vmul.f32 %v471_v32, %v471_v32  ;;  %v476_v37 = vmul.f32 %v472_v33, %v472_v33  ;;  %v477_v38 = vmul.f32 %v473_v34, %v473_v34  ;;  %v478_v39 = vmul.f32 %v474_v35, %v474_v35 }
  0xa5   : > { %v479_v40 = vsel %vm455_vm2, %v475_v36, 0.0  ;;  %v480_v41 = vsel %vm455_vm2, %v476_v37, 0.0  ;;  %v482_v43 = vsel %vm455_vm2, %v477_v38, 0.0  ;;  %v484_v45 = vsel %vm455_vm2, %v478_v39, 0.0 }
  0xa6   : > { %v481_v42 = vadd.f32 %v480_v41, %v479_v40  ;;  %v5824_v36 = vmov 0   ;;  %v532_v37 = vsub.s32 2, %v5946_v61 }
  0xa8   : > { %v483_v44 = vadd.f32 %v482_v43, %v481_v42  ;;  %v533_v39 = vrot.slane %v5955_v1, %v532_v37 }
  0xaa   : > { %v485_v46 = vadd.f32 %v484_v45, %v483_v44 }
  0xac   : > { %v486_v47 = vrot.slane %v485_v46, 4 }
  0xae   : > { %v487_v48 = vadd.f32 %v486_v47, %v485_v46 }
  0xb0   : > { %v488_v49 = vrot.slane %v487_v48, 2 }
  0xb2   : > { %v489_v50 = vadd.f32 %v488_v49, %v487_v48 }
  0xb4   : > { %v490_v51 = vrot.slane %v489_v50, 1 }
  0xb6   : > { %v491_v52 = vadd.f32 %v490_v51, %v489_v50 }
  0xb8   : > { %v492_v53 = vmul.f32 0.03125, %v491_v52 }
  0xba   : > { %v493_v54 = vadd.f32 1e-05, %v492_v53 }
  0xbc   : > { %5620 = vrsqrt.f32 %v493_v54  ;;  %vm496_vm3 = vcmp.eq.f32.partialorder %v493_v54, inf  ;;  %v499_v57 = vand.u32 2147483648, %v493_v54  ;;  %vm498_vm4 = vcmp.eq.f32.partialorder %v493_v54, 0.0 }
  0xc6   : > { %v5621_v55 = vpop.eup %5620 }
  0xc7   : > { %v495_v56 = vmul.f32 %v5621_v55, %v493_v54 }
  0xc9   : > { %v497_v58 = vsel %vm496_vm3, %v493_v54, %v495_v56 }
  0xca   : > { %v5942_v59 = vsel %vm498_vm4, %v499_v57, %v497_v58 }
  0xcb   : > { %7873 = vst [vmem:[#allocation3_spill] sm:$0xff] %v5942_v59  ;;  %5622 = vrcp.f32 %v5942_v59 }
  0xd5   : > { %v5623_v62 = vpop.eup %5622 }
  0xd6   : > { %v502_v63 = vmul.f32 %v5623_v62, %v5942_v59 }
  0xd8   : > { %v503_v2 = vsub.f32 2.0, %v502_v63 }
  0xda   : > { %v504_v6 = vmul.f32 %v5623_v62, %v503_v2 }
  0xdc   : > { %v506_v8 = vmul.f32 %v504_v6, %v472_v33  ;;  %v505_v10 = vmul.f32 %v504_v6, %v471_v32  ;;  %v507_v11 = vmul.f32 %v504_v6, %v473_v34  ;;  %v508_v14 = vmul.f32 %v504_v6, %v474_v35  ;;  %v5584_v32 = vld [vmem:[%s7844_s3 + $0x24] ss:$16 sps:$4 sm:$0xff]   ;;  %v5587_v33 = vld [vmem:[%s7844_s3 + $0x2c] ss:$16 sps:$4 sm:$0xff]   ;;  %v5582_v34 = vld [vmem:[%s7844_s3 + $0x20] ss:$16 sps:$4 sm:$0xff]  }
  0xdd   : > { %v5585_v35 = vld [vmem:[%s7844_s3 + $0x28] ss:$16 sps:$4 sm:$0xff]  }
  0xde   : > { %v514_v12 = vmul.f32 %v512_v7, %v506_v8  ;;  %v513_v13 = vmul.f32 %v512_v7, %v505_v10  ;;  %v515_v17 = vmul.f32 %v512_v7, %v507_v11  ;;  %v516_v19 = vmul.f32 %v512_v7, %v508_v14 }
  0xe0   : > { %v522_v15 = vadd.f32 %v5963_v9, %v514_v12  ;;  %v521_v16 = vadd.f32 %v5963_v9, %v513_v13  ;;  %v523_v18 = vadd.f32 %v5963_v9, %v515_v17  ;;  %v524_v20 = vadd.f32 %v5963_v9, %v516_v19 }
  0xe2   : > { %639 = vxpose.xlu1.b32.start.end [1/1] (short) (narrow) %v522_v15, 8  ;;  %534 = vxpose.xlu0.b32.start.end [1/1] (short) (narrow) %v521_v16, 8  ;;  %v528_v22 = vrot.slane %v524_v20, %v7857_v21 }
  0xe6   : > { %744 = vxpose.xlu0.b32.start.end [1/1] (short) (narrow) %v523_v18, 8 }
  0xea   : > { %849 = vxpose.xlu0.b32.start.end [1/1] (short) (narrow) %v524_v20, 8 }
  0xee   : > { %954 = vxpose.xlu0.b32.start.end [1/1] (short) (narrow) %v528_v22, 8 }
 0x162   : > { %v550_v23 = vpop.trf.xlu0  ;;  %v655_v24 = vpop.trf.xlu1 }
 0x163   : > { %5050 = vmatmul.mubr.msk.f32.vlgmr.msra.gmra.mrb[0].mxu1 %vm455_vm2, %v550_v23 }
 0x164   : > { %5053 = vmatpush3.msra.mxu1 %v5912_v4  ;;  %5054 = vmatprep.mubr.msk.f32.mxu1 %vm5823_vm0, %v7860_v5 }
 0x165   : > { %5062 = vmatprep.subr.mxu1 %v7860_v5 }
 0x166   : > { %v760_v25 = vpop.trf.xlu0 }
 0x167   : > { %5055 = vmatmul.mubr.msk.f32.vlgmr.msra.gmra.mrb[2].mxu1 %vm455_vm2, %v655_v24  ;;  %5060 = vmatmul.mubr.msk.f32.vlgmr.msra.gmra.mrb[0].mxu0 %vm455_vm2, %v760_v25 }
 0x168   : > { %5063 = vmatpush3.msra.mxu1 %v5912_v4  ;;  %5064 = vmatprep.mubr.msk.f32.mxu1 %vm5823_vm0, %v7860_v5 }
 0x169   : > { %5068 = vmatpush3.msra.mxu0 %v5912_v4  ;;  %5069 = vmatprep.mubr.msk.f32.mxu0 %vm5823_vm0, %v7860_v5  ;;  %v5576_v4 = vld [vmem:[%s7844_s3] ss:$16 sps:$4 sm:$0xff]  }
 0x16a   : > { %v865_v26 = vpop.trf.xlu0  ;;  %1120 = vmatprep.subr.bf16.mxu1 %v5578_v28  ;;  %1181 = vmatprep.subr.bf16.mxu0 %v5581_v29 }
 0x16b   : > { %5065 = vmatmul.mubr.msk.f32.vlgmr.msra.gmra.mrb[4].mxu1 %vm455_vm2, %v865_v26 }
 0x16c   : > { %1121 = vmatpush1.bf16.msra.mxu1 %v5576_v4  ;;  %1152 = vmatprep.mubr.bf16.mxu1 %v5824_v36 }
 0x16d   : > { %1122 = vmatprep.subr.bf16.mxu1 %v5584_v32 }
 0x16e   : > { %v970_v27 = vpop.trf.xlu0 }
 0x16f   : > { %5070 = vmatmul.mubr.msk.f32.vlgmr.msra.gmra.mrb[2].mxu0 %vm455_vm2, %v970_v27 }
 0x170   : > { %1182 = vmatpush1.bf16.msra.mxu0 %v5579_v30  ;;  %1123 = vmatpush1.bf16.msra.mxu1 %v5582_v34 }
 0x171   : > { %1183 = vmatprep.subr.bf16.mxu0 %v5587_v33  ;;  %1213 = vmatprep.mubr.bf16.mxu0 %v5824_v36 }
 0x174   : > { %1184 = vmatpush1.bf16.msra.mxu0 %v5585_v35 }
 0x236   : > { %v635_v38 = vpop.f32.mrb[0].mxu1 }
 0x237   : > { %v5051_v40 = vpop.f32.mrb[1].mxu1  ;;  %v6015_v43 = vadd.f32 %v635_v38, %v533_v39 }
 0x23a   : > { %v740_v41 = vpop.f32.mrb[2].mxu1  ;;  %v845_v42 = vpop.f32.mrb[0].mxu0 }
 0x23b   : > { %v6017_v44 = vadd.f32 %v740_v41, %v533_v39  ;;  %v5056_v45 = vpop.f32.mrb[3].mxu1  ;;  %v5061_v46 = vpop.f32.mrb[1].mxu0  ;;  %v6023_v50 = vadd.f32 %v845_v42, %v533_v39 }
 0x23c   : > { %v5588_v45 = vld [vmem:[%s7845_s4 + $0x40] sm:$0xff]  }
 0x23d   : > { %v1059_v47 = vpack.c.bf16 %v6017_v44, %v6015_v43  ;;  %v5589_v46 = vld [vmem:[%s7845_s4 + $0xc0] sm:$0xff]   ;;  %4817 = vmatprep.subr.bf16.mxu1 %v5588_v45 }
 0x23e   : > { %v950_v48 = vpop.f32.mrb[4].mxu1  ;;  %4851 = vmatprep.subr.bf16.mxu0 %v5589_v46 }
 0x23f   : > { %4718 = vmatmul.mubr.msk.bf16.vlgmr.msra.gmra.mrb[8].mxu1 %vm1110_vm5, %v1059_v47  ;;  %4721 = vmatmul.mubr.msk.bf16.vlgmr.msra.gmra.mrb[4].mxu0 %vm1110_vm5, %v1059_v47  ;;  %v5066_v49 = vpop.f32.mrb[5].mxu1  ;;  %v6025_v51 = vadd.f32 %v950_v48, %v533_v39  ;;  %v5590_v47 = vld [vmem:[%s7845_s4] sm:$0xff]  }
 0x240   : > { %1162 = vmatprep.mubr.bf16.mxu1 %v5824_v36  ;;  %1223 = vmatprep.mubr.bf16.mxu0 %v5824_v36  ;;  %v5591_v48 = vld [vmem:[%s7845_s4 + $0x80] sm:$0xff]   ;;  %v5592_v49 = vld [vmem:[%s7845_s4 + $0x48] sm:$0xff]  }
 0x241   : > { %v1060_v54 = vpack.c.bf16 %v6025_v51, %v6023_v50  ;;  %4818 = vmatpush3.bf16.msra.mxu1 %v5590_v47  ;;  %4852 = vmatpush3.bf16.msra.mxu0 %v5591_v48 }
 0x242   : > { %v1055_v52 = vpop.f32.mrb[2].mxu0  ;;  %4819 = vmatprep.subr.bf16.mxu1 %v5592_v49 }
 0x243   : > { %v5071_v53 = vpop.f32.mrb[3].mxu0  ;;  %v6031_v55 = vadd.f32 %v1055_v52, %v533_v39  ;;  %v5593_v52 = vld [vmem:[%s7845_s4 + $0xc8] sm:$0xff]  }
 0x244   : > { %v5594_v53 = vld [vmem:[%s7845_s4 + $0x8] sm:$0xff]   ;;  %4853 = vmatprep.subr.bf16.mxu0 %v5593_v52 }
 0x245   : > { %v1061_v56 = vpack.c.bf16 %v6031_v55, %v6031_v55  ;;  %4820 = vmatpush3.bf16.msra.mxu1 %v5594_v53 }
 0x247   : > { %4719 = vmatmul.mubr.msk.bf16.gmra.mrb[12].mxu1 %vm1110_vm5, %v1060_v54  ;;  %4722 = vmatmul.mubr.msk.bf16.gmra.mrb[8].mxu0 %vm1110_vm5, %v1060_v54  ;;  %v5595_v54 = vld [vmem:[%s7845_s4 + $0x88] sm:$0xff]  }
 0x248   : > { %1172 = vmatprep.mubr.bf16.mxu1 %v5824_v36  ;;  %1233 = vmatprep.mubr.bf16.mxu0 %v5824_v36 }
 0x249   : > { %4854 = vmatpush3.bf16.msra.mxu0 %v5595_v54 }
 0x24f   : > { %4720 = vmatmul.mubr.msk.bf16.gmra.mrb[16].mxu1 %vm1110_vm5, %v1061_v56  ;;  %4723 = vmatmul.mubr.msk.bf16.gmra.mrb[12].mxu0 %vm1110_vm5, %v1061_v56  ;;  %v5596_v56 = vld [vmem:[%s7845_s4 + $0x50] sm:$0xff]  }
 0x250   : > { %4821 = vmatprep.subr.bf16.mxu1 %v5596_v56 }
 0x312   : > { %v6037_v57 = vpop.f32.mrb[8].mxu1  ;;  %v6039_v58 = vpop.f32.mrb[4].mxu0 }
 0x313   : > { %v6041_v62 = vpop.f32.mrb[9].mxu1  ;;  %v6043_v63 = vpop.f32.mrb[5].mxu0 }
 0x314   : > { %v1242_v2 = vmax.f32 %v6037_v57, %v6041_v62  ;;  %v6047_v6 = vpop.f32.mrb[10].mxu1  ;;  %v6049_v7 = vpop.f32.mrb[6].mxu0 }
 0x315   : > { %v6051_v8 = vpop.f32.mrb[11].mxu1  ;;  %v6053_v10 = vpop.f32.mrb[7].mxu0 }
 0x316   : > { %v1247_v11 = vmax.f32 %v6047_v6, %v6051_v8  ;;  %v1243_v12 = vmax.f32 %v1242_v2, %v6039_v58  ;;  %v5597_v2 = vld [vmem:[%s7845_s4 + $0xd0] sm:$0xff]  }
 0x317   : > { %4855 = vmatprep.subr.bf16.mxu0 %v5597_v2 }
 0x318   : > { %v1244_v13 = vmax.f32 %v1243_v12, %v6043_v63  ;;  %v1248_v14 = vmax.f32 %v1247_v11, %v6049_v7  ;;  %v5598_v11 = vld [vmem:[%s7845_s4 + $0x10] sm:$0xff]  }
 0x319   : > { %v5599_v12 = vld [vmem:[%s7845_s4 + $0x90] sm:$0xff]   ;;  %4822 = vmatpush3.bf16.msra.mxu1 %v5598_v11 }
 0x31a   : > { %v6060_v15 = vpop.f32.mrb[12].mxu1  ;;  %1245 = vmax.xlane.f32.xlu1 %v1244_v13  ;;  %v6062_v16 = vpop.f32.mrb[8].mxu0  ;;  %v1249_v17 = vmax.f32 %v1248_v14, %v6053_v10  ;;  %v5600_v13 = vld [vmem:[%s7845_s4 + $0x58] sm:$0xff]   ;;  %4856 = vmatpush3.bf16.msra.mxu0 %v5599_v12 }
 0x31b   : > { %v6065_v18 = vpop.f32.mrb[13].mxu1  ;;  %v6067_v19 = vpop.f32.mrb[9].mxu0  ;;  %v5601_v14 = vld [vmem:[%s7845_s4 + $0xd8] sm:$0xff]   ;;  %4823 = vmatprep.subr.bf16.mxu1 %v5600_v13 }
 0x31c   : > { %v1252_v20 = vmax.f32 %v6060_v15, %v6065_v18  ;;  %v6071_v22 = vpop.f32.mrb[14].mxu1  ;;  %1250 = vmax.xlane.f32.xlu0 %v1249_v17  ;;  %v6073_v23 = vpop.f32.mrb[10].mxu0  ;;  %v5602_v17 = vld [vmem:[%s7845_s4 + $0x18] sm:$0xff]   ;;  %4857 = vmatprep.subr.bf16.mxu0 %v5601_v14 }
 0x31d   : > { %v6075_v24 = vpop.f32.mrb[15].mxu1  ;;  %v6077_v25 = vpop.f32.mrb[11].mxu0  ;;  %4824 = vmatpush3.bf16.msra.mxu1 %v5602_v17 }
 0x31e   : > { %v1257_v26 = vmax.f32 %v6071_v22, %v6075_v24  ;;  %v1253_v27 = vmax.f32 %v1252_v20, %v6062_v16  ;;  %v5603_v20 = vld [vmem:[%s7845_s4 + $0x98] sm:$0xff]  }
 0x31f   : > { %4858 = vmatpush3.bf16.msra.mxu0 %v5603_v20 }
 0x320   : > { %v1254_v28 = vmax.f32 %v1253_v27, %v6067_v19  ;;  %v1258_v29 = vmax.f32 %v1257_v26, %v6073_v23 }
 0x322   : > { %v6084_v4 = vpop.f32.mrb[16].mxu1  ;;  %1255 = vmax.xlane.f32.xlu1 %v1254_v28  ;;  %v6086_v30 = vpop.f32.mrb[12].mxu0  ;;  %v1259_v32 = vmax.f32 %v1258_v29, %v6077_v25 }
 0x323   : > { %v6089_v33 = vpop.f32.mrb[17].mxu1  ;;  %v6091_v34 = vpop.f32.mrb[13].mxu0 }
 0x324   : > { %v1262_v35 = vmax.f32 %v6084_v4, %v6089_v33  ;;  %v1178_v36 = vpop.f32.mrb[18].mxu1  ;;  %v1239_v38 = vpop.f32.mrb[14].mxu0 }
 0x325   : > { %v1179_v39 = vpop.f32.mrb[19].mxu1  ;;  %v1240_v40 = vpop.f32.mrb[15].mxu0 }
 0x326   : > { %v1263_v41 = vmax.f32 %v1262_v35, %v6086_v30  ;;  %1260 = vmax.xlane.f32.xlu1 %v1259_v32 }
 0x328   : > { %v1264_v42 = vmax.f32 %v1263_v41, %v6091_v34 }
 0x32a   : > { %1265 = vmax.xlane.f32.xlu0 %v1264_v42 }
 0x3a7   : > { %v1246_v26 = vpop.xlane.xlu1 %1245 }
 0x3a8   : > { %v1267_v27 = vsub.f32 %v6037_v57, %v1246_v26  ;;  %v1268_v28 = vsub.f32 %v6041_v62, %v1246_v26  ;;  %v1269_v29 = vsub.f32 %v6039_v58, %v1246_v26  ;;  %v1270_v32 = vsub.f32 %v6043_v63, %v1246_v26 }
 0x3a9   : > { %v1251_v35 = vpop.xlane.xlu0 %1250 }
 0x3aa   : > { %v1287_v36 = vmul.f32 1.442695, %v1267_v27  ;;  %v1289_v38 = vmul.f32 1.442695, %v1268_v28  ;;  %v1291_v39 = vmul.f32 1.442695, %v1269_v29  ;;  %v1271_v40 = vsub.f32 %v6047_v6, %v1251_v35 }
 0x3ab   : > { %v1293_v41 = vmul.f32 1.442695, %v1270_v32  ;;  %v1272_v42 = vsub.f32 %v6051_v8, %v1251_v35  ;;  %v1273_v45 = vsub.f32 %v6049_v7, %v1251_v35  ;;  %v1274_v46 = vsub.f32 %v6053_v10, %v1251_v35 }
 0x3ac   : > { %5624 = vpow2.f32 %v1287_v36  ;;  %v1295_v57 = vmul.f32 1.442695, %v1271_v40 }
 0x3ad   : > { %5626 = vpow2.f32 %v1289_v38  ;;  %v1297_v62 = vmul.f32 1.442695, %v1272_v42  ;;  %v1299_v58 = vmul.f32 1.442695, %v1273_v45  ;;  %v1301_v63 = vmul.f32 1.442695, %v1274_v46 }
 0x3ae   : > { %5628 = vpow2.f32 %v1291_v39 }
 0x3af   : > { %5630 = vpow2.f32 %v1293_v41  ;;  %v1256_v47 = vpop.xlane.xlu1 %1255 }
 0x3b0   : > { %5632 = vpow2.f32 %v1295_v57  ;;  %v1275_v48 = vsub.f32 %v6060_v15, %v1256_v47  ;;  %v1276_v6 = vsub.f32 %v6065_v18, %v1256_v47  ;;  %v1277_v8 = vsub.f32 %v6062_v16, %v1256_v47 }
 0x3b1   : > { %5634 = vpow2.f32 %v1297_v62  ;;  %v1278_v7 = vsub.f32 %v6067_v19, %v1256_v47 }
 0x3b2   : > { %5636 = vpow2.f32 %v1299_v58  ;;  %v1303_v10 = vmul.f32 1.442695, %v1275_v48  ;;  %v1305_v49 = vmul.f32 1.442695, %v1276_v6  ;;  %v1307_v52 = vmul.f32 1.442695, %v1277_v8 }
 0x3b3   : > { %5638 = vpow2.f32 %v1301_v63  ;;  %v1309_v53 = vmul.f32 1.442695, %v1278_v7  ;;  %v1261_v54 = vpop.xlane.xlu1 %1260 }
 0x3b4   : > { %5640 = vpow2.f32 %v1303_v10  ;;  %v1279_v56 = vsub.f32 %v6071_v22, %v1261_v54  ;;  %v1280_v2 = vsub.f32 %v6075_v24, %v1261_v54  ;;  %v1281_v15 = vsub.f32 %v6073_v23, %v1261_v54 }
 0x3b5   : > { %5642 = vpow2.f32 %v1305_v49  ;;  %v1282_v16 = vsub.f32 %v6077_v25, %v1261_v54 }
 0x3b6   : > { %v6161_v18 = vpop.eup %5624  ;;  %5644 = vpow2.f32 %v1307_v52  ;;  %v1311_v19 = vmul.f32 1.442695, %v1279_v56  ;;  %v1313_v11 = vmul.f32 1.442695, %v1280_v2  ;;  %v1315_v12 = vmul.f32 1.442695, %v1281_v15 }
 0x3b7   : > { %v6163_v13 = vpop.eup %5626  ;;  %5646 = vpow2.f32 %v1309_v53  ;;  %v1317_v14 = vmul.f32 1.442695, %v1282_v16  ;;  %v1266_v17 = vpop.xlane.xlu0 %1265 }
 0x3b8   : > { %v6165_v20 = vpop.eup %5628  ;;  %5648 = vpow2.f32 %v1311_v19  ;;  %v1283_v22 = vsub.f32 %v6084_v4, %v1266_v17  ;;  %v1284_v23 = vsub.f32 %v6089_v33, %v1266_v17  ;;  %v1285_v24 = vsub.f32 %v6086_v30, %v1266_v17  ;;  %v5604_v19 = vld [vmem:[%s7845_s4 + $0x60] sm:$0xff]  }
 0x3b9   : > { %v6170_v25 = vpop.eup %5630  ;;  %5650 = vpow2.f32 %v1313_v11  ;;  %v1286_v26 = vsub.f32 %v6091_v34, %v1266_v17  ;;  %v1327_v27 = vadd.f32 %v6163_v13, %v6161_v18  ;;  %v5605_v11 = vld [vmem:[%s7845_s4 + $0xe0] sm:$0xff]   ;;  %v5608_v17 = vld [vmem:[%s7845_s4 + $0x68] sm:$0xff]   ;;  %4825 = vmatprep.subr.bf16.mxu1 %v5604_v19 }
 0x3ba   : > { %v6175_v28 = vpop.eup %5632  ;;  %5652 = vpow2.f32 %v1315_v12  ;;  %v1319_v29 = vmul.f32 1.442695, %v1283_v22  ;;  %v1321_v32 = vmul.f32 1.442695, %v1284_v23  ;;  %v1323_v4 = vmul.f32 1.442695, %v1285_v24  ;;  %4859 = vmatprep.subr.bf16.mxu0 %v5605_v11 }
 0x3bb   : > { %v6177_v35 = vpop.eup %5634  ;;  %5654 = vpow2.f32 %v1317_v14  ;;  %v1328_v33 = vadd.f32 %v6165_v20, %v1327_v27  ;;  %v1325_v38 = vmul.f32 1.442695, %v1286_v26  ;;  %v5606_v12 = vld [vmem:[%s7845_s4 + $0x20] sm:$0xff]   ;;  %v5609_v22 = vld [vmem:[%s7845_s4 + $0xe8] sm:$0xff]   ;;  %v5612_v26 = vld [vmem:[%s7845_s4 + $0x70] sm:$0xff]  }
 0x3bc   : > { %v6180_v30 = vpop.eup %5636  ;;  %5656 = vpow2.f32 %v1319_v29  ;;  %v1332_v34 = vadd.f32 %v6177_v35, %v6175_v28  ;;  %v5607_v14 = vld [vmem:[%s7845_s4 + $0xa0] sm:$0xff]   ;;  %4826 = vmatpush3.bf16.msra.mxu1 %v5606_v12  ;;  %v5610_v23 = vld [vmem:[%s7845_s4 + $0x28] sm:$0xff]   ;;  %v5613_v27 = vld [vmem:[%s7845_s4 + $0xf0] sm:$0xff]  }
 0x3bd   : > { %v6184_v36 = vpop.eup %5638  ;;  %5658 = vpow2.f32 %v1321_v32  ;;  %v1329_v39 = vadd.f32 %v6170_v25, %v1328_v33  ;;  %4860 = vmatpush3.bf16.msra.mxu0 %v5607_v14  ;;  %v5611_v24 = vld [vmem:[%s7845_s4 + $0xa8] sm:$0xff]   ;;  %4827 = vmatprep.subr.bf16.mxu1 %v5608_v17  ;;  %v5614_v29 = vld [vmem:[%s7845_s4 + $0x30] sm:$0xff]   ;;  %v5617_v33 = vld [vmem:[%s7845_s4 + $0xf8] sm:$0xff]  }
 0x3be   : > { %v6187_v40 = vpop.eup %5640  ;;  %v1333_v41 = vadd.f32 %v6180_v30, %v1332_v34  ;;  %5660 = vpow2.f32 %v1323_v4  ;;  %4861 = vmatprep.subr.bf16.mxu0 %v5609_v22  ;;  %v5615_v32 = vld [vmem:[%s7845_s4 + $0xb0] sm:$0xff]   ;;  %v5616_v4 = vld [vmem:[%s7845_s4 + $0x78] sm:$0xff]  }
 0x3bf   : > { %v6190_v42 = vpop.eup %5642  ;;  %1330 = vadd.xlane.f32.xlu1 %v1329_v39  ;;  %5662 = vpow2.f32 %v1325_v38  ;;  %v5618_v34 = vld [vmem:[%s7845_s4 + $0x38] sm:$0xff]  }
 0x3c0   : > { %v6192_v45 = vpop.eup %5644  ;;  %v1334_v46 = vadd.f32 %v6184_v36, %v1333_v41  ;;  %v1337_v57 = vadd.f32 %v6190_v42, %v6187_v40  ;;  %4828 = vmatpush3.bf16.msra.mxu1 %v5610_v23  ;;  %v5619_v38 = vld [vmem:[%s7845_s4 + $0xb8] sm:$0xff]  }
 0x3c1   : > { %v6197_v62 = vpop.eup %5646  ;;  %4862 = vmatpush3.bf16.msra.mxu0 %v5611_v24  ;;  %4829 = vmatprep.subr.bf16.mxu1 %v5612_v26 }
 0x3c2   : > { %v6199_v58 = vpop.eup %5648  ;;  %1335 = vadd.xlane.f32.xlu0 %v1334_v46  ;;  %v1338_v63 = vadd.f32 %v6192_v45, %v1337_v57  ;;  %4863 = vmatprep.subr.bf16.mxu0 %v5613_v27 }
 0x3c3   : > { %v6202_v47 = vpop.eup %5650 }
 0x3c4   : > { %v6204_v48 = vpop.eup %5652  ;;  %v1339_v6 = vadd.f32 %v6197_v62, %v1338_v63  ;;  %v1342_v8 = vadd.f32 %v6202_v47, %v6199_v58  ;;  %4830 = vmatpush3.bf16.msra.mxu1 %v5614_v29 }
 0x3c5   : > { %v6209_v7 = vpop.eup %5654  ;;  %4864 = vmatpush3.bf16.msra.mxu0 %v5615_v32  ;;  %4831 = vmatprep.subr.bf16.mxu1 %v5616_v4 }
 0x3c6   : > { %v6211_v10 = vpop.eup %5656  ;;  %1340 = vadd.xlane.f32.xlu1 %v1339_v6  ;;  %v1343_v49 = vadd.f32 %v6204_v48, %v1342_v8  ;;  %4865 = vmatprep.subr.bf16.mxu0 %v5617_v33 }
 0x3c7   : > { %v6214_v52 = vpop.eup %5658 }
 0x3c8   : > { %v1344_v53 = vadd.f32 %v6209_v7, %v1343_v49  ;;  %v1347_v54 = vadd.f32 %v6214_v52, %v6211_v10  ;;  %v6219_v56 = vpop.eup %5660  ;;  %4832 = vmatpush3.bf16.msra.mxu1 %v5618_v34 }
 0x3c9   : > { %v6222_v15 = vpop.eup %5662  ;;  %4866 = vmatpush3.bf16.msra.mxu0 %v5619_v38 }
 0x3ca   : > { %1345 = vadd.xlane.f32.xlu0 %v1344_v53  ;;  %v1348_v2 = vadd.f32 %v6219_v56, %v1347_v54 }
 0x3cc   : > { %v1349_v16 = vadd.f32 %v6222_v15, %v1348_v2 }
 0x3ce   : > { %1350 = vadd.xlane.f32.xlu1 %v1349_v16 }
 0x44c   : > { %v1331_v39 = vpop.xlane.xlu1 %1330 }
 0x44d   : > { %5664 = vrcp.f32 %v1331_v39 }
 0x44f   : > { %v1336_v41 = vpop.xlane.xlu0 %1335 }
 0x450   : > { %5666 = vrcp.f32 %v1336_v41 }
 0x453   : > { %v1341_v46 = vpop.xlane.xlu1 %1340 }
 0x454   : > { %5668 = vrcp.f32 %v1341_v46 }
 0x457   : > { %v5665_v57 = vpop.eup %5664  ;;  %v1346_v63 = vpop.xlane.xlu0 %1345 }
 0x458   : > { %5670 = vrcp.f32 %v1346_v63  ;;  %v1358_v8 = vmul.f32 %v5665_v57, %v6163_v13  ;;  %v1360_v49 = vmul.f32 %v5665_v57, %v6170_v25  ;;  %v1357_v53 = vmul.f32 %v5665_v57, %v6161_v18 }
 0x459   : > { %v1359_v54 = vmul.f32 %v5665_v57, %v6165_v20 }
 0x45a   : > { %v5667_v6 = vpop.eup %5666 }
 0x45b   : > { %v1351_v2 = vpop.xlane.xlu1 %1350  ;;  %v1362_v16 = vmul.f32 %v5667_v6, %v6177_v35  ;;  %v1364_v19 = vmul.f32 %v5667_v6, %v6184_v36  ;;  %v1361_v11 = vmul.f32 %v5667_v6, %v6175_v28  ;;  %v1363_v12 = vmul.f32 %v5667_v6, %v6180_v30 }
 0x45c   : > { %5672 = vrcp.f32 %v1351_v2 }
 0x45d   : > { %v1378_v14 = vpack.c.bf16 %v1362_v16, %v1358_v8  ;;  %v1380_v17 = vpack.c.bf16 %v1364_v19, %v1360_v49  ;;  %v1377_v22 = vpack.c.bf16 %v1361_v11, %v1357_v53  ;;  %v1379_v13 = vpack.c.bf16 %v1363_v12, %v1359_v54 }
 0x45e   : > { %v5669_v23 = vpop.eup %5668 }
 0x45f   : > { %1677 = vmatprep.mubr.bf16.mxu1 %v1378_v14  ;;  %1733 = vmatprep.mubr.bf16.mxu0 %v1380_v17  ;;  %v1366_v20 = vmul.f32 %v5669_v23, %v6190_v42  ;;  %v1368_v25 = vmul.f32 %v5669_v23, %v6197_v62  ;;  %v1365_v35 = vmul.f32 %v5669_v23, %v6187_v40 }
 0x460   : > { %1678 = vmatmul.mubr.bf16.vlgmr.msra.gmra.mrb[20].mxu1 %v1377_v22  ;;  %1734 = vmatmul.mubr.bf16.vlgmr.msra.gmra.mrb[16].mxu0 %v1379_v13  ;;  %v1367_v28 = vmul.f32 %v5669_v23, %v6192_v45 }
 0x462   : > { %v5671_v18 = vpop.eup %5670 }
 0x463   : > { %v1370_v30 = vmul.f32 %v5671_v18, %v6202_v47  ;;  %v1372_v36 = vmul.f32 %v5671_v18, %v6209_v7  ;;  %v1369_v24 = vmul.f32 %v5671_v18, %v6199_v58  ;;  %v1371_v26 = vmul.f32 %v5671_v18, %v6204_v48 }
 0x465   : > { %v1382_v27 = vpack.c.bf16 %v1370_v30, %v1366_v20  ;;  %v1384_v29 = vpack.c.bf16 %v1372_v36, %v1368_v25  ;;  %v1381_v32 = vpack.c.bf16 %v1369_v24, %v1365_v35  ;;  %v1383_v4 = vpack.c.bf16 %v1371_v26, %v1367_v28 }
 0x466   : > { %v5673_v33 = vpop.eup %5672 }
 0x467   : > { %1685 = vmatprep.mubr.bf16.mxu1 %v1382_v27  ;;  %1741 = vmatprep.mubr.bf16.mxu0 %v1384_v29  ;;  %v1374_v42 = vmul.f32 %v5673_v33, %v6214_v52  ;;  %v1376_v40 = vmul.f32 %v5673_v33, %v6222_v15  ;;  %v1373_v47 = vmul.f32 %v5673_v33, %v6211_v10 }
 0x468   : > { %1686 = vmatmul.mubr.bf16.gmra.mrb[24].mxu1 %v1381_v32  ;;  %1742 = vmatmul.mubr.bf16.gmra.mrb[20].mxu0 %v1383_v4  ;;  %v1375_v58 = vmul.f32 %v5673_v33, %v6219_v56 }
 0x469   : > { %v1386_v45 = vpack.c.bf16 %v1374_v42, %v1374_v42  ;;  %v1388_v62 = vpack.c.bf16 %v1376_v40, %v1376_v40  ;;  %v1385_v48 = vpack.c.bf16 %v1373_v47, %v1373_v47 }
 0x46a   : > { %v1387_v7 = vpack.c.bf16 %v1375_v58, %v1375_v58 }
 0x46b   : > { %1693 = vmatprep.mubr.bf16.mxu1 %v1386_v45  ;;  %1749 = vmatprep.mubr.bf16.mxu0 %v1388_v62 }
 0x470   : > { %1694 = vmatmul.mubr.bf16.gmra.mrb[28].mxu1 %v1385_v48  ;;  %1750 = vmatmul.mubr.bf16.gmra.mrb[24].mxu0 %v1387_v7 }
 0x471   : > { %5080 = vmatprep.mubr.msk.f32.mxu1 %vm5823_vm0, %v7860_v5  ;;  %2370 = vmatprep.mubr.f32.mxu0 %v7860_v5 }
 0x533   : > { %v4833_v52 = vpop.f32.mrb[20].mxu1  ;;  %v4867_v15 = vpop.f32.mrb[16].mxu0 }
 0x534   : > { %v4834_v34 = vpop.f32.mrb[21].mxu1  ;;  %v4868_v38 = vpop.f32.mrb[17].mxu0 }
 0x535   : > { %v4835_v39 = vadd.f32 %v4834_v34, %v4833_v52  ;;  %v4869_v41 = vadd.f32 %v4868_v38, %v4867_v15  ;;  %v4836_v10 = vpop.f32.mrb[22].mxu1  ;;  %v4870_v46 = vpop.f32.mrb[18].mxu0 }
 0x536   : > { %v4837_v56 = vpop.f32.mrb[23].mxu1  ;;  %v4871_v57 = vpop.f32.mrb[19].mxu0 }
 0x537   : > { %v4838_v63 = vadd.f32 %v4837_v56, %v4836_v10  ;;  %v4872_v6 = vadd.f32 %v4871_v57, %v4870_v46  ;;  %v1736_v8 = vadd.f32 %v4869_v41, %v4835_v39 }
 0x539   : > { %v1757_v49 = vsel %vm1110_vm5, %v1736_v8, 0.0  ;;  %v1739_v53 = vadd.f32 %v4872_v6, %v4838_v63 }
 0x53a   : > { %1758 = vadd.xlane.f32.xlu0 %v1757_v49 }
 0x53b   : > { %v1760_v54 = vsel %vm1110_vm5, %v1739_v53, 0.0  ;;  %v4839_v2 = vpop.f32.mrb[24].mxu1  ;;  %v4873_v16 = vpop.f32.mrb[20].mxu0 }
 0x53c   : > { %1761 = vadd.xlane.f32.xlu1 %v1760_v54  ;;  %v4840_v19 = vpop.f32.mrb[25].mxu1  ;;  %v4874_v11 = vpop.f32.mrb[21].mxu0 }
 0x53d   : > { %v4841_v12 = vadd.f32 %v4840_v19, %v4839_v2  ;;  %v4875_v14 = vadd.f32 %v4874_v11, %v4873_v16  ;;  %v4842_v17 = vpop.f32.mrb[26].mxu1  ;;  %v4876_v22 = vpop.f32.mrb[22].mxu0 }
 0x53e   : > { %v4843_v13 = vpop.f32.mrb[27].mxu1  ;;  %v4877_v23 = vpop.f32.mrb[23].mxu0 }
 0x53f   : > { %v4844_v18 = vadd.f32 %v4843_v13, %v4842_v17  ;;  %v4878_v20 = vadd.f32 %v4877_v23, %v4876_v22  ;;  %v1744_v25 = vadd.f32 %v4875_v14, %v4841_v12  ;;  %v1990_v14 = vld [vmem:[%s7846_s5] sm:$0xff]  ;;  %v1991_v17 = vld [vmem:[%s7846_s5 + $0x8] sm:$0xff]  ;;  %v1992_v22 = vld [vmem:[%s7846_s5 + $0x10] sm:$0xff]  ;;  %v7858_v13 = vmov 0.0|0.0  }
 0x540   : > { %5228 = vmatprep.subr.bf16.mxu1 %v7858_v13  ;;  %v5229_v23 = vpack.c.bf16 %v1991_v17, %v1990_v14 }
 0x541   : > { %v1763_v35 = vsel %vm1110_vm5, %v1744_v25, 0.0  ;;  %v1747_v28 = vadd.f32 %v4878_v20, %v4844_v18  ;;  %v1993_v18 = vld [vmem:[%s7846_s5 + $0x18] sm:$0xff] }
 0x542   : > { %1764 = vadd.xlane.f32.xlu0 %v1763_v35  ;;  %5230 = vmatpush3.bf16.msra.mxu1 %v5229_v23  ;;  %v5232_v20 = vpack.c.bf16 %v1993_v18, %v1992_v22 }
 0x543   : > { %v4845_v30 = vpop.f32.mrb[28].mxu1  ;;  %v4879_v36 = vpop.f32.mrb[24].mxu0  ;;  %v1766_v24 = vsel %vm1110_vm5, %v1747_v28, 0.0  ;;  %5231 = vmatprep.subr.bf16.mxu1 %v7858_v13 }
 0x544   : > { %v4846_v26 = vpop.f32.mrb[29].mxu1  ;;  %v4880_v27 = vpop.f32.mrb[25].mxu0  ;;  %1767 = vadd.xlane.f32.xlu1 %v1766_v24 }
 0x545   : > { %v4847_v29 = vadd.f32 %v4846_v26, %v4845_v30  ;;  %v4881_v32 = vadd.f32 %v4880_v27, %v4879_v36  ;;  %v4848_v4 = vpop.f32.mrb[30].mxu1  ;;  %v4882_v33 = vpop.f32.mrb[26].mxu0 }
 0x546   : > { %v4849_v42 = vpop.f32.mrb[31].mxu1  ;;  %v4883_v40 = vpop.f32.mrb[27].mxu0  ;;  %5233 = vmatpush3.bf16.msra.mxu1 %v5232_v20 }
 0x547   : > { %v1752_v45 = vadd.f32 %v4881_v32, %v4847_v29  ;;  %v1824_v29 = vsub.s32 3, %v5946_v61  ;;  %v1833_v42 = vsub.s32 4, %v5946_v61 }
 0x549   : > { %v1769_v62 = vsel %vm1110_vm5, %v1752_v45, 0.0 }
 0x54a   : > { %1770 = vadd.xlane.f32.xlu0 %v1769_v62 }
 0x5c7   : > { %v1759_v47 = vpop.xlane.xlu0 %1758 }
 0x5c8   : > { %v1772_v58 = vmul.f32 0.03125, %v1759_v47  ;;  %v1834_v47 = vrot.slane %v5955_v1, %v1833_v42 }
 0x5c9   : > { %v1762_v48 = vpop.xlane.xlu1 %1761 }
 0x5ca   : > { %v1777_v7 = vsub.f32 %v1736_v8, %v1772_v58  ;;  %v1773_v52 = vmul.f32 0.03125, %v1762_v48 }
 0x5cc   : > { %v1778_v15 = vsub.f32 %v1739_v53, %v1773_v52  ;;  %v1782_v34 = vmul.f32 %v1777_v7, %v1777_v7 }
 0x5ce   : > { %v1787_v38 = vsel %vm1110_vm5, %v1782_v34, 0.0  ;;  %v1783_v39 = vmul.f32 %v1778_v15, %v1778_v15 }
 0x5cf   : > { %1788 = vadd.xlane.f32.xlu1 %v1787_v38  ;;  %v1765_v41 = vpop.xlane.xlu0 %1764 }
 0x5d0   : > { %v1790_v10 = vsel %vm1110_vm5, %v1783_v39, 0.0  ;;  %v1774_v46 = vmul.f32 0.03125, %v1765_v41 }
 0x5d1   : > { %1791 = vadd.xlane.f32.xlu0 %v1790_v10  ;;  %v1768_v56 = vpop.xlane.xlu1 %1767 }
 0x5d2   : > { %v1779_v57 = vsub.f32 %v1744_v25, %v1774_v46  ;;  %v1775_v63 = vmul.f32 0.03125, %v1768_v56 }
 0x5d4   : > { %v6303_v6 = vsub.f32 %v1747_v28, %v1775_v63  ;;  %v1784_v49 = vmul.f32 %v1779_v57, %v1779_v57 }
 0x5d6   : > { %v1793_v8 = vsel %vm1110_vm5, %v1784_v49, 0.0  ;;  %v1785_v53 = vmul.f32 %v6303_v6, %v6303_v6 }
 0x5d7   : > { %1794 = vadd.xlane.f32.xlu1 %v1793_v8  ;;  %v1771_v54 = vpop.xlane.xlu0 %1770 }
 0x5d8   : > { %v1776_v2 = vmul.f32 0.03125, %v1771_v54  ;;  %v1796_v16 = vsel %vm1110_vm5, %v1785_v53, 0.0 }
 0x5d9   : > { %1797 = vadd.xlane.f32.xlu0 %v1796_v16 }
 0x5da   : > { %v6309_v19 = vsub.f32 %v1752_v45, %v1776_v2  ;;  %v1825_v45 = vrot.slane %v5955_v1, %v1824_v29 }
 0x5dc   : > { %v1786_v11 = vmul.f32 %v6309_v19, %v6309_v19 }
 0x5de   : > { %v1799_v12 = vsel %vm1110_vm5, %v1786_v11, 0.0 }
 0x5df   : > { %1800 = vadd.xlane.f32.xlu1 %v1799_v12 }
 0x65c   : > { %v1789_v25 = vpop.xlane.xlu1 %1788 }
 0x65d   : > { %v1802_v35 = vmul.f32 0.03125, %v1789_v25 }
 0x65e   : > { %v1792_v28 = vpop.xlane.xlu0 %1791 }
 0x65f   : > { %v1807_v30 = vadd.f32 1e-05, %v1802_v35  ;;  %v1803_v36 = vmul.f32 0.03125, %v1792_v28 }
 0x661   : > { %5674 = vrsqrt.f32 %v1807_v30  ;;  %v1808_v24 = vadd.f32 1e-05, %v1803_v36 }
 0x663   : > { %5676 = vrsqrt.f32 %v1808_v24 }
 0x664   : > { %v1795_v26 = vpop.xlane.xlu1 %1794 }
 0x665   : > { %v1804_v27 = vmul.f32 0.03125, %v1795_v26 }
 0x666   : > { %v1798_v32 = vpop.xlane.xlu0 %1797 }
 0x667   : > { %v1809_v4 = vadd.f32 1e-05, %v1804_v27  ;;  %v1805_v33 = vmul.f32 0.03125, %v1798_v32 }
 0x669   : > { %5678 = vrsqrt.f32 %v1809_v4  ;;  %v1810_v40 = vadd.f32 1e-05, %v1805_v33 }
 0x66b   : > { %v5675_v62 = vpop.eup %5674  ;;  %5680 = vrsqrt.f32 %v1810_v40 }
 0x66c   : > { %v1817_v58 = vmul.f32 %v5675_v62, %v1777_v7  ;;  %v1801_v48 = vpop.xlane.xlu1 %1800 }
 0x66d   : > { %v5677_v52 = vpop.eup %5676  ;;  %v1806_v34 = vmul.f32 0.03125, %v1801_v48 }
 0x66e   : > { %v1826_v38 = vmul.f32 %v1825_v45, %v1817_v58  ;;  %v1818_v39 = vmul.f32 %v5677_v52, %v1778_v15 }
 0x66f   : > { %v1811_v41 = vadd.f32 1e-05, %v1806_v34 }
 0x670   : > { %v6336_v10 = vadd.f32 %v1834_v47, %v1826_v38  ;;  %v1827_v46 = vmul.f32 %v1825_v45, %v1818_v39 }
 0x671   : > { %5682 = vrsqrt.f32 %v1811_v41 }
 0x672   : > { %v6339_v56 = vmul.f32 0.70710677, %v6336_v10  ;;  %v6341_v63 = vadd.f32 %v1834_v47, %v1827_v46 }
 0x673   : > { %v5679_v49 = vpop.eup %5678 }
 0x674   : > { %v1860_v8 = vand.u32 2147483647, %v6339_v56  ;;  %v1819_v1 = vmul.f32 %v5679_v49, %v1779_v57  ;;  %v6345_v53 = vmul.f32 0.70710677, %v6341_v63  ;;  %vm1850_vm6 = vcmp.ge.f32.partialorder %v6339_v56, 0.0 }
 0x675   : > { %v5681_v7 = vpop.eup %5680 }
 0x676   : > { %v1865_v54 = vmul.f32 0.3275911, %v1860_v8  ;;  %v1828_v15 = vmul.f32 %v1825_v45, %v1819_v1  ;;  %v1820_v2 = vmul.f32 %v5681_v7, %v6303_v6  ;;  %v1861_v16 = vand.u32 2147483647, %v6345_v53 }
 0x677   : > { %v1940_v40 = vsub.f32 0.0, %v1860_v8  ;;  %vm1851_vm7 = vcmp.ge.f32.partialorder %v6345_v53, 0.0 }
 0x678   : > { %v1870_v11 = vadd.f32 1.0, %v1865_v54  ;;  %v1829_v12 = vmul.f32 %v1825_v45, %v1820_v2  ;;  %v1866_v14 = vmul.f32 0.3275911, %v1861_v16  ;;  %v6349_v17 = vadd.f32 %v1834_v47, %v1828_v15 }
 0x679   : > { %v1945_v38 = vmul.f32 %v1940_v40, %v1860_v8 }
 0x67a   : > { %5684 = vrcp.f32 %v1870_v11  ;;  %v6351_v22 = vadd.f32 %v1834_v47, %v1829_v12  ;;  %v1871_v57 = vadd.f32 1.0, %v1866_v14  ;;  %v6354_v18 = vmul.f32 0.70710677, %v6349_v17 }
 0x67b   : > { %v5683_v23 = vpop.eup %5682  ;;  %v1950_v15 = vmul.f32 1.442695, %v1945_v38 }
 0x67c   : > { %v1821_v20 = vmul.f32 %v5683_v23, %v6309_v19  ;;  %v6358_v25 = vmul.f32 0.70710677, %v6351_v22  ;;  %5686 = vrcp.f32 %v1871_v57  ;;  %v1862_v6 = vand.u32 2147483647, %v6354_v18 }
 0x67d   : > { %vm1852_vm8 = vcmp.ge.f32.partialorder %v6354_v18, 0.0 }
 0x67e   : > { %v1830_v35 = vmul.f32 %v1825_v45, %v1821_v20  ;;  %v1863_v28 = vand.u32 2147483647, %v6358_v25  ;;  %v1867_v30 = vmul.f32 0.3275911, %v1862_v6  ;;  %v1942_v14 = vsub.f32 0.0, %v1862_v6 }
 0x67f   : > { %vm1853_vm9 = vcmp.ge.f32.partialorder %v6358_v25, 0.0 }
 0x680   : > { %v1868_v36 = vmul.f32 0.3275911, %v1863_v28  ;;  %v6362_v24 = vadd.f32 %v1834_v47, %v1830_v35  ;;  %v1872_v26 = vadd.f32 1.0, %v1867_v30  ;;  %v1941_v47 = vsub.f32 0.0, %v1861_v16 }
 0x681   : > { %v1943_v35 = vsub.f32 0.0, %v1863_v28 }
 0x682   : > { %v1873_v27 = vadd.f32 1.0, %v1868_v36  ;;  %v6365_v32 = vmul.f32 0.70710677, %v6362_v24  ;;  %5688 = vrcp.f32 %v1872_v26  ;;  %v1946_v7 = vmul.f32 %v1941_v47, %v1861_v16 }
 0x684   : > { %v5685_v19 = vpop.eup %5684  ;;  %5690 = vrcp.f32 %v1873_v27  ;;  %v1864_v4 = vand.u32 2147483647, %v6365_v32  ;;  %v1952_v36 = vmul.f32 1.442695, %v1946_v7  ;;  %vm1854_vm10 = vcmp.ge.f32.partialorder %v6365_v32, 0.0 }
 0x685   : > { %v1880_v33 = vmul.f32 %v5685_v19, %v1870_v11  ;;  %v1844_v32 = vmul.f32 0.5, %v6362_v24  ;;  %v2221_v24 = vld [vmem:[%s7847_s6 + $0x18] sm:$0xff] }
 0x686   : > { %v1869_v62 = vmul.f32 0.3275911, %v1864_v4  ;;  %v5687_v45 = vpop.eup %5686 }
 0x687   : > { %v1885_v58 = vsub.f32 2.0, %v1880_v33  ;;  %v1881_v48 = vmul.f32 %v5687_v45, %v1871_v57 }
 0x688   : > { %v1874_v52 = vadd.f32 1.0, %v1869_v62  ;;  %v1947_v62 = vmul.f32 %v1942_v14, %v1862_v6 }
 0x689   : > { %v1890_v34 = vmul.f32 %v5685_v19, %v1885_v58  ;;  %v1886_v39 = vsub.f32 2.0, %v1881_v48  ;;  %v1948_v48 = vmul.f32 %v1943_v35, %v1863_v28 }
 0x68a   : > { %5692 = vrcp.f32 %v1874_v52 }
 0x68b   : > { %v1895_v41 = vmul.f32 1.0614054, %v1890_v34  ;;  %v1891_v46 = vmul.f32 %v5687_v45, %v1886_v39  ;;  %5694 = vpow2.f32 %v1950_v15 }
 0x68c   : > { %v5689_v49 = vpop.eup %5688  ;;  %5696 = vpow2.f32 %v1952_v36 }
 0x68d   : > { %v1900_v1 = vadd.f32 -1.4531521, %v1895_v41  ;;  %v1896_v2 = vmul.f32 1.0614054, %v1891_v46  ;;  %v1882_v11 = vmul.f32 %v5689_v49, %v1872_v26 }
 0x68e   : > { %v5691_v54 = vpop.eup %5690 }
 0x68f   : > { %v1905_v12 = vmul.f32 %v1900_v1, %v1890_v34  ;;  %v1883_v23 = vmul.f32 %v5691_v54, %v1873_v27  ;;  %v1901_v20 = vadd.f32 -1.4531521, %v1896_v2  ;;  %v1887_v57 = vsub.f32 2.0, %v1882_v11 }
 0x690   : > { %v1944_v1 = vsub.f32 0.0, %v1864_v4  ;;  %v1956_v11 = vmul.f32 1.442695, %v1948_v48 }
 0x691   : > { %v1910_v30 = vadd.f32 1.4214138, %v1905_v12  ;;  %v1888_v8 = vsub.f32 2.0, %v1883_v23  ;;  %v1906_v19 = vmul.f32 %v1901_v20, %v1891_v46  ;;  %v6368_v33 = vmul.f32 %v5689_v49, %v1887_v57 }
 0x692   : > { %v1954_v49 = vmul.f32 1.442695, %v1947_v62  ;;  %v1949_v57 = vmul.f32 %v1944_v1, %v1864_v4 }
 0x693   : > { %v1915_v40 = vmul.f32 %v1910_v30, %v1890_v34  ;;  %v6370_v16 = vmul.f32 %v5691_v54, %v1888_v8  ;;  %v1911_v58 = vadd.f32 1.4214138, %v1906_v19  ;;  %v1897_v26 = vmul.f32 1.0614054, %v6368_v33 }
 0x694   : > { %v5693_v45 = vpop.eup %5692  ;;  %5698 = vpow2.f32 %v1954_v49  ;;  %v1958_v48 = vmul.f32 1.442695, %v1949_v57 }
 0x695   : > { %v1920_v27 = vadd.f32 -0.28449672, %v1915_v40  ;;  %v1898_v47 = vmul.f32 1.0614054, %v6370_v16  ;;  %v1884_v38 = vmul.f32 %v5693_v45, %v1874_v52  ;;  %v1916_v39 = vmul.f32 %v1911_v58, %v1891_v46  ;;  %v5695_v36 = vpop.eup %5694 }
 0x696   : > { %v1902_v41 = vadd.f32 -1.4531521, %v1897_v26  ;;  %5700 = vpow2.f32 %v1956_v11  ;;  %v5697_v4 = vpop.eup %5696 }
 0x697   : > { %v1925_v7 = vmul.f32 %v1920_v27, %v1890_v34  ;;  %v1903_v15 = vadd.f32 -1.4531521, %v1898_v47  ;;  %v1889_v2 = vsub.f32 2.0, %v1884_v38  ;;  %v1921_v6 = vadd.f32 -0.28449672, %v1916_v39 }
 0x698   : > { %v1907_v54 = vmul.f32 %v1902_v41, %v6368_v33  ;;  %v7856_v38 = vmov -1.0   ;;  %5702 = vpow2.f32 %v1958_v48 }
 0x699   : > { %v1930_v12 = vadd.f32 0.2548296, %v1925_v7  ;;  %v1908_v14 = vmul.f32 %v1903_v15, %v6370_v16  ;;  %v6376_v28 = vmul.f32 %v5693_v45, %v1889_v2  ;;  %v1926_v23 = vmul.f32 %v1921_v6, %v1891_v46 }
 0x69a   : > { %v1912_v20 = vadd.f32 1.4214138, %v1907_v54  ;;  %v1855_v39 = vsel %vm1850_vm6, 1.0, %v7856_v38  ;;  %v1856_v54 = vsel %vm1851_vm7, 1.0, %v7856_v38  ;;  %v1858_v18 = vsel %vm1853_vm9, 1.0, %v7856_v38 }
 0x69b   : > { %v1935_v52 = vmul.f32 %v1930_v12, %v1890_v34  ;;  %v1913_v35 = vadd.f32 1.4214138, %v1908_v14  ;;  %v1899_v30 = vmul.f32 1.0614054, %v6376_v28  ;;  %v1931_v8 = vadd.f32 0.2548296, %v1926_v23 }
 0x69c   : > { %v1917_v19 = vmul.f32 %v1912_v20, %v6368_v33 }
 0x69d   : > { %v1960_v40 = vmul.f32 %v5695_v36, %v1935_v52  ;;  %v1918_v62 = vmul.f32 %v1913_v35, %v6370_v16  ;;  %v1904_v45 = vadd.f32 -1.4531521, %v1899_v30  ;;  %v1936_v58 = vmul.f32 %v1931_v8, %v1891_v46 }
 0x69e   : > { %v1922_v26 = vadd.f32 -0.28449672, %v1917_v19  ;;  %v1840_v46 = vmul.f32 0.5, %v6336_v10  ;;  %v5699_v23 = vpop.eup %5698  ;;  %v1841_v10 = vmul.f32 0.5, %v6341_v63 }
 0x69f   : > { %v1965_v34 = vsub.f32 1.0, %v1960_v40  ;;  %v1923_v27 = vadd.f32 -0.28449672, %v1918_v62  ;;  %v1909_v47 = vmul.f32 %v1904_v45, %v6376_v28  ;;  %v1961_v41 = vmul.f32 %v5697_v4, %v1936_v58 }
 0x6a0   : > { %v1927_v56 = vmul.f32 %v1922_v26, %v6368_v33  ;;  %v5701_v35 = vpop.eup %5700  ;;  %v1842_v4 = vmul.f32 0.5, %v6349_v17 }
 0x6a1   : > { %v1970_v1 = vmul.f32 %v1965_v34, %v1855_v39  ;;  %v1928_v7 = vmul.f32 %v1923_v27, %v6370_v16  ;;  %v1914_v49 = vadd.f32 1.4214138, %v1909_v47  ;;  %v1966_v15 = vsub.f32 1.0, %v1961_v41 }
 0x6a2   : > { %v1932_v2 = vadd.f32 0.2548296, %v1927_v56  ;;  %v5703_v48 = vpop.eup %5702  ;;  %v1843_v41 = vmul.f32 0.5, %v6351_v22  ;;  %v2219_v22 = vld [vmem:[%s7847_s6 + $0x8] sm:$0xff] }
 0x6a3   : > { %v1975_v6 = vadd.f32 1.0, %v1970_v1  ;;  %v1933_v11 = vadd.f32 0.2548296, %v1928_v7  ;;  %v1919_v12 = vmul.f32 %v1914_v49, %v6376_v28  ;;  %v1971_v14 = vmul.f32 %v1966_v15, %v1856_v54 }
 0x6a4   : > { %v1937_v53 = vmul.f32 %v1932_v2, %v6368_v33  ;;  %v1859_v1 = vsel %vm1854_vm10, 1.0, %v7856_v38  ;;  %v2227_v2 = vld [vmem:[%s7847_s6 + $0x48] sm:$0xff] }
 0x6a5   : > { %v1980_v20 = vmul.f32 %v1975_v6, %v1840_v46  ;;  %v1938_v57 = vmul.f32 %v1933_v11, %v6370_v16  ;;  %v1924_v52 = vadd.f32 -0.28449672, %v1919_v12  ;;  %v1976_v30 = vadd.f32 1.0, %v1971_v14  ;;  %v2230_v6 = vld [vmem:[%s7847_s6 + $0x60] sm:$0xff]  ;;  %v2220_v12 = vld [vmem:[%s7847_s6 + $0x10] sm:$0xff]  ;;  %v2229_v14 = vld [vmem:[%s7847_s6 + $0x58] sm:$0xff] }
 0x6a6   : > { %v1962_v36 = vmul.f32 %v5699_v23, %v1937_v53  ;;  %v1857_v16 = vsel %vm1852_vm8, 1.0, %v7856_v38  ;;  %v5250_v11 = vpack.c.bf16 %v2230_v6, %v2221_v24  ;;  %v5252_v53 = vpack.c.bf16 %v2229_v14, %v2220_v12  ;;  %v2237_v23 = vld [vmem:[%s7847_s6 + $0x98] sm:$0xff]  ;;  %v2234_v24 = vld [vmem:[%s7847_s6 + $0x80] sm:$0xff] }
 0x6a7   : > { %v1985_v8 = vadd.f32 %v1980_v20, %v6015_v43  ;;  %v1963_v19 = vmul.f32 %v5701_v35, %v1938_v57  ;;  %v1929_v40 = vmul.f32 %v1924_v52, %v6376_v28  ;;  %v1981_v33 = vmul.f32 %v1976_v30, %v1841_v10  ;;  %v2246_v20 = vld [vmem:[%s7847_s6 + $0xe0] sm:$0xff]  ;;  %v2239_v57 = vld [vmem:[%s7847_s6 + $0xa8] sm:$0xff]  ;;  %v2236_v35 = vld [vmem:[%s7847_s6 + $0x90] sm:$0xff] }
 0x6a8   : > { %v1967_v62 = vsub.f32 1.0, %v1962_v36  ;;  %5251 = vmatprep.subr.bf16.mxu1 %v5250_v11  ;;  %v5238_v52 = vpack.c.bf16 %v2246_v20, %v2237_v23  ;;  %v2245_v10 = vld [vmem:[%s7847_s6 + $0xd8] sm:$0xff]  ;;  %v2248_v30 = vld [vmem:[%s7847_s6 + $0xf0] sm:$0xff]  ;;  %v2108_v6 = vsub.s32 5, %v5946_v61  ;;  %v6540_v11 = vld [vmem:[%s7842_s1] sm:$0xff] }
 0x6a9   : > { %5081 = vmatmul.mubr.msk.f32.vlgmr.msra.gmra.mrb[6].mxu1 %vm1110_vm5, %v1985_v8  ;;  %v1968_v45 = vsub.f32 1.0, %v1963_v19  ;;  %v1934_v58 = vadd.f32 0.2548296, %v1929_v40  ;;  %v1986_v43 = vadd.f32 %v1981_v33, %v6017_v44  ;;  %v5240_v36 = vpack.c.bf16 %v2245_v10, %v2236_v35  ;;  %v2238_v19 = vld [vmem:[%s7847_s6 + $0xa0] sm:$0xff]  ;;  %v2247_v40 = vld [vmem:[%s7847_s6 + $0xe8] sm:$0xff] }
 0x6aa   : > { %5083 = vmatprep.mubr.msk.f32.mxu1 %vm5823_vm0, %v7860_v5  ;;  %v1972_v63 = vmul.f32 %v1967_v62, %v1857_v16  ;;  %5253 = vmatpush1.bf16.msra.mxu1 %v5252_v53  ;;  %v5254_v8 = vpack.c.bf16 %v2248_v30, %v2239_v57  ;;  %v5256_v33 = vpack.c.bf16 %v2247_v40, %v2238_v19  ;;  %v2255_v62 = vld [vmem:[%s7847_s6 + $0x128] sm:$0xff]  ;;  %v2264_v16 = vld [vmem:[%s7847_s6 + $0x170] sm:$0xff] }
 0x6ab   : > { %v1973_v25 = vmul.f32 %v1968_v45, %v1858_v18  ;;  %v1939_v26 = vmul.f32 %v1934_v58, %v6376_v28  ;;  %v2257_v45 = vld [vmem:[%s7847_s6 + $0x138] sm:$0xff]  ;;  %v5242_v58 = vpack.c.bf16 %v2264_v16, %v2255_v62  ;;  %v2263_v18 = vld [vmem:[%s7847_s6 + $0x168] sm:$0xff]  ;;  %v2109_v12 = vrot.slane %v6540_v11, %v2108_v6 }
 0x6ac   : > { %v1977_v34 = vadd.f32 1.0, %v1972_v63  ;;  %5255 = vmatprep.subr.bf16.mxu1 %v5254_v8  ;;  %v2254_v63 = vld [vmem:[%s7847_s6 + $0x120] sm:$0xff] }
 0x6ad   : > { %5084 = vmatmul.mubr.msk.f32.gmra.mrb[32].mxu1 %vm1110_vm5, %v1986_v43  ;;  %v1978_v27 = vadd.f32 1.0, %v1973_v25  ;;  %v1964_v47 = vmul.f32 %v5703_v48, %v1939_v26  ;;  %v2266_v43 = vld [vmem:[%s7847_s6 + $0x180] sm:$0xff]  ;;  %v5244_v25 = vpack.c.bf16 %v2263_v18, %v2254_v63  ;;  %v2256_v48 = vld [vmem:[%s7847_s6 + $0x130] sm:$0xff] }
 0x6ae   : > { %5086 = vmatprep.mubr.msk.f32.mxu1 %vm5823_vm0, %v7860_v5  ;;  %v1982_v39 = vmul.f32 %v1977_v34, %v1842_v4  ;;  %5257 = vmatpush1.bf16.msra.mxu1 %v5256_v33  ;;  %v5258_v26 = vpack.c.bf16 %v2266_v43, %v2257_v45  ;;  %v2265_v4 = vld [vmem:[%s7847_s6 + $0x178] sm:$0xff] }
 0x6af   : > { %v1969_v44 = vsub.f32 1.0, %v1964_v47  ;;  %v1983_v28 = vmul.f32 %v1978_v27, %v1843_v41  ;;  %v5260_v34 = vpack.c.bf16 %v2265_v4, %v2256_v48  ;;  %v2273_v27 = vld [vmem:[%s7847_s6 + $0x1b8] sm:$0xff]  ;;  %v2282_v47 = vld [vmem:[%s7847_s6 + $0x200] sm:$0xff] }
 0x6b0   : > { %v1987_v56 = vadd.f32 %v1982_v39, %v6023_v50  ;;  %5259 = vmatprep.subr.bf16.mxu1 %v5258_v26  ;;  %v2275_v39 = vld [vmem:[%s7847_s6 + $0x1c8] sm:$0xff]  ;;  %v5246_v41 = vpack.c.bf16 %v2282_v47, %v2273_v27 }
 0x6b1   : > { %v1974_v17 = vmul.f32 %v1969_v44, %v1859_v1  ;;  %v1988_v49 = vadd.f32 %v1983_v28, %v6025_v51  ;;  %v2228_v51 = vld [vmem:[%s7847_s6 + $0x50] sm:$0xff] }
 0x6b2   : > { %5087 = vmatmul.mubr.msk.f32.gmra.mrb[34].mxu1 %vm1110_vm5, %v1987_v56  ;;  %v5234_v15 = vpack.c.bf16 %v2228_v51, %v2219_v22  ;;  %v2272_v44 = vld [vmem:[%s7847_s6 + $0x1b0] sm:$0xff]  ;;  %v2281_v56 = vld [vmem:[%s7847_s6 + $0x1f8] sm:$0xff] }
 0x6b3   : > { %5089 = vmatprep.mubr.msk.f32.mxu1 %vm5823_vm0, %v7860_v5  ;;  %v1979_v7 = vadd.f32 1.0, %v1974_v17  ;;  %5261 = vmatpush1.bf16.msra.mxu1 %v5260_v34  ;;  %v2284_v28 = vld [vmem:[%s7847_s6 + $0x210] sm:$0xff]  ;;  %v5248_v1 = vpack.c.bf16 %v2281_v56, %v2272_v44  ;;  %v2225_v22 = vld [vmem:[%s7847_s6 + $0x38] sm:$0xff] }
 0x6b4   : > { %5235 = vmatprep.subr.bf16.mxu0 %v5234_v15  ;;  %v5262_v17 = vpack.c.bf16 %v2284_v28, %v2275_v39  ;;  %v5282_v15 = vpack.c.bf16 %v2234_v24, %v2225_v22 }
 0x6b5   : > { %v1984_v46 = vmul.f32 %v1979_v7, %v1844_v32  ;;  %v2274_v32 = vld [vmem:[%s7847_s6 + $0x1c0] sm:$0xff]  ;;  %v2283_v7 = vld [vmem:[%s7847_s6 + $0x208] sm:$0xff] }
 0x6b6   : > { %5090 = vmatmul.mubr.msk.f32.gmra.mrb[36].mxu1 %vm1110_vm5, %v1988_v49  ;;  %v5264_v49 = vpack.c.bf16 %v2283_v7, %v2274_v32  ;;  %5263 = vmatprep.subr.bf16.mxu1 %v5262_v17 }
 0x6b7   : > { %5092 = vmatprep.mubr.msk.f32.mxu1 %vm5823_vm0, %v7860_v5  ;;  %v1989_v50 = vadd.f32 %v1984_v46, %v6031_v55  ;;  %v2218_v55 = vld [vmem:[%s7847_s6] sm:$0xff]  ;;  %v2223_v46 = vld [vmem:[%s7847_s6 + $0x28] sm:$0xff] }
 0x6b8   : > { %v5236_v54 = vpack.c.bf16 %v2227_v2, %v2218_v55  ;;  %5265 = vmatpush1.bf16.msra.mxu1 %v5264_v49  ;;  %v424_v55 = vld [vmem:[%s7842_s1 + $0x8] sm:$0xff] }
 0x6b9   : > { %5283 = vmatprep.subr.bf16.mxu1 %v5282_v15  ;;  %v2102_v2 = vrot.slane %v424_v55, %v532_v37  ;;  %v2116_v14 = vrot.slane %v424_v55, %v1824_v29  ;;  %v2128_v20 = vrot.slane %v424_v55, %v1833_v42 }
 0x6ba   : > { %5093 = vmatmul.mubr.msk.f32.gmra.mrb[38].mxu1 %vm1110_vm5, %v1989_v50  ;;  %5237 = vmatpush1.bf16.msra.mxu0 %v5236_v54  ;;  %v2232_v50 = vld [vmem:[%s7847_s6 + $0x70] sm:$0xff] }
 0x6bb   : > { %2465 = vmatprep.mubr.f32.mxu1 %v7860_v5  ;;  %5239 = vmatprep.subr.bf16.mxu0 %v5238_v52  ;;  %v5266_v51 = vpack.c.bf16 %v2232_v50, %v2223_v46  ;;  %v2103_v54 = vmul.f32 0.0, %v2102_v2  ;;  %v2117_v23 = vmul.f32 0.0, %v2116_v14  ;;  %v2129_v37 = vmul.f32 0.0, %v2128_v20 }
 0x6bc   : > { %v2142_v52 = vrot.slane %v424_v55, %v2108_v6 }
 0x6bd   : > { %v2110_v53 = vadd.f32 %v2109_v12, %v2103_v54 }
 0x6be   : > { %5241 = vmatpush1.bf16.msra.mxu0 %v5240_v36 }
 0x6bf   : > { %5243 = vmatprep.subr.bf16.mxu0 %v5242_v58  ;;  %v2121_v57 = vadd.f32 %v2117_v23, %v2110_v53 }
 0x6c1   : > { %v2134_v35 = vadd.f32 %v2129_v37, %v2121_v57 }
 0x6c2   : > { %5245 = vmatpush1.bf16.msra.mxu0 %v5244_v25 }
 0x6c3   : > { %5247 = vmatprep.subr.bf16.mxu0 %v5246_v41 }
 0x6c6   : > { %5249 = vmatpush1.bf16.msra.mxu0 %v5248_v1 }
 0x6c7   : > { %5267 = vmatprep.subr.bf16.mxu0 %v5266_v51 }
 0x77c   : > { %v6547_v10 = vpop.f32.mrb[6].mxu1 }
 0x77d   : > { %v2104_v30 = vmul.f32 %v2102_v2, %v6547_v10  ;;  %v2118_v36 = vmul.f32 %v2116_v14, %v6547_v10  ;;  %v2143_v8 = vmul.f32 %v2142_v52, %v6547_v10  ;;  %v5082_v19 = vpop.f32.mrb[7].mxu1  ;;  %v2130_v29 = vmul.f32 %v2128_v20, %v6547_v10 }
 0x77e   : > { %vm3821_vm9 = vcmp.ge.f32.partialorder %v6547_v10, 0.0 }
 0x77f   : > { %v6553_v40 = vadd.f32 %v2143_v8, %v2134_v35  ;;  %v2122_v42 = vadd.f32 %v2118_v36, %v2110_v53  ;;  %v2111_v58 = vadd.f32 %v2109_v12, %v2104_v30  ;;  %v2135_v63 = vadd.f32 %v2130_v29, %v2121_v57 }
 0x780   : > { %v6555_v33 = vpop.f32.mrb[32].mxu1 }
 0x781   : > { %v2153_v62 = vand.u32 2147483647, %v6553_v40  ;;  %v2119_v16 = vmul.f32 %v2116_v14, %v6555_v33  ;;  %v5085_v45 = vpop.f32.mrb[33].mxu1  ;;  %v2105_v18 = vmul.f32 %v2102_v2, %v6555_v33  ;;  %v2131_v43 = vmul.f32 %v2128_v20, %v6555_v33 }
 0x782   : > { %v2144_v25 = vmul.f32 %v2142_v52, %v6555_v33  ;;  %vm2198_vm11 = vcmp.ge.f32.partialorder %v6553_v40, 0.0 }
 0x783   : > { %v2158_v26 = vsub.f32 0.0, %v2153_v62  ;;  %v2123_v48 = vadd.f32 %v2119_v16, %v2111_v58  ;;  %v2136_v34 = vadd.f32 %v2131_v43, %v2122_v42  ;;  %v2112_v56 = vadd.f32 %v2109_v12, %v2105_v18 }
 0x784   : > { %v6562_v4 = vadd.f32 %v2144_v25, %v2135_v63 }
 0x785   : > { %v2163_v27 = vmul.f32 1.442695, %v2158_v26  ;;  %v6564_v47 = vpop.f32.mrb[34].mxu1 }
 0x786   : > { %v2154_v39 = vand.u32 2147483647, %v6562_v4  ;;  %v2120_v41 = vmul.f32 %v2116_v14, %v6564_v47  ;;  %v5088_v44 = vpop.f32.mrb[35].mxu1  ;;  %v2132_v28 = vmul.f32 %v2128_v20, %v6564_v47  ;;  %v2145_v1 = vmul.f32 %v2142_v52, %v6564_v47 }
 0x787   : > { %5704 = vpow2.f32 %v2163_v27  ;;  %v2222_v27 = vld [vmem:[%s7847_s6 + $0x20] sm:$0xff]  ;;  %v2241_v44 = vld [vmem:[%s7847_s6 + $0xb8] sm:$0xff]  ;;  %vm2199_vm13 = vcmp.ge.f32.partialorder %v6562_v4, 0.0 }
 0x788   : > { %v2159_v17 = vsub.f32 0.0, %v2154_v39  ;;  %v2124_v32 = vadd.f32 %v2120_v41, %v2112_v56  ;;  %v6570_v7 = vadd.f32 %v2145_v1, %v2136_v34  ;;  %v2137_v46 = vadd.f32 %v2132_v28, %v2123_v48  ;;  %v2231_v39 = vld [vmem:[%s7847_s6 + $0x68] sm:$0xff]  ;;  %v2250_v56 = vld [vmem:[%s7847_s6 + $0x100] sm:$0xff]  ;;  %v2224_v1 = vld [vmem:[%s7847_s6 + $0x30] sm:$0xff] }
 0x789   : > { %v6572_v49 = vpop.f32.mrb[36].mxu1 }
 0x78a   : > { %v2165_v50 = vmul.f32 1.442695, %v2159_v17  ;;  %v2133_v22 = vmul.f32 %v2128_v20, %v6572_v49  ;;  %v2146_v51 = vmul.f32 %v2142_v52, %v6572_v49  ;;  %v5091_v24 = vpop.f32.mrb[37].mxu1  ;;  %v2155_v15 = vand.u32 2147483647, %v6570_v7  ;;  %v2233_v17 = vld [vmem:[%s7847_s6 + $0x78] sm:$0xff] }
 0x78b   : > { %vm2200_vm14 = vcmp.ge.f32.partialorder %v6570_v7, 0.0 }
 0x78c   : > { %5706 = vpow2.f32 %v2165_v50  ;;  %v6577_v55 = vadd.f32 %v2146_v51, %v2137_v46  ;;  %v2138_v2 = vadd.f32 %v2133_v22, %v2124_v32  ;;  %v2160_v6 = vsub.f32 0.0, %v2155_v15  ;;  %v2243_v50 = vld [vmem:[%s7847_s6 + $0xc8] sm:$0xff]  ;;  %v2252_v22 = vld [vmem:[%s7847_s6 + $0x110] sm:$0xff] }
 0x78d   : > { %v6579_v54 = vpop.f32.mrb[38].mxu1  ;;  %v5268_v46 = vpack.c.bf16 %v2231_v39, %v2222_v27  ;;  %v2269_v39 = vld [vmem:[%s7847_s6 + $0x198] sm:$0xff] }
 0x78e   : > { %v2156_v12 = vand.u32 2147483647, %v6577_v55  ;;  %v2147_v14 = vmul.f32 %v2142_v52, %v6579_v54  ;;  %v5094_v53 = vpop.f32.mrb[39].mxu1  ;;  %v2167_v23 = vmul.f32 1.442695, %v2160_v6  ;;  %vm2201_vm15 = vcmp.ge.f32.partialorder %v6577_v55, 0.0 }
 0x78f   : > { %v5284_v53 = vpack.c.bf16 %v2233_v17, %v2224_v1  ;;  %v2288_v1 = vld [vmem:[%s7847_s6 + $0x230] sm:$0xff]  ;;  %v3780_v59 = vand.u32 2147483647, %v6579_v54 }
 0x790   : > { %v2161_v57 = vsub.f32 0.0, %v2156_v12  ;;  %v6583_v20 = vadd.f32 %v2147_v14, %v2138_v2  ;;  %5708 = vpow2.f32 %v2167_v23  ;;  %v5270_v2 = vpack.c.bf16 %v2250_v56, %v2241_v44  ;;  %v2240_v12 = vld [vmem:[%s7847_s6 + $0xb0] sm:$0xff]  ;;  %v2249_v14 = vld [vmem:[%s7847_s6 + $0xf8] sm:$0xff]  ;;  %v2286_v56 = vld [vmem:[%s7847_s6 + $0x220] sm:$0xff] }
 0x791   : > { %v5705_v37 = vpop.eup %5704 }
 0x792   : > { %v2173_v35 = vadd.f32 1.0, %v5705_v37  ;;  %v2169_v30 = vmul.f32 1.442695, %v2161_v57  ;;  %v2157_v36 = vand.u32 2147483647, %v6583_v20  ;;  %v2259_v57 = vld [vmem:[%s7847_s6 + $0x148] sm:$0xff] }
 0x793   : > { %v2268_v37 = vld [vmem:[%s7847_s6 + $0x190] sm:$0xff]  ;;  %vm2202_vm3 = vcmp.ge.f32.partialorder %v6583_v20, 0.0 }
 0x794   : > { %5710 = vrcp.f32 %v2173_v35  ;;  %v2162_v8 = vsub.f32 0.0, %v2157_v36  ;;  %v2251_v36 = vld [vmem:[%s7847_s6 + $0x108] sm:$0xff] }
 0x795   : > { %5712 = vpow2.f32 %v2169_v30  ;;  %v2242_v30 = vld [vmem:[%s7847_s6 + $0xc0] sm:$0xff] }
 0x796   : > { %v5707_v19 = vpop.eup %5706  ;;  %v2171_v29 = vmul.f32 1.442695, %v2162_v8 }
 0x797   : > { %v2174_v42 = vadd.f32 1.0, %v5707_v19 }
 0x798   : > { %5714 = vpow2.f32 %v2171_v29  ;;  %v5272_v29 = vpack.c.bf16 %v2249_v14, %v2240_v12  ;;  %v2287_v14 = vld [vmem:[%s7847_s6 + $0x228] sm:$0xff] }
 0x799   : > { %5716 = vrcp.f32 %v2174_v42 }
 0x79a   : > { %v5709_v52 = vpop.eup %5708 }
 0x79b   : > { %v2175_v62 = vadd.f32 1.0, %v5709_v52  ;;  %v2270_v52 = vld [vmem:[%s7847_s6 + $0x1a0] sm:$0xff] }
 0x79d   : > { %5718 = vrcp.f32 %v2175_v62 }
 0x79e   : > { %v5711_v16 = vpop.eup %5710 }
 0x79f   : > { %v5713_v45 = vpop.eup %5712  ;;  %v2183_v58 = vmul.f32 %v5711_v16, %v2173_v35 }
 0x7a0   : > { %v2176_v63 = vadd.f32 1.0, %v5713_v45 }
 0x7a1   : > { %v2188_v18 = vsub.f32 2.0, %v2183_v58  ;;  %v5274_v58 = vpack.c.bf16 %v2268_v37, %v2259_v57 }
 0x7a2   : > { %v5715_v43 = vpop.eup %5714  ;;  %5720 = vrcp.f32 %v2176_v63 }
 0x7a3   : > { %v5717_v25 = vpop.eup %5716  ;;  %v2193_v26 = vmul.f32 %v5711_v16, %v2188_v18  ;;  %v6586_v48 = vadd.f32 1.0, %v5715_v43  ;;  %v5288_v18 = vpack.c.bf16 %v2251_v36, %v2242_v30  ;;  %v2258_v43 = vld [vmem:[%s7847_s6 + $0x140] sm:$0xff] }
 0x7a4   : > { %v2184_v34 = vmul.f32 %v5717_v25, %v2174_v42  ;;  %v2261_v42 = vld [vmem:[%s7847_s6 + $0x158] sm:$0xff]  ;;  %v2226_v36 = vld [vmem:[%s7847_s6 + $0x40] sm:$0xff] }
 0x7a5   : > { %v2203_v41 = vsub.f32 1.0, %v2193_v26  ;;  %5722 = vrcp.f32 %v6586_v48 }
 0x7a6   : > { %v2189_v28 = vsub.f32 2.0, %v2184_v34 }
 0x7a7   : > { %v2208_v32 = vsel %vm2198_vm11, %v2193_v26, %v2203_v41  ;;  %v5719_v51 = vpop.eup %5718  ;;  %v2277_v41 = vld [vmem:[%s7847_s6 + $0x1d8] sm:$0xff]  ;;  %vm3823_vm11 = vcmp.ge.f32.partialorder %v6564_v47, 0.0 }
 0x7a8   : > { %v6615_v24 = vmul.f32 %v2208_v32, %v6553_v40  ;;  %v2194_v15 = vmul.f32 %v5717_v25, %v2189_v28  ;;  %v2185_v6 = vmul.f32 %v5719_v51, %v2175_v62  ;;  %v5286_v40 = vpack.c.bf16 %v2252_v22, %v2243_v50  ;;  %v2267_v25 = vld [vmem:[%s7847_s6 + $0x188] sm:$0xff] }
 0x7a9   : > { %v2279_v28 = vld [vmem:[%s7847_s6 + $0x1e8] sm:$0xff] }
 0x7aa   : > { %v2204_v23 = vsub.f32 1.0, %v2194_v15  ;;  %4761 = vmatmul.mubr.msk.f32.vlgmr.msra.gmra.mrb[28].mxu0 %vm2290_vm12, %v6615_v24  ;;  %4766 = vmatmul.mubr.msk.f32.vlgmr.msra.gmra.mrb[40].mxu1 %vm2290_vm12, %v6615_v24  ;;  %v2190_v35 = vsub.f32 2.0, %v2185_v6  ;;  %v2285_v6 = vld [vmem:[%s7847_s6 + $0x218] sm:$0xff]  ;;  %v5294_v12 = vpack.c.bf16 %v2288_v1, %v2279_v28  ;;  %v2900_v28 = vld [vmem:[%s7848_s7 + $0x50] sm:$0xff]  ;;  %v2907_v1 = vld [vmem:[%s7848_s7 + $0x88] sm:$0xff] }
 0x7ab   : > { %5269 = vmatpush1.bf16.msra.mxu0 %v5268_v46  ;;  %2376 = vmatprep.mubr.f32.mxu0 %v7860_v5 }
 0x7ac   : > { %v5721_v8 = vpop.eup %5720  ;;  %v2209_v19 = vsel %vm2199_vm13, %v2194_v15, %v2204_v23  ;;  %2471 = vmatprep.mubr.f32.mxu1 %v7860_v5  ;;  %5271 = vmatprep.subr.bf16.mxu0 %v5270_v2  ;;  %v2195_v16 = vmul.f32 %v5719_v51, %v2190_v35  ;;  %v2276_v51 = vld [vmem:[%s7847_s6 + $0x1d0] sm:$0xff]  ;;  %v5278_v2 = vpack.c.bf16 %v2286_v56, %v2277_v41  ;;  %vm3822_vm13 = vcmp.ge.f32.partialorder %v6555_v33, 0.0 }
 0x7ad   : > { %v6649_v62 = vmul.f32 %v2209_v19, %v6562_v4  ;;  %v2186_v45 = vmul.f32 %v5721_v8, %v2176_v63  ;;  %5285 = vmatpush1.bf16.msra.mxu1 %v5284_v53  ;;  %v5290_v4 = vpack.c.bf16 %v2270_v52, %v2261_v42  ;;  %v2260_v63 = vld [vmem:[%s7847_s6 + $0x150] sm:$0xff]  ;;  %v5280_v37 = vpack.c.bf16 %v2285_v6, %v2276_v51  ;;  %v2262_v52 = vld [vmem:[%s7847_s6 + $0x160] sm:$0xff] }
 0x7ae   : > { %5287 = vmatprep.subr.bf16.mxu1 %v5286_v40  ;;  %v2205_v34 = vsub.f32 1.0, %v2195_v16  ;;  %v5292_v22 = vpack.c.bf16 %v2269_v39, %v2260_v63  ;;  %v2244_v19 = vld [vmem:[%s7847_s6 + $0xd0] sm:$0xff]  ;;  %v2890_v63 = vld [vmem:[%s7848_s7] sm:$0xff] }
 0x7af   : > { %v5723_v26 = vpop.eup %5722  ;;  %v2191_v27 = vsub.f32 2.0, %v2186_v45  ;;  %4762 = vmatmul.mubr.msk.f32.gmra.mrb[30].mxu0 %vm2290_vm12, %v6649_v62  ;;  %4767 = vmatmul.mubr.msk.f32.gmra.mrb[42].mxu1 %vm2290_vm12, %v6649_v62  ;;  %v2898_v39 = vld [vmem:[%s7848_s7 + $0x40] sm:$0xff]  ;;  %v2892_v56 = vld [vmem:[%s7848_s7 + $0x10] sm:$0xff] }
 0x7b0   : > { %v2187_v44 = vmul.f32 %v5723_v26, %v6586_v48  ;;  %5273 = vmatpush1.bf16.msra.mxu0 %v5272_v29  ;;  %2382 = vmatprep.mubr.f32.mxu0 %v7860_v5  ;;  %v2210_v17 = vsel %vm2200_vm14, %v2195_v16, %v2205_v34  ;;  %v5276_v48 = vpack.c.bf16 %v2267_v25, %v2258_v43  ;;  %v2253_v29 = vld [vmem:[%s7847_s6 + $0x118] sm:$0xff]  ;;  %v2271_v16 = vld [vmem:[%s7847_s6 + $0x1a8] sm:$0xff]  ;;  %v2908_v6 = vld [vmem:[%s7848_s7 + $0x90] sm:$0xff]  ;;  %vm3825_vm14 = vcmp.ge.f32.partialorder %v6579_v54, 0.0 }
 0x7b1   : > { %v2196_v32 = vmul.f32 %v5721_v8, %v2191_v27  ;;  %2477 = vmatprep.mubr.f32.mxu1 %v7860_v5  ;;  %5275 = vmatprep.subr.bf16.mxu0 %v5274_v58  ;;  %v6684_v46 = vmul.f32 %v2210_v17, %v6570_v7  ;;  %v2278_v7 = vld [vmem:[%s7847_s6 + $0x1e0] sm:$0xff]  ;;  %v2235_v8 = vld [vmem:[%s7847_s6 + $0x88] sm:$0xff]  ;;  %v5302_v42 = vpack.c.bf16 %v2253_v29, %v2244_v19  ;;  %v2280_v58 = vld [vmem:[%s7847_s6 + $0x1f0] sm:$0xff] }
 0x7b2   : > { %v2192_v50 = vsub.f32 2.0, %v2187_v44  ;;  %5289 = vmatpush1.bf16.msra.mxu1 %v5288_v18  ;;  %v5296_v35 = vpack.c.bf16 %v2287_v14, %v2278_v7  ;;  %v5305_v45 = vpack.c.bf16 %v2271_v16, %v2262_v52  ;;  %v2289_v18 = vld [vmem:[%s7847_s6 + $0x238] sm:$0xff]  ;;  %v2891_v25 = vld [vmem:[%s7848_s7 + $0x8] sm:$0xff]  ;;  %v5312_v44 = vpack.c.bf16 %v2898_v39, %v2890_v63  ;;  %v2916_v7 = vld [vmem:[%s7848_s7 + $0xd0] sm:$0xff] }
 0x7b3   : > { %v2206_v15 = vsub.f32 1.0, %v2196_v32  ;;  %5291 = vmatprep.subr.bf16.mxu1 %v5290_v4  ;;  %4763 = vmatmul.mubr.msk.f32.gmra.mrb[32].mxu0 %vm2290_vm12, %v6684_v46  ;;  %v5308_v43 = vpack.c.bf16 %v2289_v18, %v2280_v58  ;;  %v2893_v34 = vld [vmem:[%s7848_s7 + $0x18] sm:$0xff]  ;;  %v5344_v17 = vpack.c.bf16 %v2900_v28, %v2892_v56  ;;  %v2923_v14 = vld [vmem:[%s7848_s7 + $0x108] sm:$0xff]  ;;  %v2932_v19 = vld [vmem:[%s7848_s7 + $0x150] sm:$0xff] }
 0x7b4   : > { %v2197_v53 = vmul.f32 %v5723_v26, %v2192_v50  ;;  %4768 = vmatmul.mubr.msk.f32.gmra.mrb[44].mxu1 %vm2290_vm12, %v6684_v46  ;;  %5277 = vmatpush1.bf16.msra.mxu0 %v5276_v48  ;;  %v2899_v26 = vld [vmem:[%s7848_s7 + $0x48] sm:$0xff]  ;;  %v2901_v4 = vld [vmem:[%s7848_s7 + $0x58] sm:$0xff] }
 0x7b5   : > { %v2211_v23 = vsel %vm2201_vm15, %v2196_v32, %v2206_v15  ;;  %2388 = vmatprep.mubr.f32.mxu0 %v7860_v5  ;;  %2483 = vmatprep.mubr.f32.mxu1 %v7860_v5  ;;  %v5310_v27 = vpack.c.bf16 %v2899_v26, %v2891_v25  ;;  %v5342_v41 = vpack.c.bf16 %v2901_v4, %v2893_v34  ;;  %v2915_v32 = vld [vmem:[%s7848_s7 + $0xc8] sm:$0xff]  ;;  %v2909_v48 = vld [vmem:[%s7848_s7 + $0x98] sm:$0xff]  ;;  %v2906_v15 = vld [vmem:[%s7848_s7 + $0x80] sm:$0xff]  ;;  %vm3824_vm15 = vcmp.ge.f32.partialorder %v6572_v49, 0.0 }
 0x7b6   : > { %v6705_v40 = vmul.f32 %v2211_v23, %v6577_v55  ;;  %v2207_v57 = vsub.f32 1.0, %v2197_v53  ;;  %5293 = vmatpush1.bf16.msra.mxu1 %v5292_v22  ;;  %5279 = vmatprep.subr.bf16.mxu0 %v5278_v2  ;;  %v2917_v50 = vld [vmem:[%s7848_s7 + $0xd8] sm:$0xff]  ;;  %v5314_v22 = vpack.c.bf16 %v2915_v32, %v2907_v1  ;;  %v2914_v2 = vld [vmem:[%s7848_s7 + $0xc0] sm:$0xff]  ;;  %v5348_v23 = vpack.c.bf16 %v2916_v7, %v2908_v6  ;;  %v2947_v52 = vld [vmem:[%s7848_s7 + $0x1c8] sm:$0xff] }
 0x7b7   : > { %5295 = vmatprep.subr.bf16.mxu1 %v5294_v12  ;;  %v5346_v51 = vpack.c.bf16 %v2917_v50, %v2909_v48  ;;  %v5316_v12 = vpack.c.bf16 %v2914_v2, %v2906_v15  ;;  %v2941_v16 = vld [vmem:[%s7848_s7 + $0x198] sm:$0xff]  ;;  %v2946_v25 = vld [vmem:[%s7848_s7 + $0x1c0] sm:$0xff]  ;;  %v2940_v34 = vld [vmem:[%s7848_s7 + $0x190] sm:$0xff] }
 0x7b8   : > { %v2212_v30 = vsel %vm2202_vm3, %v2197_v53, %v2207_v57  ;;  %4764 = vmatmul.mubr.msk.f32.gmra.mrb[34].mxu0 %vm2290_vm12, %v6705_v40  ;;  %4769 = vmatmul.mubr.msk.f32.gmra.mrb[46].mxu1 %vm2290_vm12, %v6705_v40  ;;  %v2931_v53 = vld [vmem:[%s7848_s7 + $0x148] sm:$0xff]  ;;  %v2949_v18 = vld [vmem:[%s7848_s7 + $0x1d8] sm:$0xff]  ;;  %v2954_v1 = vld [vmem:[%s7848_s7 + $0x200] sm:$0xff] }
 0x7b9   : > { %v6714_v55 = vmul.f32 %v2212_v30, %v6583_v20  ;;  %2394 = vmatprep.mubr.f32.mxu0 %v7860_v5  ;;  %2489 = vmatprep.mubr.f32.mxu1 %v7860_v5  ;;  %v5299_v20 = vpack.c.bf16 %v2235_v8, %v2226_v36  ;;  %v5318_v57 = vpack.c.bf16 %v2931_v53, %v2923_v14  ;;  %v2922_v30 = vld [vmem:[%s7848_s7 + $0x100] sm:$0xff]  ;;  %v2955_v4 = vld [vmem:[%s7848_s7 + $0x208] sm:$0xff]  ;;  %v2957_v39 = vld [vmem:[%s7848_s7 + $0x218] sm:$0xff] }
 0x7ba   : > { %5281 = vmatpush1.bf16.msra.mxu0 %v5280_v37  ;;  %5297 = vmatpush1.bf16.msra.mxu1 %v5296_v35  ;;  %v2925_v37 = vld [vmem:[%s7848_s7 + $0x118] sm:$0xff]  ;;  %v2930_v8 = vld [vmem:[%s7848_s7 + $0x140] sm:$0xff]  ;;  %v5354_v26 = vpack.c.bf16 %v2949_v18, %v2941_v16  ;;  %v2963_v63 = vld [vmem:[%s7848_s7 + $0x248] sm:$0xff] }
 0x7bb   : > { %5298 = vmatprep.subr.bf16.mxu0 %v7858_v13  ;;  %5311 = vmatprep.subr.bf16.mxu1 %v5310_v27  ;;  %v2933_v35 = vld [vmem:[%s7848_s7 + $0x158] sm:$0xff]  ;;  %v5320_v29 = vpack.c.bf16 %v2930_v8, %v2922_v30  ;;  %v2948_v27 = vld [vmem:[%s7848_s7 + $0x1d0] sm:$0xff]  ;;  %v5326_v28 = vpack.c.bf16 %v2963_v63, %v2955_v4  ;;  %v2970_v14 = vld [vmem:[%s7848_s7 + $0x280] sm:$0xff] }
 0x7bc   : > { %4765 = vmatmul.mubr.msk.f32.gmra.mrb[36].mxu0 %vm2290_vm12, %v6714_v55  ;;  %4770 = vmatmul.mubr.msk.f32.gmra.mrb[48].mxu1 %vm2290_vm12, %v6714_v55  ;;  %v5350_v36 = vpack.c.bf16 %v2933_v35, %v2925_v37  ;;  %v5356_v56 = vpack.c.bf16 %v2948_v27, %v2940_v34  ;;  %v2956_v32 = vld [vmem:[%s7848_s7 + $0x210] sm:$0xff]  ;;  %v2973_v15 = vld [vmem:[%s7848_s7 + $0x298] sm:$0xff]  ;;  %v2978_v53 = vld [vmem:[%s7848_s7 + $0x2c0] sm:$0xff] }
 0x7bd   : > { %2560 = vmatprep.mubr.f32.mxu0 %v7860_v5  ;;  %2655 = vmatprep.mubr.f32.mxu1 %v7860_v5  ;;  %v2964_v50 = vld [vmem:[%s7848_s7 + $0x250] sm:$0xff]  ;;  %v2981_v2 = vld [vmem:[%s7848_s7 + $0x2d8] sm:$0xff]  ;;  %v2987_v35 = vld [vmem:[%s7848_s7 + $0x308] sm:$0xff] }
 0x7be   : > { %v2980_v37 = vld [vmem:[%s7848_s7 + $0x2d0] sm:$0xff]  ;;  %v2995_v30 = vld [vmem:[%s7848_s7 + $0x348] sm:$0xff]  ;;  %v2997_v8 = vld [vmem:[%s7848_s7 + $0x358] sm:$0xff] }
 0x7bf   : > { %v2988_v16 = vld [vmem:[%s7848_s7 + $0x310] sm:$0xff]  ;;  %v3005_v4 = vld [vmem:[%s7848_s7 + $0x398] sm:$0xff] }
 0x7c0   : > { %4771 = vmatmul.mubr.msk.f32.vlgmr.msra.gmra.mrb[38].mxu0 %vm2290_vm12, %v6615_v24  ;;  %4776 = vmatmul.mubr.msk.f32.vlgmr.msra.gmra.mrb[50].mxu1 %vm2290_vm12, %v6615_v24  ;;  %v3013_v63 = vld [vmem:[%s7848_s7 + $0x3d8] sm:$0xff] }
 0x7c1   : > { %5300 = vmatpush3.bf16.msra.mxu0 %v5299_v20  ;;  %2566 = vmatprep.mubr.f32.mxu0 %v7860_v5  ;;  %v2924_v20 = vld [vmem:[%s7848_s7 + $0x110] sm:$0xff] }
 0x7c2   : > { %2661 = vmatprep.mubr.f32.mxu1 %v7860_v5  ;;  %5301 = vmatprep.subr.bf16.mxu0 %v7858_v13 }
 0x7c3   : > { %5313 = vmatpush1.bf16.msra.mxu1 %v5312_v44 }
 0x7c4   : > { %4772 = vmatmul.mubr.msk.f32.gmra.mrb[40].mxu0 %vm2290_vm12, %v6649_v62  ;;  %4777 = vmatmul.mubr.msk.f32.gmra.mrb[52].mxu1 %vm2290_vm12, %v6649_v62 }
 0x7c5   : > { %5303 = vmatpush3.bf16.msra.mxu0 %v5302_v42  ;;  %2572 = vmatprep.mubr.f32.mxu0 %v7860_v5  ;;  %v2939_v42 = vld [vmem:[%s7848_s7 + $0x188] sm:$0xff] }
 0x7c6   : > { %2667 = vmatprep.mubr.f32.mxu1 %v7860_v5  ;;  %5304 = vmatprep.subr.bf16.mxu0 %v7858_v13  ;;  %v5322_v58 = vpack.c.bf16 %v2947_v52, %v2939_v42  ;;  %v2986_v42 = vld [vmem:[%s7848_s7 + $0x300] sm:$0xff] }
 0x7c7   : > { %5315 = vmatprep.subr.bf16.mxu1 %v5314_v22  ;;  %v2971_v22 = vld [vmem:[%s7848_s7 + $0x288] sm:$0xff]  ;;  %v2994_v52 = vld [vmem:[%s7848_s7 + $0x340] sm:$0xff] }
 0x7c8   : > { %4773 = vmatmul.mubr.msk.f32.gmra.mrb[42].mxu0 %vm2290_vm12, %v6684_v46  ;;  %4778 = vmatmul.mubr.msk.f32.gmra.mrb[54].mxu1 %vm2290_vm12, %v6684_v46 }
 0x7c9   : > { %5306 = vmatpush3.bf16.msra.mxu0 %v5305_v45  ;;  %2578 = vmatprep.mubr.f32.mxu0 %v7860_v5  ;;  %v5352_v45 = vpack.c.bf16 %v2932_v19, %v2924_v20  ;;  %v5332_v20 = vpack.c.bf16 %v2978_v53, %v2970_v14 }
 0x7ca   : > { %2673 = vmatprep.mubr.f32.mxu1 %v7860_v5  ;;  %5307 = vmatprep.subr.bf16.mxu0 %v7858_v13 }
 0x7cb   : > { %5317 = vmatpush1.bf16.msra.mxu1 %v5316_v12  ;;  %v5360_v12 = vpack.c.bf16 %v2964_v50, %v2956_v32  ;;  %v3012_v32 = vld [vmem:[%s7848_s7 + $0x3d0] sm:$0xff] }
 0x7cc   : > { %4774 = vmatmul.mubr.msk.f32.gmra.mrb[44].mxu0 %vm2290_vm12, %v6705_v40  ;;  %4779 = vmatmul.mubr.msk.f32.gmra.mrb[56].mxu1 %vm2290_vm12, %v6705_v40 }
 0x7cd   : > { %2584 = vmatprep.mubr.f32.mxu0 %v7860_v5  ;;  %2679 = vmatprep.mubr.f32.mxu1 %v7860_v5 }
 0x7ce   : > { %5309 = vmatpush3.bf16.msra.mxu0 %v5308_v43  ;;  %5319 = vmatprep.subr.bf16.mxu1 %v5318_v57  ;;  %v2938_v43 = vld [vmem:[%s7848_s7 + $0x180] sm:$0xff]  ;;  %v5362_v57 = vpack.c.bf16 %v2981_v2, %v2973_v15 }
 0x7cf   : > { %5343 = vmatprep.subr.bf16.mxu0 %v5342_v41  ;;  %v2965_v41 = vld [vmem:[%s7848_s7 + $0x258] sm:$0xff]  ;;  %5321 = vmatpush1.bf16.msra.mxu1 %v5320_v29  ;;  %v5324_v44 = vpack.c.bf16 %v2946_v25, %v2938_v43  ;;  %v5334_v29 = vpack.c.bf16 %v2995_v30, %v2987_v35  ;;  %v2996_v43 = vld [vmem:[%s7848_s7 + $0x350] sm:$0xff]  ;;  %v3003_v25 = vld [vmem:[%s7848_s7 + $0x388] sm:$0xff] }
 0x7d0   : > { %4775 = vmatmul.mubr.msk.f32.gmra.mrb[46].mxu0 %vm2290_vm12, %v6714_v55  ;;  %4780 = vmatmul.mubr.msk.f32.gmra.mrb[58].mxu1 %vm2290_vm12, %v6714_v55  ;;  %v5358_v48 = vpack.c.bf16 %v2965_v41, %v2957_v39  ;;  %v5336_v39 = vpack.c.bf16 %v2994_v52, %v2986_v42  ;;  %v5368_v41 = vpack.c.bf16 %v2996_v43, %v2988_v16 }
 0x7d1   : > { %5111 = vmatprep.mubr.msk.f32.mxu0 %vm5823_vm0, %v7860_v5  ;;  %3082 = vmatprep.mubr.f32.mxu1 %v7860_v5 }
 0x7d2   : > { %5323 = vmatprep.subr.bf16.mxu1 %v5322_v58 }
 0x7d3   : > { %5325 = vmatpush1.bf16.msra.mxu1 %v5324_v44 }
 0x7d4   : > { %5112 = vmatmul.mubr.msk.f32.vlgmr.msra.gmra.mrb[48].mxu0 %vm2290_vm12, %v6615_v24  ;;  %5327 = vmatprep.subr.bf16.mxu1 %v5326_v28  ;;  %v3010_v28 = vld [vmem:[%s7848_s7 + $0x3c0] sm:$0xff] }
 0x7d5   : > { %5114 = vmatprep.mubr.msk.f32.mxu0 %vm5823_vm0, %v7860_v5  ;;  %5345 = vmatpush1.bf16.msra.mxu0 %v5344_v17  ;;  %v2962_v17 = vld [vmem:[%s7848_s7 + $0x240] sm:$0xff] }
 0x7d6   : > { %5347 = vmatprep.subr.bf16.mxu0 %v5346_v51  ;;  %v2979_v51 = vld [vmem:[%s7848_s7 + $0x2c8] sm:$0xff]  ;;  %v5328_v6 = vpack.c.bf16 %v2962_v17, %v2954_v1  ;;  %v5370_v1 = vpack.c.bf16 %v3013_v63, %v3005_v4  ;;  %v3004_v17 = vld [vmem:[%s7848_s7 + $0x390] sm:$0xff]  ;;  %v3776_v4 = vand.u32 2147483647, %v6547_v10 }
 0x7d7   : > { %v5330_v7 = vpack.c.bf16 %v2979_v51, %v2971_v22  ;;  %v5372_v2 = vpack.c.bf16 %v3012_v32, %v3004_v17  ;;  %v2778_v17 = vsub.s32 6, %v5946_v61  ;;  %v3777_v32 = vand.u32 2147483647, %v6555_v33 }
 0x7d8   : > { %5115 = vmatmul.mubr.msk.f32.gmra.mrb[50].mxu0 %vm2290_vm12, %v6649_v62  ;;  %5329 = vmatpush1.bf16.msra.mxu1 %v5328_v6 }
 0x7d9   : > { %5117 = vmatprep.mubr.msk.f32.mxu0 %vm5823_vm0, %v7860_v5  ;;  %5349 = vmatpush1.bf16.msra.mxu0 %v5348_v23  ;;  %v2972_v23 = vld [vmem:[%s7848_s7 + $0x290] sm:$0xff]  ;;  %v3782_v13 = vsub.f32 0.0, %v3777_v32 }
 0x7da   : > { %5351 = vmatprep.subr.bf16.mxu0 %v5350_v36  ;;  %v2989_v36 = vld [vmem:[%s7848_s7 + $0x318] sm:$0xff]  ;;  %5331 = vmatprep.subr.bf16.mxu1 %v5330_v7  ;;  %v5364_v19 = vpack.c.bf16 %v2980_v37, %v2972_v23 }
 0x7db   : > { %v5366_v18 = vpack.c.bf16 %v2997_v8, %v2989_v36 }
 0x7dc   : > { %5118 = vmatmul.mubr.msk.f32.gmra.mrb[52].mxu0 %vm2290_vm12, %v6684_v46  ;;  %5333 = vmatpush1.bf16.msra.mxu1 %v5332_v20 }
 0x7dd   : > { %5120 = vmatprep.mubr.msk.f32.mxu0 %vm5823_vm0, %v7860_v5  ;;  %5353 = vmatpush1.bf16.msra.mxu0 %v5352_v45 }
 0x7de   : > { %5355 = vmatprep.subr.bf16.mxu0 %v5354_v26  ;;  %v3011_v26 = vld [vmem:[%s7848_s7 + $0x3c8] sm:$0xff]  ;;  %5335 = vmatprep.subr.bf16.mxu1 %v5334_v29 }
 0x7df   : > { %v5338_v44 = vpack.c.bf16 %v3011_v26, %v3003_v25 }
 0x7e0   : > { %5121 = vmatmul.mubr.msk.f32.gmra.mrb[54].mxu0 %vm2290_vm12, %v6705_v40  ;;  %5337 = vmatpush1.bf16.msra.mxu1 %v5336_v39 }
 0x7e1   : > { %5123 = vmatprep.mubr.msk.f32.mxu0 %vm5823_vm0, %v7860_v5  ;;  %5357 = vmatpush1.bf16.msra.mxu0 %v5356_v56  ;;  %v3002_v56 = vld [vmem:[%s7848_s7 + $0x380] sm:$0xff] }
 0x7e2   : > { %5359 = vmatprep.subr.bf16.mxu0 %v5358_v48  ;;  %v5340_v15 = vpack.c.bf16 %v3010_v28, %v3002_v56  ;;  %5339 = vmatprep.subr.bf16.mxu1 %v5338_v44  ;;  %v3781_v56 = vsub.f32 0.0, %v3776_v4  ;;  %v2779_v4 = vrot.slane %v6540_v11, %v2778_v17 }
 0x7e4   : > { %5124 = vmatmul.mubr.msk.f32.gmra.mrb[56].mxu0 %vm2290_vm12, %v6714_v55  ;;  %5341 = vmatpush1.bf16.msra.mxu1 %v5340_v15  ;;  %v3778_v15 = vand.u32 2147483647, %v6564_v47  ;;  %v3786_v60 = vmul.f32 1.442695, %v3781_v56 }
 0x7e5   : > { %3177 = vmatprep.mubr.f32.mxu0 %v7860_v5  ;;  %5361 = vmatpush1.bf16.msra.mxu0 %v5360_v12  ;;  %v3779_v5 = vand.u32 2147483647, %v6572_v49 }
 0x7e6   : > { %5363 = vmatprep.subr.bf16.mxu0 %v5362_v57  ;;  %v3783_v31 = vsub.f32 0.0, %v3778_v15  ;;  %5724 = vpow2.f32 %v3786_v60 }
 0x7e8   : > { %v3790_v56 = vmul.f32 1.442695, %v3783_v31 }
 0x7e9   : > { %5365 = vmatpush1.bf16.msra.mxu0 %v5364_v19 }
 0x7ea   : > { %5367 = vmatprep.subr.bf16.mxu0 %v5366_v18 }
 0x7ed   : > { %5369 = vmatpush1.bf16.msra.mxu0 %v5368_v41 }
 0x7ee   : > { %5371 = vmatprep.subr.bf16.mxu0 %v5370_v1 }
 0x7f1   : > { %5373 = vmatpush1.bf16.msra.mxu0 %v5372_v2 }
 0x87d   : > { %v6967_v45 = vpop.f32.mrb[28].mxu0  ;;  %v6969_v58 = vpop.f32.mrb[40].mxu1 }
 0x87e   : > { %v6980_v34 = vpop.f32.mrb[29].mxu0  ;;  %v6982_v27 = vpop.f32.mrb[41].mxu1 }
 0x882   : > { %v7002_v48 = vpop.f32.mrb[30].mxu0  ;;  %v7004_v50 = vpop.f32.mrb[42].mxu1 }
 0x883   : > { %v7006_v22 = vpop.f32.mrb[31].mxu0  ;;  %v7008_v51 = vpop.f32.mrb[43].mxu1 }
 0x886   : > { %v7010_v6 = vpop.f32.mrb[32].mxu0 }
 0x887   : > { %v7012_v12 = vpop.f32.mrb[44].mxu1  ;;  %v7014_v7 = vpop.f32.mrb[33].mxu0 }
 0x888   : > { %v7016_v14 = vpop.f32.mrb[45].mxu1 }
 0x88b   : > { %v7018_v53 = vpop.f32.mrb[34].mxu0  ;;  %v7020_v23 = vpop.f32.mrb[46].mxu1 }
 0x88c   : > { %7877 = vst [vmem:[#allocation7_spill] sm:$0xff] %v7018_v53  ;;  %7878 = vst [vmem:[#allocation8_spill] sm:$0xff] %v7020_v23  ;;  %v7022_v57 = vpop.f32.mrb[35].mxu0  ;;  %v7024_v37 = vpop.f32.mrb[47].mxu1 }
 0x88d   : > { %7879 = vst [vmem:[#allocation9_spill] sm:$0xff] %v7022_v57  ;;  %7880 = vst [vmem:[#allocation10_spill] sm:$0xff] %v7024_v37 }
 0x88f   : > { %v7026_v35 = vpop.f32.mrb[36].mxu0  ;;  %v7028_v30 = vpop.f32.mrb[48].mxu1 }
 0x890   : > { %7881 = vst [vmem:[#allocation11_spill] sm:$0xff] %v7026_v35  ;;  %7882 = vst [vmem:[#allocation12_spill] sm:$0xff] %v7028_v30  ;;  %v7030_v36 = vpop.f32.mrb[37].mxu0  ;;  %v7032_v8 = vpop.f32.mrb[49].mxu1 }
 0x891   : > { %7883 = vst [vmem:[#allocation13_spill] sm:$0xff] %v7030_v36  ;;  %7884 = vst [vmem:[#allocation14_spill] sm:$0xff] %v7032_v8 }
 0x893   : > { %v7034_v20 = vpop.f32.mrb[38].mxu0  ;;  %v7036_v19 = vpop.f32.mrb[50].mxu1 }
 0x894   : > { %v7038_v29 = vpop.f32.mrb[39].mxu0  ;;  %v7040_v42 = vpop.f32.mrb[51].mxu1 }
 0x897   : > { %v7042_v52 = vpop.f32.mrb[40].mxu0  ;;  %v7044_v16 = vpop.f32.mrb[52].mxu1 }
 0x898   : > { %7885 = vst [vmem:[#allocation15_spill] sm:$0xff] %v7042_v52  ;;  %7886 = vst [vmem:[#allocation16_spill] sm:$0xff] %v7044_v16  ;;  %v7046_v18 = vpop.f32.mrb[41].mxu0  ;;  %v7048_v43 = vpop.f32.mrb[53].mxu1 }
 0x899   : > { %7887 = vst [vmem:[#allocation17_spill] sm:$0xff] %v7048_v43 }
 0x89b   : > { %v7050_v25 = vpop.f32.mrb[42].mxu0  ;;  %v7052_v26 = vpop.f32.mrb[54].mxu1 }
 0x89c   : > { %7888 = vst [vmem:[#allocation18_spill] sm:$0xff] %v7050_v25  ;;  %7889 = vst [vmem:[#allocation19_spill] sm:$0xff] %v7052_v26  ;;  %v7055_v63 = vpop.f32.mrb[43].mxu0  ;;  %v7057_v39 = vpop.f32.mrb[55].mxu1 }
 0x89d   : > { %7890 = vst [vmem:[#allocation20_spill] sm:$0xff] %v7055_v63  ;;  %7891 = vst [vmem:[#allocation21_spill] sm:$0xff] %v7057_v39 }
 0x89f   : > { %v7059_v41 = vpop.f32.mrb[44].mxu0  ;;  %v7061_v44 = vpop.f32.mrb[56].mxu1 }
 0x8a0   : > { %7892 = vst [vmem:[#allocation22_spill] sm:$0xff] %v7059_v41  ;;  %7893 = vst [vmem:[#allocation23_spill] sm:$0xff] %v7061_v44  ;;  %v7063_v28 = vpop.f32.mrb[45].mxu0  ;;  %v7065_v1 = vpop.f32.mrb[57].mxu1  ;;  %v3785_v44 = vsub.f32 0.0, %v3780_v59 }
 0x8a1   : > { %7894 = vst [vmem:[#allocation24_spill] sm:$0xff] %v7063_v28  ;;  %7895 = vst [vmem:[#allocation25_spill] sm:$0xff] %v7065_v1  ;;  %v5725_v59 = vpop.eup %5724 }
 0x8a2   : > { %v3794_v15 = vmul.f32 1.442695, %v3785_v44  ;;  %v3796_v44 = vadd.f32 1.0, %v5725_v59 }
 0x8a3   : > { %v7070_v2 = vpop.f32.mrb[46].mxu0  ;;  %v7072_v3 = vpop.f32.mrb[58].mxu1 }
 0x8a4   : > { %7896 = vst [vmem:[#allocation26_spill] sm:$0xff] %v7070_v2  ;;  %7897 = vst [vmem:[#allocation27_spill] sm:$0xff] %v7072_v3  ;;  %v7074_v38 = vpop.f32.mrb[47].mxu0  ;;  %v7076_v21 = vpop.f32.mrb[59].mxu1  ;;  %v3788_v2 = vmul.f32 1.442695, %v3782_v13 }
 0x8a5   : > { %7898 = vst [vmem:[#allocation28_spill] sm:$0xff] %v7074_v38  ;;  %7899 = vst [vmem:[#allocation29_spill] sm:$0xff] %v7076_v21  ;;  %v3784_v3 = vsub.f32 0.0, %v3779_v5 }
 0x8a6   : > { %5726 = vpow2.f32 %v3788_v2 }
 0x8a7   : > { %v2752_v9 = vpop.f32.mrb[48].mxu0  ;;  %v3792_v32 = vmul.f32 1.442695, %v3784_v3  ;;  %5728 = vpow2.f32 %v3790_v56 }
 0x8a8   : > { %v7081_v0 = vadd.f32 %v2779_v4, %v2752_v9  ;;  %v5113_v61 = vpop.f32.mrb[49].mxu0 }
 0x8aa   : > { %v2790_v38 = vand.u32 2147483647, %v7081_v0 }
 0x8ab   : > { %v2757_v21 = vpop.f32.mrb[50].mxu0 }
 0x8ac   : > { %v2795_v41 = vsub.f32 0.0, %v2790_v38  ;;  %v7084_v11 = vadd.f32 %v2779_v4, %v2757_v21  ;;  %v5116_v17 = vpop.f32.mrb[51].mxu0 }
 0x8ae   : > { %v2800_v1 = vmul.f32 1.442695, %v2795_v41  ;;  %v2791_v9 = vand.u32 2147483647, %v7084_v11 }
 0x8af   : > { %v2762_v61 = vpop.f32.mrb[52].mxu0 }
 0x8b0   : > { %5730 = vpow2.f32 %v2800_v1  ;;  %v2796_v60 = vsub.f32 0.0, %v2791_v9  ;;  %v7087_v5 = vadd.f32 %v2779_v4, %v2762_v61  ;;  %v5119_v31 = vpop.f32.mrb[53].mxu0  ;;  %v5727_v17 = vpop.eup %5726 }
 0x8b1   : > { %5732 = vpow2.f32 %v3792_v32  ;;  %v5729_v61 = vpop.eup %5728 }
 0x8b2   : > { %5734 = vpow2.f32 %v3794_v15  ;;  %v2802_v13 = vmul.f32 1.442695, %v2796_v60  ;;  %v2792_v21 = vand.u32 2147483647, %v7087_v5  ;;  %v7096_v59 = vadd.f32 1.0, %v5729_v61  ;;  %v2897_v61 = vld [vmem:[%s7848_s7 + $0x38] sm:$0xff] }
 0x8b3   : > { %v2767_v38 = vpop.f32.mrb[54].mxu0 }
 0x8b4   : > { %5736 = vpow2.f32 %v2802_v13  ;;  %v2797_v3 = vsub.f32 0.0, %v2792_v21  ;;  %v7090_v2 = vadd.f32 %v2779_v4, %v2767_v38  ;;  %v5122_v41 = vpop.f32.mrb[55].mxu0  ;;  %v3797_v21 = vadd.f32 1.0, %v5727_v17 }
 0x8b6   : > { %v2804_v56 = vmul.f32 1.442695, %v2797_v3  ;;  %v2793_v1 = vand.u32 2147483647, %v7090_v2 }
 0x8b7   : > { %v2772_v9 = vpop.f32.mrb[56].mxu0 }
 0x8b8   : > { %5738 = vpow2.f32 %v2804_v56  ;;  %v2798_v32 = vsub.f32 0.0, %v2793_v1  ;;  %v7093_v31 = vadd.f32 %v2779_v4, %v2772_v9  ;;  %v5125_v15 = vpop.f32.mrb[57].mxu0 }
 0x8b9   : > { %5740 = vrcp.f32 %v3796_v44 }
 0x8ba   : > { %v5731_v60 = vpop.eup %5730  ;;  %v2806_v28 = vmul.f32 1.442695, %v2798_v32  ;;  %v2794_v13 = vand.u32 2147483647, %v7093_v31 }
 0x8bb   : > { %v5733_v38 = vpop.eup %5732  ;;  %v2810_v41 = vadd.f32 1.0, %v5731_v60  ;;  %v2813_v32 = vmul.f32 -0.5, %v5731_v60  ;;  %v2816_v36 = vand.u32 2147483647, %v5731_v60 }
 0x8bc   : > { %v5735_v3 = vpop.eup %5734  ;;  %5742 = vpow2.f32 %v2806_v28  ;;  %v2799_v26 = vsub.f32 0.0, %v2794_v13  ;;  %v7098_v56 = vadd.f32 1.0, %v5733_v38  ;;  %v2895_v28 = vld [vmem:[%s7848_s7 + $0x28] sm:$0xff]  ;;  %v2905_v38 = vld [vmem:[%s7848_s7 + $0x78] sm:$0xff] }
 0x8bd   : > { %5744 = vlog2.f32 %v2810_v41  ;;  %v7100_v1 = vadd.f32 1.0, %v5735_v3  ;;  %v2814_v41 = vadd.f32 1.0, %v2813_v32  ;;  %v2785_v32 = vmax.f32 %v7081_v0, 0.0 }
 0x8be   : > { %v5737_v8 = vpop.eup %5736  ;;  %v2808_v4 = vmul.f32 1.442695, %v2799_v26  ;;  %5746 = vrcp.f32 %v3797_v21  ;;  %v2903_v26 = vld [vmem:[%s7848_s7 + $0x68] sm:$0xff]  ;;  %vm2817_vm4 = vcmp.lt.f32.partialorder %v2816_v36, 0.0004427343 }
 0x8bf   : > { %v2819_v9 = vadd.f32 1.0, %v5737_v8  ;;  %5748 = vrcp.f32 %v7096_v59  ;;  %v2822_v3 = vmul.f32 -0.5, %v5737_v8  ;;  %v2815_v37 = vmul.f32 %v5731_v60, %v2814_v41 }
 0x8c0   : > { %5750 = vpow2.f32 %v2808_v4  ;;  %v5374_v4 = vpack.c.bf16 %v2903_v26, %v2895_v28  ;;  %v2825_v28 = vand.u32 2147483647, %v5737_v8 }
 0x8c1   : > { %5752 = vlog2.f32 %v2819_v9  ;;  %v5406_v9 = vpack.c.bf16 %v2905_v38, %v2897_v61  ;;  %v2823_v57 = vadd.f32 1.0, %v2822_v3 }
 0x8c2   : > { %v5739_v17 = vpop.eup %5738  ;;  %5754 = vrcp.f32 %v7098_v56  ;;  %5375 = vmatprep.subr.bf16.mxu1 %v5374_v4  ;;  %v2786_v4 = vmax.f32 %v7084_v11, 0.0  ;;  %vm2826_vm6 = vcmp.lt.f32.partialorder %v2825_v28, 0.0004427343 }
 0x8c3   : > { %v5741_v15 = vpop.eup %5740  ;;  %5756 = vrcp.f32 %v7100_v1  ;;  %v2828_v13 = vadd.f32 1.0, %v5739_v17  ;;  %5407 = vmatprep.subr.bf16.mxu0 %v5406_v9  ;;  %v2831_v23 = vmul.f32 -0.5, %v5739_v17  ;;  %v2824_v41 = vmul.f32 %v5737_v8, %v2823_v57 }
 0x8c4   : > { %v3806_v35 = vmul.f32 %v5741_v15, %v3796_v44  ;;  %v2834_v36 = vand.u32 2147483647, %v5739_v17 }
 0x8c5   : > { %5758 = vlog2.f32 %v2828_v13  ;;  %v2832_v3 = vadd.f32 1.0, %v2831_v23 }
 0x8c6   : > { %v7117_v30 = vpop.eup %5742  ;;  %v3811_v13 = vsub.f32 2.0, %v3806_v35  ;;  %vm2835_vm7 = vcmp.lt.f32.partialorder %v2834_v36, 0.0004427343  ;;  %v2788_v36 = vmax.f32 %v7090_v2, 0.0  ;;  %v2789_v2 = vmax.f32 %v7093_v31, 0.0 }
 0x8c7   : > { %v5745_v25 = vpop.eup %5744  ;;  %v2837_v39 = vadd.f32 1.0, %v7117_v30  ;;  %v2840_v43 = vmul.f32 -0.5, %v7117_v30 }
 0x8c8   : > { %v5747_v63 = vpop.eup %5746  ;;  %v2812_v16 = vmul.f32 0.6931472, %v5745_v25  ;;  %v3816_v57 = vmul.f32 %v5741_v15, %v3811_v13 }
 0x8c9   : > { %v5749_v53 = vpop.eup %5748  ;;  %5760 = vlog2.f32 %v2837_v39  ;;  %v3807_v52 = vmul.f32 %v5747_v63, %v3797_v21  ;;  %v2833_v21 = vmul.f32 %v5739_v17, %v2832_v3 }
 0x8ca   : > { %v5751_v26 = vpop.eup %5750  ;;  %v2818_v61 = vsel %vm2817_vm4, %v2815_v37, %v2812_v16  ;;  %v3808_v16 = vmul.f32 %v5749_v53, %v7096_v59 }
 0x8cb   : > { %v5753_v44 = vpop.eup %5752  ;;  %v7121_v38 = vadd.f32 %v2818_v61, %v2785_v32  ;;  %v2846_v9 = vadd.f32 1.0, %v5751_v26  ;;  %v3812_v23 = vsub.f32 2.0, %v3807_v52  ;;  %v2841_v32 = vadd.f32 1.0, %v2840_v43 }
 0x8cc   : > { %v5755_v25 = vpop.eup %5754  ;;  %v2821_v60 = vmul.f32 0.6931472, %v5753_v44  ;;  %v2849_v28 = vmul.f32 -0.5, %v5751_v26  ;;  %v2787_v61 = vmax.f32 %v7087_v5, 0.0  ;;  %v2843_v44 = vand.u32 2147483647, %v7117_v30 }
 0x8cd   : > { %v5757_v0 = vpop.eup %5756  ;;  %5762 = vlog2.f32 %v2846_v9  ;;  %v2860_v37 = vmul.f32 %v7121_v38, %v6615_v24  ;;  %v3826_v43 = vsub.f32 1.0, %v3816_v57  ;;  %v2842_v5 = vmul.f32 %v7117_v30, %v2841_v32 }
 0x8ce   : > { %v2827_v35 = vsel %vm2826_vm6, %v2824_v41, %v2821_v60  ;;  %v3810_v60 = vmul.f32 %v5757_v0, %v7100_v1  ;;  %v3809_v41 = vmul.f32 %v5755_v25, %v7098_v56  ;;  %v2850_v13 = vadd.f32 1.0, %v2849_v28 }
 0x8cf   : > { %v5759_v39 = vpop.eup %5758  ;;  %v7128_v11 = vadd.f32 %v2827_v35, %v2786_v4  ;;  %2870 = vrot.lane.b32.xlu0 %v2860_v37, %s5827_s19  ;;  %v3813_v4 = vsub.f32 2.0, %v3808_v16  ;;  %v3817_v3 = vmul.f32 %v5747_v63, %v3812_v23  ;;  %vm2844_vm8 = vcmp.lt.f32.partialorder %v2843_v44, 0.0004427343 }
 0x8d0   : > { %v2830_v8 = vmul.f32 0.6931472, %v5759_v39  ;;  %v2852_v37 = vand.u32 2147483647, %v5751_v26  ;;  %v3815_v16 = vsub.f32 2.0, %v3810_v60  ;;  %v3814_v39 = vsub.f32 2.0, %v3809_v41 }
 0x8d1   : > { %v2861_v59 = vmul.f32 %v7128_v11, %v6649_v62  ;;  %v3818_v56 = vmul.f32 %v5749_v53, %v3813_v4  ;;  %v2851_v63 = vmul.f32 %v5751_v26, %v2850_v13  ;;  %v3831_v23 = vsel %vm3821_vm9, %v3816_v57, %v3826_v43  ;;  %v2919_v13 = vld [vmem:[%s7848_s7 + $0xe8] sm:$0xff] }
 0x8d2   : > { %v2836_v9 = vsel %vm2835_vm7, %v2833_v21, %v2830_v8  ;;  %vm2853_vm10 = vcmp.lt.f32.partialorder %v2852_v37, 0.0004427343  ;;  %v3827_v28 = vsub.f32 1.0, %v3817_v3  ;;  %v3820_v44 = vmul.f32 %v5757_v0, %v3815_v16  ;;  %v2918_v16 = vld [vmem:[%s7848_s7 + $0xe0] sm:$0xff] }
 0x8d3   : > { %v5761_v15 = vpop.eup %5760  ;;  %v7137_v52 = vadd.f32 %v2836_v9, %v2787_v61  ;;  %2872 = vrot.lane.b32.xlu1 %v2861_v59, %s5827_s19  ;;  %v3828_v61 = vsub.f32 1.0, %v3818_v56  ;;  %v3819_v59 = vmul.f32 %v5755_v25, %v3814_v39  ;;  %v3836_v4 = vmul.f32 %v3831_v23, %v6547_v10  ;;  %v2912_v39 = vld [vmem:[%s7848_s7 + $0xb0] sm:$0xff] }
 0x8d4   : > { %v2839_v17 = vmul.f32 0.6931472, %v5761_v15  ;;  %v3832_v57 = vsel %vm3822_vm13, %v3817_v3, %v3827_v28  ;;  %v3830_v60 = vsub.f32 1.0, %v3820_v44  ;;  %v2913_v3 = vld [vmem:[%s7848_s7 + $0xb8] sm:$0xff] }
 0x8d5   : > { %v2862_v1 = vmul.f32 %v7137_v52, %v6684_v46  ;;  %v3833_v31 = vsel %vm3823_vm11, %v3818_v56, %v3828_v61  ;;  %v3829_v41 = vsub.f32 1.0, %v3819_v59  ;;  %v3837_v10 = vmul.f32 %v3832_v57, %v6555_v33  ;;  %v2894_v33 = vld [vmem:[%s7848_s7 + $0x20] sm:$0xff]  ;;  %v2929_v28 = vld [vmem:[%s7848_s7 + $0x138] sm:$0xff]  ;;  %v2936_v57 = vld [vmem:[%s7848_s7 + $0x170] sm:$0xff] }
 0x8d6   : > { %v2845_v35 = vsel %vm2844_vm8, %v2842_v5, %v2839_v17  ;;  %v3838_v25 = vmul.f32 %v3833_v31, %v6564_v47  ;;  %v3835_v0 = vsel %vm3825_vm14, %v3820_v44, %v3830_v60  ;;  %v2902_v47 = vld [vmem:[%s7848_s7 + $0x60] sm:$0xff]  ;;  %v2896_v5 = vld [vmem:[%s7848_s7 + $0x30] sm:$0xff] }
 0x8d7   : > { %v5763_v8 = vpop.eup %5762  ;;  %v7144_v21 = vadd.f32 %v2845_v35, %v2788_v36  ;;  %2874 = vrot.lane.b32.xlu1 %v2862_v1, %s5827_s19  ;;  %v3834_v15 = vsel %vm3824_vm15, %v3819_v59, %v3829_v41  ;;  %v3840_v43 = vmul.f32 %v3835_v0, %v6579_v54  ;;  %v2911_v54 = vld [vmem:[%s7848_s7 + $0xa8] sm:$0xff]  ;;  %v2921_v36 = vld [vmem:[%s7848_s7 + $0xf8] sm:$0xff]  ;;  %v5376_v37 = vpack.c.bf16 %v2902_v47, %v2894_v33  ;;  %v2910_v35 = vld [vmem:[%s7848_s7 + $0xa0] sm:$0xff] }
 0x8d8   : > { %v2848_v30 = vmul.f32 0.6931472, %v5763_v8  ;;  %v3839_v17 = vmul.f32 %v3834_v15, %v6572_v49  ;;  %v2904_v49 = vld [vmem:[%s7848_s7 + $0x70] sm:$0xff]  ;;  %v5410_v23 = vpack.c.bf16 %v2921_v36, %v2913_v3  ;;  %v2926_v44 = vld [vmem:[%s7848_s7 + $0x120] sm:$0xff]  ;;  %v2951_v0 = vld [vmem:[%s7848_s7 + $0x1e8] sm:$0xff] }
 0x8d9   : > { %v2863_v32 = vmul.f32 %v7144_v21, %v6705_v40  ;;  %v5408_v1 = vpack.c.bf16 %v2904_v49, %v2896_v5  ;;  %v2920_v8 = vld [vmem:[%s7848_s7 + $0xf0] sm:$0xff]  ;;  %v2953_v15 = vld [vmem:[%s7848_s7 + $0x1f8] sm:$0xff]  ;;  %v2942_v33 = vld [vmem:[%s7848_s7 + $0x1a0] sm:$0xff] }
 0x8da   : > { %v2854_v53 = vsel %vm2853_vm10, %v2851_v63, %v2848_v30  ;;  %v5378_v63 = vpack.c.bf16 %v2919_v13, %v2911_v54  ;;  %v5412_v61 = vpack.c.bf16 %v2920_v8, %v2912_v39  ;;  %v2928_v31 = vld [vmem:[%s7848_s7 + $0x130] sm:$0xff]  ;;  %v2950_v5 = vld [vmem:[%s7848_s7 + $0x1e0] sm:$0xff] }
 0x8db   : > { %v7151_v9 = vadd.f32 %v2854_v53, %v2789_v2  ;;  %2876 = vrot.lane.b32.xlu0 %v2863_v32, %s5827_s19  ;;  %v2927_v2 = vld [vmem:[%s7848_s7 + $0x128] sm:$0xff]  ;;  %v5380_v53 = vpack.c.bf16 %v2918_v16, %v2910_v35  ;;  %v2944_v49 = vld [vmem:[%s7848_s7 + $0x1b0] sm:$0xff]  ;;  %v2969_v35 = vld [vmem:[%s7848_s7 + $0x278] sm:$0xff] }
 0x8dc   : > { %v2935_v32 = vld [vmem:[%s7848_s7 + $0x168] sm:$0xff]  ;;  %v2952_v54 = vld [vmem:[%s7848_s7 + $0x1f0] sm:$0xff]  ;;  %v2958_v39 = vld [vmem:[%s7848_s7 + $0x220] sm:$0xff] }
 0x8dd   : > { %v2864_v26 = vmul.f32 %v7151_v9, %v6714_v55  ;;  %v5382_v41 = vpack.c.bf16 %v2935_v32, %v2927_v2  ;;  %v5420_v16 = vpack.c.bf16 %v2952_v54, %v2944_v49  ;;  %v2966_v8 = vld [vmem:[%s7848_s7 + $0x260] sm:$0xff]  ;;  %v2968_v2 = vld [vmem:[%s7848_s7 + $0x270] sm:$0xff]  ;;  %v2975_v32 = vld [vmem:[%s7848_s7 + $0x2a8] sm:$0xff] }
 0x8de   : > { %v2990_v49 = vld [vmem:[%s7848_s7 + $0x320] sm:$0xff] }
 0x8df   : > { %3846 = vrot.lane.b32.xlu0 %v3836_v4, %s5827_s19  ;;  %2878 = vrot.lane.b32.xlu1 %v2864_v26, %s5827_s19  ;;  %v7900_v4 = vmov 0.0   ;;  %v2934_v26 = vld [vmem:[%s7848_s7 + $0x160] sm:$0xff] }
 0x8e0   : > { %v2998_v54 = vld [vmem:[%s7848_s7 + $0x360] sm:$0xff] }
 0x8e3   : > { %3850 = vrot.lane.b32.xlu0 %v3838_v25, %s5827_s19  ;;  %3848 = vrot.lane.b32.xlu1 %v3837_v10, %s5827_s19  ;;  %v2943_v10 = vld [vmem:[%s7848_s7 + $0x1a8] sm:$0xff] }
 0x8e4   : > { %v5386_v3 = vpack.c.bf16 %v2951_v0, %v2943_v10  ;;  %v2976_v0 = vld [vmem:[%s7848_s7 + $0x2b0] sm:$0xff] }
 0x8e7   : > { %3854 = vrot.lane.b32.xlu0 %v3840_v43, %s5827_s19  ;;  %3852 = vrot.lane.b32.xlu1 %v3839_v17, %s5827_s19  ;;  %v5384_v43 = vpack.c.bf16 %v2934_v26, %v2926_v44  ;;  %v5416_v17 = vpack.c.bf16 %v2936_v57, %v2928_v31  ;;  %v2977_v44 = vld [vmem:[%s7848_s7 + $0x2b8] sm:$0xff]  ;;  %v2974_v31 = vld [vmem:[%s7848_s7 + $0x2a0] sm:$0xff]  ;;  %s420_s19 = scalar_lea.vmem %s7853_s12, %s4806_s16 }
 0x8e8   : > { %v2982_v57 = vld [vmem:[%s7848_s7 + $0x2e0] sm:$0xff] }
 0x941   : > { %v2871_v56 = vpop.permute.xlu0 %2870 }
 0x942   : > { %v7209_v30 = vsel %vm2290_vm12, %v7121_v38, %v2871_v56  ;;  %v2937_v38 = vld [vmem:[%s7848_s7 + $0x178] sm:$0xff]  ;;  %v5388_v56 = vpack.c.bf16 %v2950_v5, %v2942_v33  ;;  %v5396_v5 = vpack.c.bf16 %v2982_v57, %v2974_v31 }
 0x943   : > { %3083 = vmatmul.mubr.f32.vlgmr.msra.gmra.mrb[60].mxu1 %v7209_v30  ;;  %3178 = vmatmul.mubr.f32.vlgmr.msra.gmra.mrb[58].mxu0 %v7209_v30  ;;  %v5414_v25 = vpack.c.bf16 %v2937_v38, %v2929_v28  ;;  %v2993_v33 = vld [vmem:[%s7848_s7 + $0x338] sm:$0xff] }
 0x944   : > { %5377 = vmatpush1.bf16.msra.mxu1 %v5376_v37  ;;  %5409 = vmatpush1.bf16.msra.mxu0 %v5408_v1  ;;  %v2959_v37 = vld [vmem:[%s7848_s7 + $0x228] sm:$0xff] }
 0x945   : > { %v2873_v59 = vpop.permute.xlu1 %2872  ;;  %3088 = vmatprep.mubr.f32.mxu1 %v7900_v4  ;;  %3183 = vmatprep.mubr.f32.mxu0 %v7900_v4  ;;  %v2967_v1 = vld [vmem:[%s7848_s7 + $0x268] sm:$0xff] }
 0x946   : > { %v7241_v60 = vsel %vm2290_vm12, %v7128_v11, %v2873_v59  ;;  %5379 = vmatprep.subr.bf16.mxu1 %v5378_v63  ;;  %5411 = vmatprep.subr.bf16.mxu0 %v5410_v23  ;;  %v2945_v11 = vld [vmem:[%s7848_s7 + $0x1b8] sm:$0xff]  ;;  %v2960_v23 = vld [vmem:[%s7848_s7 + $0x230] sm:$0xff]  ;;  %v5390_v38 = vpack.c.bf16 %v2967_v1, %v2959_v37 }
 0x947   : > { %3089 = vmatmul.mubr.f32.gmra.mrb[62].mxu1 %v7241_v60  ;;  %3184 = vmatmul.mubr.f32.gmra.mrb[60].mxu0 %v7241_v60  ;;  %v5418_v36 = vpack.c.bf16 %v2953_v15, %v2945_v11  ;;  %v2985_v59 = vld [vmem:[%s7848_s7 + $0x2f8] sm:$0xff]  ;;  %v5424_v26 = vpack.c.bf16 %v2968_v2, %v2960_v23  ;;  %v2984_v11 = vld [vmem:[%s7848_s7 + $0x2f0] sm:$0xff]  ;;  %v2991_v15 = vld [vmem:[%s7848_s7 + $0x328] sm:$0xff] }
 0x948   : > { %5381 = vmatpush1.bf16.msra.mxu1 %v5380_v53  ;;  %5413 = vmatpush1.bf16.msra.mxu0 %v5412_v61  ;;  %v2983_v61 = vld [vmem:[%s7848_s7 + $0x2e8] sm:$0xff]  ;;  %v5426_v10 = vpack.c.bf16 %v2985_v59, %v2977_v44  ;;  %v2992_v37 = vld [vmem:[%s7848_s7 + $0x330] sm:$0xff] }
 0x949   : > { %v2875_v47 = vpop.permute.xlu1 %2874  ;;  %3094 = vmatprep.mubr.f32.mxu1 %v7900_v4  ;;  %3189 = vmatprep.mubr.f32.mxu0 %v7900_v4  ;;  %v3000_v1 = vld [vmem:[%s7848_s7 + $0x370] sm:$0xff] }
 0x94a   : > { %v7273_v13 = vsel %vm2290_vm12, %v7137_v52, %v2875_v47  ;;  %5383 = vmatprep.subr.bf16.mxu1 %v5382_v41  ;;  %5415 = vmatprep.subr.bf16.mxu0 %v5414_v25  ;;  %v2961_v52 = vld [vmem:[%s7848_s7 + $0x238] sm:$0xff]  ;;  %v5394_v25 = vpack.c.bf16 %v2983_v61, %v2975_v32  ;;  %v3014_v32 = vld [vmem:[%s7848_s7 + $0x3e0] sm:$0xff] }
 0x94b   : > { %3095 = vmatmul.mubr.f32.gmra.mrb[64].mxu1 %v7273_v13  ;;  %3190 = vmatmul.mubr.f32.gmra.mrb[62].mxu0 %v7273_v13  ;;  %v5422_v53 = vpack.c.bf16 %v2969_v35, %v2961_v52  ;;  %v3001_v47 = vld [vmem:[%s7848_s7 + $0x378] sm:$0xff]  ;;  %v3007_v52 = vld [vmem:[%s7848_s7 + $0x3a8] sm:$0xff] }
 0x94c   : > { %5385 = vmatpush1.bf16.msra.mxu1 %v5384_v43  ;;  %5417 = vmatpush1.bf16.msra.mxu0 %v5416_v17  ;;  %v2999_v17 = vld [vmem:[%s7848_s7 + $0x368] sm:$0xff] }
 0x94d   : > { %v2877_v63 = vpop.permute.xlu0 %2876  ;;  %3100 = vmatprep.mubr.f32.mxu1 %v7900_v4  ;;  %3195 = vmatprep.mubr.f32.mxu0 %v7900_v4  ;;  %v3015_v35 = vld [vmem:[%s7848_s7 + $0x3e8] sm:$0xff] }
 0x94e   : > { %v7308_v28 = vsel %vm2290_vm12, %v7144_v21, %v2877_v63  ;;  %5387 = vmatprep.subr.bf16.mxu1 %v5386_v3  ;;  %5419 = vmatprep.subr.bf16.mxu0 %v5418_v36  ;;  %v5392_v21 = vpack.c.bf16 %v2966_v8, %v2958_v39  ;;  %v5398_v3 = vpack.c.bf16 %v2999_v17, %v2991_v15  ;;  %v3006_v63 = vld [vmem:[%s7848_s7 + $0x3a0] sm:$0xff]  ;;  %v3577_v15 = vld [vmem:[%s7849_s8 + $0x190] sm:$0xff]  ;;  %v3578_v17 = vld [vmem:[%s7849_s8 + $0x198] sm:$0xff] }
 0x94f   : > { %3101 = vmatmul.mubr.f32.gmra.mrb[66].mxu1 %v7308_v28  ;;  %3196 = vmatmul.mubr.f32.gmra.mrb[64].mxu0 %v7308_v28  ;;  %v5430_v36 = vpack.c.bf16 %v3001_v47, %v2993_v33  ;;  %v5400_v39 = vpack.c.bf16 %v2998_v54, %v2990_v49  ;;  %v5432_v8 = vpack.c.bf16 %v3000_v1, %v2992_v37  ;;  %v3529_v33 = vld [vmem:[%s7849_s8 + $0x10] sm:$0xff]  ;;  %v3530_v47 = vld [vmem:[%s7849_s8 + $0x18] sm:$0xff]  ;;  %v3548_v37 = vld [vmem:[%s7849_s8 + $0xa8] sm:$0xff] }
 0x950   : > { %5389 = vmatpush1.bf16.msra.mxu1 %v5388_v56  ;;  %5421 = vmatpush1.bf16.msra.mxu0 %v5420_v16  ;;  %v3009_v56 = vld [vmem:[%s7848_s7 + $0x3b8] sm:$0xff]  ;;  %v5402_v23 = vpack.c.bf16 %v3015_v35, %v3007_v52  ;;  %v5404_v61 = vpack.c.bf16 %v3014_v32, %v3006_v63  ;;  %v3561_v49 = vld [vmem:[%s7849_s8 + $0x110] sm:$0xff]  ;;  %v3579_v1 = vld [vmem:[%s7849_s8 + $0x1a0] sm:$0xff] }
 0x951   : > { %v2879_v41 = vpop.permute.xlu1 %2878  ;;  %3106 = vmatprep.mubr.f32.mxu1 %v7900_v4  ;;  %3201 = vmatprep.mubr.f32.mxu0 %v7900_v4  ;;  %v3017_v16 = vld [vmem:[%s7848_s7 + $0x3f8] sm:$0xff]  ;;  %v3580_v35 = vld [vmem:[%s7849_s8 + $0x1a8] sm:$0xff]  ;;  %v3563_v63 = vld [vmem:[%s7849_s8 + $0x120] sm:$0xff] }
 0x952   : > { %v2889_v43 = vsel %vm2290_vm12, %v7151_v9, %v2879_v41  ;;  %5391 = vmatprep.subr.bf16.mxu1 %v5390_v38  ;;  %5423 = vmatprep.subr.bf16.mxu0 %v5422_v53  ;;  %v5428_v9 = vpack.c.bf16 %v2984_v11, %v2976_v0  ;;  %v5434_v2 = vpack.c.bf16 %v3017_v16, %v3009_v56  ;;  %v3008_v38 = vld [vmem:[%s7848_s7 + $0x3b0] sm:$0xff]  ;;  %v3559_v41 = vld [vmem:[%s7849_s8 + $0x100] sm:$0xff]  ;;  %v3546_v11 = vld [vmem:[%s7849_s8 + $0x98] sm:$0xff] }
 0x953   : > { %3107 = vmatmul.mubr.f32.gmra.mrb[68].mxu1 %v2889_v43  ;;  %3202 = vmatmul.mubr.f32.gmra.mrb[66].mxu0 %v2889_v43  ;;  %v3016_v53 = vld [vmem:[%s7848_s7 + $0x3f0] sm:$0xff]  ;;  %v3562_v54 = vld [vmem:[%s7849_s8 + $0x118] sm:$0xff]  ;;  %v3531_v56 = vld [vmem:[%s7849_s8 + $0x20] sm:$0xff] }
 0x954   : > { %5393 = vmatpush1.bf16.msra.mxu1 %v5392_v21  ;;  %5425 = vmatpush1.bf16.msra.mxu0 %v5424_v26  ;;  %v5436_v44 = vpack.c.bf16 %v3016_v53, %v3008_v38  ;;  %v3527_v21 = vld [vmem:[%s7849_s8] sm:$0xff]  ;;  %v3528_v26 = vld [vmem:[%s7849_s8 + $0x8] sm:$0xff]  ;;  %v3545_v0 = vld [vmem:[%s7849_s8 + $0x90] sm:$0xff] }
 0x955   : > { %5395 = vmatprep.subr.bf16.mxu1 %v5394_v25  ;;  %5427 = vmatprep.subr.bf16.mxu0 %v5426_v10  ;;  %v5440_v57 = vpack.c.bf16 %v3528_v26, %v3527_v21  ;;  %v3560_v25 = vld [vmem:[%s7849_s8 + $0x108] sm:$0xff]  ;;  %v3549_v32 = vld [vmem:[%s7849_s8 + $0xb0] sm:$0xff]  ;;  %v3550_v38 = vld [vmem:[%s7849_s8 + $0xb8] sm:$0xff] }
 0x956   : > { %3272 = vmatprep.mubr.f32.mxu1 %v7900_v4  ;;  %3367 = vmatprep.mubr.f32.mxu0 %v7900_v4  ;;  %v5472_v10 = vpack.c.bf16 %v3560_v25, %v3559_v41  ;;  %v3532_v16 = vld [vmem:[%s7849_s8 + $0x28] sm:$0xff]  ;;  %v3581_v53 = vld [vmem:[%s7849_s8 + $0x1b0] sm:$0xff]  ;;  %v3566_v21 = vld [vmem:[%s7849_s8 + $0x138] sm:$0xff] }
 0x957   : > { %v3551_v26 = vld [vmem:[%s7849_s8 + $0xc0] sm:$0xff]  ;;  %v3584_v25 = vld [vmem:[%s7849_s8 + $0x1c8] sm:$0xff] }
 0x958   : > { %5397 = vmatpush1.bf16.msra.mxu1 %v5396_v5  ;;  %5429 = vmatpush1.bf16.msra.mxu0 %v5428_v9  ;;  %v5474_v5 = vpack.c.bf16 %v3578_v17, %v3577_v15  ;;  %v5444_v9 = vpack.c.bf16 %v3530_v47, %v3529_v33  ;;  %v3583_v41 = vld [vmem:[%s7849_s8 + $0x1c0] sm:$0xff]  ;;  %v3536_v15 = vld [vmem:[%s7849_s8 + $0x48] sm:$0xff]  ;;  %v3553_v47 = vld [vmem:[%s7849_s8 + $0xd0] sm:$0xff] }
 0x959   : > { %5399 = vmatprep.subr.bf16.mxu1 %v5398_v3  ;;  %5431 = vmatprep.subr.bf16.mxu0 %v5430_v36  ;;  %v5476_v3 = vpack.c.bf16 %v3562_v54, %v3561_v49  ;;  %v3547_v36 = vld [vmem:[%s7849_s8 + $0xa0] sm:$0xff]  ;;  %v3568_v33 = vld [vmem:[%s7849_s8 + $0x148] sm:$0xff]  ;;  %v3585_v54 = vld [vmem:[%s7849_s8 + $0x1d0] sm:$0xff] }
 0x95a   : > { %v5446_v52 = vpack.c.bf16 %v3548_v37, %v3547_v36  ;;  %v3537_v36 = vld [vmem:[%s7849_s8 + $0x50] sm:$0xff] }
 0x95c   : > { %5401 = vmatpush1.bf16.msra.mxu1 %v5400_v39  ;;  %5433 = vmatpush1.bf16.msra.mxu0 %v5432_v8  ;;  %v5478_v39 = vpack.c.bf16 %v3580_v35, %v3579_v1  ;;  %v5448_v8 = vpack.c.bf16 %v3532_v16, %v3531_v56  ;;  %v3538_v1 = vld [vmem:[%s7849_s8 + $0x58] sm:$0xff] }
 0x95d   : > { %5403 = vmatprep.subr.bf16.mxu1 %v5402_v23  ;;  %5435 = vmatprep.subr.bf16.mxu0 %v5434_v2  ;;  %v3564_v23 = vld [vmem:[%s7849_s8 + $0x128] sm:$0xff]  ;;  %v3570_v35 = vld [vmem:[%s7849_s8 + $0x158] sm:$0xff]  ;;  %v5460_v56 = vpack.c.bf16 %v3538_v1, %v3537_v36 }
 0x95e   : > { %v5480_v2 = vpack.c.bf16 %v3564_v23, %v3563_v63  ;;  %v3587_v63 = vld [vmem:[%s7849_s8 + $0x1e0] sm:$0xff] }
 0x960   : > { %5405 = vmatpush1.bf16.msra.mxu1 %v5404_v61  ;;  %5437 = vmatpush1.bf16.msra.mxu0 %v5436_v44  ;;  %v5450_v61 = vpack.c.bf16 %v3550_v38, %v3549_v32  ;;  %v3582_v44 = vld [vmem:[%s7849_s8 + $0x1b8] sm:$0xff]  ;;  %v3539_v32 = vld [vmem:[%s7849_s8 + $0x60] sm:$0xff]  ;;  %v3540_v38 = vld [vmem:[%s7849_s8 + $0x68] sm:$0xff] }
 0x963   : > { %3273 = vmatmul.mubr.f32.vlgmr.msra.gmra.mrb[70].mxu1 %v7209_v30  ;;  %3368 = vmatmul.mubr.f32.vlgmr.msra.gmra.mrb[68].mxu0 %v7209_v30  ;;  %v3543_v30 = vld [vmem:[%s7849_s8 + $0x80] sm:$0xff] }
 0x964   : > { %3278 = vmatprep.mubr.f32.mxu1 %v7900_v4  ;;  %3373 = vmatprep.mubr.f32.mxu0 %v7900_v4 }
 0x967   : > { %3279 = vmatmul.mubr.f32.gmra.mrb[72].mxu1 %v7241_v60  ;;  %3374 = vmatmul.mubr.f32.gmra.mrb[70].mxu0 %v7241_v60  ;;  %v3544_v60 = vld [vmem:[%s7849_s8 + $0x88] sm:$0xff] }
 0x968   : > { %3284 = vmatprep.mubr.f32.mxu1 %v7900_v4  ;;  %3379 = vmatprep.mubr.f32.mxu0 %v7900_v4  ;;  %v5438_v59 = vpack.c.bf16 %v3544_v60, %v3543_v30  ;;  %v3533_v30 = vld [vmem:[%s7849_s8 + $0x30] sm:$0xff]  ;;  %v3534_v60 = vld [vmem:[%s7849_s8 + $0x38] sm:$0xff] }
 0x96a   : > { %5439 = vmatprep.subr.bf16.mxu1 %v5438_v59  ;;  %v5452_v59 = vpack.c.bf16 %v3534_v60, %v3533_v30  ;;  %v3572_v30 = vld [vmem:[%s7849_s8 + $0x168] sm:$0xff] }
 0x96b   : > { %3285 = vmatmul.mubr.f32.gmra.mrb[74].mxu1 %v7273_v13  ;;  %3380 = vmatmul.mubr.f32.gmra.mrb[72].mxu0 %v7273_v13  ;;  %v3575_v13 = vld [vmem:[%s7849_s8 + $0x180] sm:$0xff] }
 0x96c   : > { %3290 = vmatprep.mubr.f32.mxu1 %v7900_v4  ;;  %3385 = vmatprep.mubr.f32.mxu0 %v7900_v4 }
 0x96d   : > { %5441 = vmatpush3.bf16.msra.mxu1 %v5440_v57  ;;  %v3552_v57 = vld [vmem:[%s7849_s8 + $0xc8] sm:$0xff] }
 0x96f   : > { %3291 = vmatmul.mubr.f32.gmra.mrb[76].mxu1 %v7308_v28  ;;  %3386 = vmatmul.mubr.f32.gmra.mrb[74].mxu0 %v7308_v28  ;;  %v3576_v28 = vld [vmem:[%s7849_s8 + $0x188] sm:$0xff] }
 0x970   : > { %3296 = vmatprep.mubr.f32.mxu1 %v7900_v4  ;;  %3391 = vmatprep.mubr.f32.mxu0 %v7900_v4  ;;  %v5470_v31 = vpack.c.bf16 %v3576_v28, %v3575_v13  ;;  %v5482_v13 = vpack.c.bf16 %v3582_v44, %v3581_v53  ;;  %v3565_v28 = vld [vmem:[%s7849_s8 + $0x130] sm:$0xff]  ;;  %v3571_v44 = vld [vmem:[%s7849_s8 + $0x160] sm:$0xff] }
 0x971   : > { %v5496_v60 = vpack.c.bf16 %v3572_v30, %v3571_v44 }
 0x972   : > { %5471 = vmatprep.subr.bf16.mxu0 %v5470_v31  ;;  %v5484_v31 = vpack.c.bf16 %v3566_v21, %v3565_v28  ;;  %v3589_v28 = vld [vmem:[%s7849_s8 + $0x1f0] sm:$0xff] }
 0x973   : > { %3297 = vmatmul.mubr.f32.gmra.mrb[78].mxu1 %v2889_v43  ;;  %3392 = vmatmul.mubr.f32.gmra.mrb[76].mxu0 %v2889_v43  ;;  %v5442_v43 = vpack.c.bf16 %v3546_v11, %v3545_v0  ;;  %v5486_v0 = vpack.c.bf16 %v3584_v25, %v3583_v41  ;;  %v3535_v11 = vld [vmem:[%s7849_s8 + $0x40] sm:$0xff] }
 0x974   : > { %5473 = vmatpush3.bf16.msra.mxu0 %v5472_v10  ;;  %v5454_v10 = vpack.c.bf16 %v3552_v57, %v3551_v26  ;;  %v5456_v17 = vpack.c.bf16 %v3536_v15, %v3535_v11  ;;  %v3590_v26 = vld [vmem:[%s7849_s8 + $0x1f8] sm:$0xff]  ;;  %v7901_v15 = vmov 0.0|0.0  }
 0x975   : > { %5443 = vmatprep.subr.bf16.mxu1 %v5442_v43  ;;  %5475 = vmatprep.subr.bf16.mxu0 %v5474_v5  ;;  %v3567_v43 = vld [vmem:[%s7849_s8 + $0x140] sm:$0xff]  ;;  %v3554_v5 = vld [vmem:[%s7849_s8 + $0xd8] sm:$0xff]  ;;  %v5498_v41 = vpack.c.bf16 %v3590_v26, %v3589_v28 }
 0x976   : > { %5445 = vmatpush3.bf16.msra.mxu1 %v5444_v9  ;;  %v5488_v9 = vpack.c.bf16 %v3568_v33, %v3567_v43  ;;  %v5458_v49 = vpack.c.bf16 %v3554_v5, %v3553_v47  ;;  %v3542_v57 = vld [vmem:[%s7849_s8 + $0x78] sm:$0xff] }
 0x977   : > { %5447 = vmatprep.subr.bf16.mxu1 %v5446_v52  ;;  %v3569_v52 = vld [vmem:[%s7849_s8 + $0x150] sm:$0xff] }
 0x978   : > { %5477 = vmatpush3.bf16.msra.mxu0 %v5476_v3  ;;  %v3586_v3 = vld [vmem:[%s7849_s8 + $0x1d8] sm:$0xff]  ;;  %v5492_v16 = vpack.c.bf16 %v3570_v35, %v3569_v52 }
 0x979   : > { %5479 = vmatprep.subr.bf16.mxu0 %v5478_v39  ;;  %v5490_v37 = vpack.c.bf16 %v3586_v3, %v3585_v54  ;;  %v3555_v39 = vld [vmem:[%s7849_s8 + $0xe0] sm:$0xff] }
 0x97a   : > { %5449 = vmatpush3.bf16.msra.mxu1 %v5448_v8  ;;  %v3556_v8 = vld [vmem:[%s7849_s8 + $0xe8] sm:$0xff] }
 0x97b   : > { %5451 = vmatprep.subr.bf16.mxu1 %v5450_v61  ;;  %v5462_v23 = vpack.c.bf16 %v3556_v8, %v3555_v39  ;;  %v5464_v61 = vpack.c.bf16 %v3540_v38, %v3539_v32 }
 0x97c   : > { %5481 = vmatpush3.bf16.msra.mxu0 %v5480_v2  ;;  %v3588_v2 = vld [vmem:[%s7849_s8 + $0x1e8] sm:$0xff] }
 0x97d   : > { %5483 = vmatprep.subr.bf16.mxu0 %v5482_v13  ;;  %v5494_v53 = vpack.c.bf16 %v3588_v2, %v3587_v63  ;;  %v3557_v13 = vld [vmem:[%s7849_s8 + $0xf0] sm:$0xff] }
 0x97e   : > { %5453 = vmatpush3.bf16.msra.mxu1 %v5452_v59  ;;  %v3558_v59 = vld [vmem:[%s7849_s8 + $0xf8] sm:$0xff] }
 0x97f   : > { %5455 = vmatprep.subr.bf16.mxu1 %v5454_v10  ;;  %v5466_v21 = vpack.c.bf16 %v3558_v59, %v3557_v13  ;;  %v3573_v10 = vld [vmem:[%s7849_s8 + $0x170] sm:$0xff] }
 0x980   : > { %5485 = vmatpush3.bf16.msra.mxu0 %v5484_v31  ;;  %v3541_v31 = vld [vmem:[%s7849_s8 + $0x70] sm:$0xff] }
 0x981   : > { %5487 = vmatprep.subr.bf16.mxu0 %v5486_v0  ;;  %v5468_v25 = vpack.c.bf16 %v3542_v57, %v3541_v31  ;;  %v3574_v0 = vld [vmem:[%s7849_s8 + $0x178] sm:$0xff] }
 0x982   : > { %5457 = vmatpush3.bf16.msra.mxu1 %v5456_v17  ;;  %v5500_v11 = vpack.c.bf16 %v3574_v0, %v3573_v10  ;;  %v7605_v10 = vld [vmem:[%s7850_s9 + $0x8] sm:$0xff] }
 0x983   : > { %5459 = vmatprep.subr.bf16.mxu1 %v5458_v49 }
 0x984   : > { %5489 = vmatpush3.bf16.msra.mxu0 %v5488_v9 }
 0x985   : > { %5491 = vmatprep.subr.bf16.mxu0 %v5490_v37 }
 0x986   : > { %5461 = vmatpush3.bf16.msra.mxu1 %v5460_v56 }
 0x987   : > { %5463 = vmatprep.subr.bf16.mxu1 %v5462_v23 }
 0x988   : > { %5493 = vmatpush3.bf16.msra.mxu0 %v5492_v16 }
 0x989   : > { %5495 = vmatprep.subr.bf16.mxu0 %v5494_v53 }
 0x98a   : > { %5465 = vmatpush3.bf16.msra.mxu1 %v5464_v61 }
 0x98b   : > { %5467 = vmatprep.subr.bf16.mxu1 %v5466_v21 }
 0x98c   : > { %5497 = vmatpush3.bf16.msra.mxu0 %v5496_v60 }
 0x98d   : > { %5499 = vmatprep.subr.bf16.mxu0 %v5498_v41 }
 0x98e   : > { %5469 = vmatpush3.bf16.msra.mxu1 %v5468_v25  ;;  %v7600_v25 = vld [vmem:[%s7850_s9] sm:$0xff] }
 0x98f   : > { %5502 = vmatprep.subr.bf16.mxu1 %v7901_v15 }
 0x990   : > { %5501 = vmatpush3.bf16.msra.mxu0 %v5500_v11 }
 0x991   : > { %5514 = vmatprep.subr.bf16.mxu0 %v7901_v15 }
 0xa16   : > { %v3084_v43 = vpop.f32.mrb[60].mxu1  ;;  %v3179_v17 = vpop.f32.mrb[58].mxu0 }
 0xa17   : > { %v3086_v33 = vpop.f32.mrb[61].mxu1  ;;  %v3181_v47 = vpop.f32.mrb[59].mxu0  ;;  %v3398_v39 = vmul.f32 1.442695, %v3084_v43  ;;  %v3402_v8 = vmul.f32 1.442695, %v3179_v17 }
 0xa18   : > { %v3400_v63 = vmul.f32 1.442695, %v3086_v33  ;;  %v3404_v32 = vmul.f32 1.442695, %v3181_v47 }
 0xa19   : > { %5764 = vpow2.f32 %v3398_v39 }
 0xa1a   : > { %v3090_v5 = vpop.f32.mrb[62].mxu1  ;;  %v3185_v9 = vpop.f32.mrb[60].mxu0  ;;  %5766 = vpow2.f32 %v3402_v8 }
 0xa1b   : > { %v3092_v49 = vpop.f32.mrb[63].mxu1  ;;  %v3187_v54 = vpop.f32.mrb[61].mxu0  ;;  %v3406_v53 = vmul.f32 1.442695, %v3090_v5  ;;  %v3410_v44 = vmul.f32 1.442695, %v3185_v9  ;;  %5768 = vpow2.f32 %v3400_v63  ;;  %v5503_v5 = vpack.c.bf16 %v7605_v10, %v7600_v25 }
 0xa1c   : > { %v3408_v30 = vmul.f32 1.442695, %v3092_v49  ;;  %5770 = vpow2.f32 %v3404_v32  ;;  %v3412_v60 = vmul.f32 1.442695, %v3187_v54  ;;  %v7612_v9 = vld [vmem:[%s7850_s9 + $0x10] sm:$0xff]  ;;  %v7617_v49 = vld [vmem:[%s7850_s9 + $0x18] sm:$0xff] }
 0xa1d   : > { %5772 = vpow2.f32 %v3406_v53 }
 0xa1e   : > { %v3096_v3 = vpop.f32.mrb[64].mxu1  ;;  %v3191_v36 = vpop.f32.mrb[62].mxu0  ;;  %5774 = vpow2.f32 %v3410_v44 }
 0xa1f   : > { %v3098_v37 = vpop.f32.mrb[65].mxu1  ;;  %v3193_v1 = vpop.f32.mrb[63].mxu0  ;;  %v3414_v13 = vmul.f32 1.442695, %v3096_v3  ;;  %v3418_v59 = vmul.f32 1.442695, %v3191_v36  ;;  %5776 = vpow2.f32 %v3408_v30 }
 0xa20   : > { %v3416_v28 = vmul.f32 1.442695, %v3098_v37  ;;  %5778 = vpow2.f32 %v3412_v60  ;;  %v3420_v21 = vmul.f32 1.442695, %v3193_v1  ;;  %v5506_v60 = vpack.c.bf16 %v7617_v49, %v7612_v9  ;;  %v3870_v9 = vld [vmem:[%s7850_s9 + $0x20] sm:$0xff]  ;;  %v3871_v49 = vld [vmem:[%s7850_s9 + $0x28] sm:$0xff] }
 0xa21   : > { %5780 = vpow2.f32 %v3414_v13 }
 0xa22   : > { %v3102_v52 = vpop.f32.mrb[66].mxu1  ;;  %v3197_v35 = vpop.f32.mrb[64].mxu0  ;;  %5782 = vpow2.f32 %v3418_v59 }
 0xa23   : > { %v3104_v56 = vpop.f32.mrb[67].mxu1  ;;  %v3199_v16 = vpop.f32.mrb[65].mxu0  ;;  %v3422_v26 = vmul.f32 1.442695, %v3102_v52  ;;  %v3426_v31 = vmul.f32 1.442695, %v3197_v35  ;;  %5784 = vpow2.f32 %v3416_v28 }
 0xa24   : > { %v5765_v57 = vpop.eup %5764  ;;  %v3424_v41 = vmul.f32 1.442695, %v3104_v56  ;;  %5786 = vpow2.f32 %v3420_v21  ;;  %v3428_v11 = vmul.f32 1.442695, %v3199_v16 }
 0xa25   : > { %v5767_v0 = vpop.eup %5766  ;;  %5788 = vpow2.f32 %v3422_v26  ;;  %v3458_v3 = vmul.f32 0.0, %v5765_v57 }
 0xa26   : > { %v3108_v23 = vpop.f32.mrb[68].mxu1  ;;  %v3203_v2 = vpop.f32.mrb[66].mxu0  ;;  %5790 = vpow2.f32 %v3426_v31  ;;  %v3460_v36 = vmul.f32 0.0, %v5767_v0 }
 0xa27   : > { %v3110_v38 = vpop.f32.mrb[69].mxu1  ;;  %v3205_v61 = vpop.f32.mrb[67].mxu0  ;;  %v3430_v17 = vmul.f32 1.442695, %v3108_v23  ;;  %v3434_v47 = vmul.f32 1.442695, %v3203_v2  ;;  %5792 = vpow2.f32 %v3424_v41 }
 0xa28   : > { %v5769_v43 = vpop.eup %5768  ;;  %v3432_v37 = vmul.f32 1.442695, %v3110_v38  ;;  %5794 = vpow2.f32 %v3428_v11 }
 0xa29   : > { %v5771_v33 = vpop.eup %5770  ;;  %v3459_v56 = vmul.f32 0.0, %v5769_v43  ;;  %5796 = vpow2.f32 %v3430_v17 }
 0xa2a   : > { %v5773_v54 = vpop.eup %5772  ;;  %v3461_v2 = vmul.f32 0.0, %v5771_v33  ;;  %5798 = vpow2.f32 %v3434_v47 }
 0xa2b   : > { %v5775_v35 = vpop.eup %5774  ;;  %5800 = vpow2.f32 %v3432_v37 }
 0xa2c   : > { %v5777_v23 = vpop.eup %5776 }
 0xa2d   : > { %v5779_v44 = vpop.eup %5778 }
 0xa2e   : > { %v5781_v13 = vpop.eup %5780 }
 0xa2f   : > { %v5783_v26 = vpop.eup %5782 }
 0xa30   : > { %v5785_v11 = vpop.eup %5784 }
 0xa31   : > { %v5787_v47 = vpop.eup %5786 }
 0xa36   : > { %v3274_v1 = vpop.f32.mrb[70].mxu1  ;;  %v3369_v52 = vpop.f32.mrb[68].mxu0 }
 0xa37   : > { %v3438_v16 = vmul.f32 %v3274_v1, %v6967_v45  ;;  %v3440_v39 = vmul.f32 %v3369_v52, %v6969_v58  ;;  %v3276_v8 = vpop.f32.mrb[71].mxu1  ;;  %v3371_v63 = vpop.f32.mrb[69].mxu0  ;;  %v3436_v45 = vmul.f32 1.442695, %v3205_v61 }
 0xa38   : > { %v3439_v32 = vmul.f32 %v3276_v8, %v6980_v34  ;;  %v3441_v53 = vmul.f32 %v3371_v63, %v6982_v27 }
 0xa39   : > { %v3462_v38 = vadd.f32 %v3458_v3, %v3438_v16  ;;  %v3464_v30 = vadd.f32 %v3460_v36, %v3440_v39  ;;  %5802 = vpow2.f32 %v3436_v45 }
 0xa3a   : > { %v3463_v58 = vadd.f32 %v3459_v56, %v3439_v32  ;;  %v3465_v59 = vadd.f32 %v3461_v2, %v3441_v53  ;;  %v3280_v28 = vpop.f32.mrb[72].mxu1  ;;  %v3375_v21 = vpop.f32.mrb[70].mxu0 }
 0xa3b   : > { %v3466_v31 = vmul.f32 %v3462_v38, %v7034_v20  ;;  %v3468_v34 = vmul.f32 %v3464_v30, %v7036_v19  ;;  %v3442_v27 = vmul.f32 %v3280_v28, %v7002_v48  ;;  %v3470_v57 = vmul.f32 %v5773_v54, %v3462_v38  ;;  %v3282_v41 = vpop.f32.mrb[73].mxu1  ;;  %v3377_v0 = vpop.f32.mrb[71].mxu0  ;;  %v7903_v28 = vld [vmem:[#allocation15_spill] sm:$0xff] }
 0xa3c   : > { %v3444_v43 = vmul.f32 %v3375_v21, %v7004_v50  ;;  %v3472_v17 = vmul.f32 %v5775_v35, %v3464_v30  ;;  %v3443_v61 = vmul.f32 %v3282_v41, %v7006_v22  ;;  %v3471_v33 = vmul.f32 %v5777_v23, %v3463_v58  ;;  %v5789_v19 = vpop.eup %5788 }
 0xa3d   : > { %v3474_v3 = vadd.f32 %v3470_v57, %v3442_v27  ;;  %v3445_v36 = vmul.f32 %v3377_v0, %v7008_v51  ;;  %v3473_v37 = vmul.f32 %v5779_v44, %v3465_v59  ;;  %v3467_v20 = vmul.f32 %v3463_v58, %v7038_v29  ;;  %v5791_v50 = vpop.eup %5790  ;;  %v7902_v58 = vld [vmem:[#allocation17_spill] sm:$0xff]  ;;  %v7905_v27 = vld [vmem:[#allocation8_spill] sm:$0xff] }
 0xa3e   : > { %v3476_v48 = vadd.f32 %v3472_v17, %v3444_v43  ;;  %v3475_v54 = vadd.f32 %v3471_v33, %v3443_v61  ;;  %v3286_v1 = vpop.f32.mrb[74].mxu1  ;;  %v3381_v52 = vpop.f32.mrb[72].mxu0  ;;  %v3469_v56 = vmul.f32 %v3465_v59, %v7040_v42  ;;  %v7906_v43 = vld [vmem:[#allocation9_spill] sm:$0xff]  ;;  %v7907_v33 = vld [vmem:[#allocation10_spill] sm:$0xff] }
 0xa3f   : > { %v3477_v35 = vadd.f32 %v3473_v37, %v3445_v36  ;;  %v3446_v22 = vmul.f32 %v3286_v1, %v7010_v6  ;;  %v3482_v16 = vmul.f32 %v5781_v13, %v3474_v3  ;;  %v3448_v39 = vmul.f32 %v3381_v52, %v7012_v12  ;;  %3655 = vmatprep.mubr.f32.mxu1 %v3467_v20  ;;  %v3288_v51 = vpop.f32.mrb[75].mxu1  ;;  %v3383_v8 = vpop.f32.mrb[73].mxu0  ;;  %v7909_v36 = vld [vmem:[#allocation20_spill] sm:$0xff]  ;;  %v7910_v52 = vld [vmem:[#allocation21_spill] sm:$0xff] }
 0xa40   : > { %v5793_v63 = vpop.eup %5792  ;;  %v3484_v29 = vmul.f32 %v5783_v26, %v3476_v48  ;;  %3745 = vmatprep.mubr.f32.mxu0 %v3469_v56  ;;  %v3447_v23 = vmul.f32 %v3288_v51, %v7014_v7  ;;  %v3483_v2 = vmul.f32 %v5785_v11, %v3475_v54  ;;  %v3449_v32 = vmul.f32 %v3383_v8, %v7016_v14  ;;  %v7904_v26 = vld [vmem:[#allocation7_spill] sm:$0xff]  ;;  %v7913_v8 = vld [vmem:[#allocation12_spill] sm:$0xff] }
 0xa41   : > { %v5795_v53 = vpop.eup %5794  ;;  %v3486_v42 = vadd.f32 %v3482_v16, %v3446_v22  ;;  %v3485_v44 = vmul.f32 %v5787_v47, %v3477_v35  ;;  %3656 = vmatmul.mubr.f32.vlgmr.msra.gmra.mrb[80].mxu1 %v3466_v31  ;;  %3746 = vmatmul.mubr.f32.vlgmr.msra.gmra.mrb[78].mxu0 %v3468_v34  ;;  %v3479_v6 = vmul.f32 %v3475_v54, %v7046_v18  ;;  %v7912_v16 = vld [vmem:[#allocation11_spill] sm:$0xff] }
 0xa42   : > { %v5797_v38 = vpop.eup %5796  ;;  %v3488_v12 = vadd.f32 %v3484_v29, %v3448_v39  ;;  %v3487_v30 = vadd.f32 %v3483_v2, %v3447_v23  ;;  %v3292_v13 = vpop.f32.mrb[76].mxu1  ;;  %v3481_v59 = vmul.f32 %v3477_v35, %v7902_v58  ;;  %v3478_v21 = vmul.f32 %v3474_v3, %v7903_v28  ;;  %5504 = vmatpush3.bf16.msra.mxu1 %v5503_v5  ;;  %v7908_v5 = vld [vmem:[#allocation16_spill] sm:$0xff] }
 0xa43   : > { %v3387_v45 = vpop.f32.mrb[74].mxu0  ;;  %v5799_v7 = vpop.eup %5798  ;;  %v3489_v14 = vadd.f32 %v3485_v44, %v3449_v32  ;;  %v3450_v31 = vmul.f32 %v3292_v13, %v7904_v26  ;;  %v3494_v34 = vmul.f32 %v5789_v19, %v3486_v42  ;;  %3660 = vmatprep.mubr.f32.mxu1 %v3479_v6  ;;  %v3480_v3 = vmul.f32 %v3476_v48, %v7908_v5  ;;  %v7914_v32 = vld [vmem:[#allocation13_spill] sm:$0xff]  ;;  %v7917_v28 = vld [vmem:[#allocation24_spill] sm:$0xff]  ;;  %v3980_v5 = vld [vmem:[%s7851_s10 + $0x8] sm:$0xff] }
 0xa44   : > { %v3452_v18 = vmul.f32 %v3387_v45, %v7905_v27  ;;  %v3294_v57 = vpop.f32.mrb[77].mxu1  ;;  %v3389_v41 = vpop.f32.mrb[75].mxu0  ;;  %v3496_v11 = vmul.f32 %v5791_v50, %v3488_v12  ;;  %3750 = vmatprep.mubr.f32.mxu0 %v3481_v59  ;;  %v3495_v61 = vmul.f32 %v5793_v63, %v3487_v30  ;;  %v3491_v37 = vmul.f32 %v3487_v30, %v7909_v36  ;;  %v7911_v50 = vld [vmem:[#allocation18_spill] sm:$0xff]  ;;  %v7916_v45 = vld [vmem:[#allocation19_spill] sm:$0xff] }
 0xa45   : > { %v5801_v0 = vpop.eup %5800  ;;  %v3451_v17 = vmul.f32 %v3294_v57, %v7906_v43  ;;  %v3453_v47 = vmul.f32 %v3389_v41, %v7907_v33  ;;  %v3498_v25 = vadd.f32 %v3494_v34, %v3450_v31  ;;  %v3497_v10 = vmul.f32 %v5795_v53, %v3489_v14  ;;  %3661 = vmatmul.mubr.f32.gmra.mrb[82].mxu1 %v3478_v21  ;;  %v7919_v31 = vld [vmem:[#allocation22_spill] sm:$0xff]  ;;  %v7920_v27 = vld [vmem:[#allocation23_spill] sm:$0xff]  ;;  %v3872_v33 = vld [vmem:[%s7850_s9 + $0x30] sm:$0xff] }
 0xa46   : > { %v3500_v20 = vadd.f32 %v3496_v11, %v3452_v18  ;;  %v3298_v54 = vpop.f32.mrb[78].mxu1  ;;  %v3393_v1 = vpop.f32.mrb[76].mxu0  ;;  %v3493_v56 = vmul.f32 %v3489_v14, %v7910_v52  ;;  %v3490_v35 = vmul.f32 %v3486_v42, %v7911_v50  ;;  %5505 = vmatprep.subr.bf16.mxu1 %v7901_v15  ;;  %3751 = vmatmul.mubr.f32.gmra.mrb[80].mxu0 %v3480_v3  ;;  %v7915_v42 = vld [vmem:[#allocation14_spill] sm:$0xff]  ;;  %v7918_v14 = vld [vmem:[#allocation25_spill] sm:$0xff]  ;;  %v7923_v11 = vld [vmem:[#allocation27_spill] sm:$0xff] }
 0xa47   : > { %v3499_v19 = vadd.f32 %v3495_v61, %v3451_v17  ;;  %v3501_v22 = vadd.f32 %v3497_v10, %v3453_v47  ;;  %v3454_v39 = vmul.f32 %v3298_v54, %v7912_v16  ;;  %v3506_v51 = vmul.f32 %v5797_v38, %v3498_v25  ;;  %v3300_v48 = vpop.f32.mrb[79].mxu1  ;;  %v3395_v29 = vpop.f32.mrb[77].mxu0  ;;  %3665 = vmatprep.mubr.f32.mxu1 %v3491_v37  ;;  %v7921_v57 = vld [vmem:[#allocation26_spill] sm:$0xff]  ;;  %v7924_v17 = vld [vmem:[#allocation29_spill] sm:$0xff]  ;;  %v3981_v3 = vld [vmem:[%s7851_s10 + $0x10] sm:$0xff] }
 0xa48   : > { %v3456_v63 = vmul.f32 %v3393_v1, %v7913_v8  ;;  %v5803_v23 = vpop.eup %5802  ;;  %v3508_v2 = vmul.f32 %v5799_v7, %v3500_v20  ;;  %3755 = vmatprep.mubr.f32.mxu0 %v3493_v56  ;;  %v3455_v53 = vmul.f32 %v3300_v48, %v7914_v32  ;;  %v3457_v30 = vmul.f32 %v3395_v29, %v7915_v42  ;;  %v3873_v47 = vld [vmem:[%s7850_s9 + $0x38] sm:$0xff]  ;;  %v3979_v10 = vld [vmem:[%s7851_s10] sm:$0xff]  ;;  %v7925_v54 = vld [vmem:[#allocation4_spill] sm:$0xff]  ;;  %v3847_v32 = vpop.permute.xlu0 %3846 }
 0xa49   : > { %v3507_v44 = vmul.f32 %v5801_v0, %v3499_v19  ;;  %v3510_v6 = vadd.f32 %v3506_v51, %v3454_v39  ;;  %v3509_v13 = vmul.f32 %v5803_v23, %v3501_v22  ;;  %3666 = vmatmul.mubr.f32.gmra.mrb[84].mxu1 %v3490_v35  ;;  %v3492_v58 = vmul.f32 %v3488_v12, %v7916_v45  ;;  %v7922_v12 = vld [vmem:[#allocation28_spill] sm:$0xff]  ;;  %v3982_v37 = vld [vmem:[%s7851_s10 + $0x18] sm:$0xff] }
 0xa4a   : > { %v3512_v59 = vadd.f32 %v3508_v2, %v3456_v63  ;;  %v3503_v21 = vmul.f32 %v3499_v19, %v7917_v28  ;;  %v3505_v26 = vmul.f32 %v3501_v22, %v7918_v14  ;;  %5507 = vmatpush3.bf16.msra.mxu1 %v5506_v60  ;;  %v3502_v34 = vmul.f32 %v3498_v25, %v7919_v31  ;;  %v7704_v19 = vld [vmem:[%s7842_s1] sm:$0xff]  ;;  %v3849_v14 = vpop.permute.xlu1 %3848 }
 0xa4b   : > { %v3511_v38 = vadd.f32 %v3507_v44, %v3455_v53  ;;  %v3513_v7 = vadd.f32 %v3509_v13, %v3457_v30  ;;  %3756 = vmatmul.mubr.f32.gmra.mrb[82].mxu0 %v3492_v58  ;;  %v3504_v18 = vmul.f32 %v3500_v20, %v7920_v27  ;;  %v3514_v41 = vmul.f32 %v3510_v6, %v7921_v57 }
 0xa4c   : > { %3670 = vmatprep.mubr.f32.mxu1 %v3503_v21  ;;  %3760 = vmatprep.mubr.f32.mxu0 %v3505_v26  ;;  %v3516_v43 = vmul.f32 %v3512_v59, %v7923_v11  ;;  %v5509_v60 = vpack.c.bf16 %v3871_v49, %v3870_v9  ;;  %v5512_v25 = vpack.c.bf16 %v3873_v47, %v3872_v33  ;;  %v7926_v1 = vsub.s32 7, %v7925_v54 }
 0xa4d   : > { %v3515_v0 = vmul.f32 %v3511_v38, %v7922_v12  ;;  %3671 = vmatmul.mubr.f32.gmra.mrb[86].mxu1 %v3502_v34  ;;  %v3517_v61 = vmul.f32 %v3513_v7, %v7924_v17  ;;  %5508 = vmatprep.subr.bf16.mxu1 %v7901_v15  ;;  %v5515_v36 = vpack.c.bf16 %v3980_v5, %v3979_v10 }
 0xa4e   : > { %5510 = vmatpush3.bf16.msra.mxu1 %v5509_v60  ;;  %v5518_v20 = vpack.c.bf16 %v3982_v37, %v3981_v3  ;;  %v3521_v52 = vrot.slane %v7704_v19, %v7926_v1  ;;  %v3853_v47 = vpop.permute.xlu1 %3852  ;;  %v4060_v37 = vld [vmem:[%s7851_s10 + $0x20] sm:$0xff]  ;;  %v4062_v1 = vld [vmem:[%s7851_s10 + $0x30] sm:$0xff] }
 0xa4f   : > { %3675 = vmatprep.mubr.f32.mxu1 %v3515_v0  ;;  %3761 = vmatmul.mubr.f32.gmra.mrb[84].mxu0 %v3504_v18  ;;  %v3851_v0 = vpop.permute.xlu0 %3850 }
 0xa50   : > { %3765 = vmatprep.mubr.f32.mxu0 %v3517_v61  ;;  %5511 = vmatprep.subr.bf16.mxu1 %v7901_v15  ;;  %v3522_v51 = vmul.f32 %v3521_v52, %v6615_v24  ;;  %v3523_v13 = vmul.f32 %v3521_v52, %v6649_v62  ;;  %v3524_v31 = vmul.f32 %v3521_v52, %v6684_v46 }
 0xa51   : > { %3676 = vmatmul.mubr.f32.gmra.mrb[88].mxu1 %v3514_v41  ;;  %5516 = vmatpush3.bf16.msra.mxu0 %v5515_v36  ;;  %v3525_v17 = vmul.f32 %v3521_v52, %v6705_v40  ;;  %v3526_v10 = vmul.f32 %v3521_v52, %v6714_v55  ;;  %v4061_v55 = vld [vmem:[%s7851_s10 + $0x28] sm:$0xff]  ;;  %v4063_v52 = vld [vmem:[%s7851_s10 + $0x38] sm:$0xff] }
 0xa52   : > { %5142 = vmatprep.mubr.msk.f32.mxu1 %vm5823_vm0, %v7900_v4  ;;  %5513 = vmatpush3.bf16.msra.mxu1 %v5512_v25 }
 0xa53   : > { %3766 = vmatmul.mubr.f32.gmra.mrb[86].mxu0 %v3516_v43  ;;  %5544 = vmatprep.subr.bf16.mxu1 %v7901_v15  ;;  %v3855_v40 = vpop.permute.xlu0 %3854 }
 0xa54   : > { %5165 = vmatprep.mubr.msk.f32.mxu0 %vm5823_vm0, %v7900_v4  ;;  %5517 = vmatprep.subr.bf16.mxu0 %v7901_v15 }
 0xa55   : > { %5519 = vmatpush3.bf16.msra.mxu0 %v5518_v20  ;;  %v5521_v20 = vpack.c.bf16 %v4061_v55, %v4060_v37 }
 0xa56   : > { %5520 = vmatprep.subr.bf16.mxu0 %v7901_v15 }
 0xb14   : > { %v4939_v56 = vpop.f32.mrb[80].mxu1  ;;  %v4986_v50 = vpop.f32.mrb[78].mxu0 }
 0xb15   : > { %v4940_v35 = vpop.f32.mrb[81].mxu1  ;;  %v4987_v22 = vpop.f32.mrb[79].mxu0 }
 0xb16   : > { %v4941_v16 = vadd.f32 %v4940_v35, %v4939_v56  ;;  %v4988_v39 = vadd.f32 %v4987_v22, %v4986_v50  ;;  %v5524_v35 = vpack.c.bf16 %v4063_v52, %v4062_v1  ;;  %v4138_v22 = vld [vmem:[%s7851_s10 + $0x40] sm:$0xff] }
 0xb18   : > { %v3748_v8 = vadd.f32 %v4988_v39, %v4941_v16  ;;  %v4942_v63 = vpop.f32.mrb[82].mxu1  ;;  %v4139_v16 = vld [vmem:[%s7851_s10 + $0x48] sm:$0xff] }
 0xb19   : > { %v4943_v48 = vpop.f32.mrb[83].mxu1  ;;  %v4989_v23 = vpop.f32.mrb[80].mxu0 }
 0xb1a   : > { %v3771_v29 = vadd.f32 %v3748_v8, %v3522_v51  ;;  %v4944_v2 = vadd.f32 %v4943_v48, %v4942_v63  ;;  %v4990_v53 = vpop.f32.mrb[81].mxu0  ;;  %v5527_v51 = vpack.c.bf16 %v4139_v16, %v4138_v22  ;;  %v4140_v63 = vld [vmem:[%s7851_s10 + $0x50] sm:$0xff]  ;;  %v4141_v48 = vld [vmem:[%s7851_s10 + $0x58] sm:$0xff] }
 0xb1b   : > { %v4991_v6 = vadd.f32 %v4990_v53, %v4989_v23  ;;  %v5530_v23 = vpack.c.bf16 %v4141_v48, %v4140_v63  ;;  %v4217_v53 = vld [vmem:[%s7851_s10 + $0x68] sm:$0xff]  ;;  %v7929_v63 = vlaneseq }
 0xb1c   : > { %v3861_v44 = vmul.f32 %v3847_v32, %v3771_v29  ;;  %v4945_v42 = vpop.f32.mrb[84].mxu1  ;;  %v4216_v32 = vld [vmem:[%s7851_s10 + $0x60] sm:$0xff] }
 0xb1d   : > { %v4946_v30 = vpop.f32.mrb[85].mxu1  ;;  %v3753_v45 = vadd.f32 %v4991_v6, %v4944_v2  ;;  %v5533_v6 = vpack.c.bf16 %v4217_v53, %v4216_v32  ;;  %v4485_v48 = vand.u32 127, %v7929_v63 }
 0xb1e   : > { %v4992_v58 = vpop.f32.mrb[82].mxu0  ;;  %v4947_v59 = vadd.f32 %v4946_v30, %v4945_v42  ;;  %5143 = vmatmul.mubr.msk.f32.vlgmr.msra.gmra.mrb[90].mxu1 %vm2290_vm12, %v3861_v44  ;;  %v4218_v30 = vld [vmem:[%s7851_s10 + $0x70] sm:$0xff] }
 0xb1f   : > { %v4993_v24 = vpop.f32.mrb[83].mxu0  ;;  %5145 = vmatprep.mubr.msk.f32.mxu1 %vm5823_vm0, %v7900_v4  ;;  %v3772_v38 = vadd.f32 %v3753_v45, %v3523_v13  ;;  %v4219_v13 = vld [vmem:[%s7851_s10 + $0x78] sm:$0xff] }
 0xb20   : > { %v4994_v28 = vadd.f32 %v4993_v24, %v4992_v58  ;;  %v4948_v21 = vpop.f32.mrb[86].mxu1  ;;  %v5536_v58 = vpack.c.bf16 %v4219_v13, %v4218_v30  ;;  %v4294_v24 = vld [vmem:[%s7851_s10 + $0x80] sm:$0xff]  ;;  %v4604_v30 = vadd.f32 1e-10, %v7704_v19 }
 0xb21   : > { %v4949_v26 = vpop.f32.mrb[87].mxu1  ;;  %v3862_v7 = vmul.f32 %v3849_v14, %v3772_v38  ;;  %v4295_v38 = vld [vmem:[%s7851_s10 + $0x88] sm:$0xff]  ;;  %v4297_v14 = vld [vmem:[%s7851_s10 + $0x98] sm:$0xff] }
 0xb22   : > { %v3758_v34 = vadd.f32 %v4994_v28, %v4947_v59  ;;  %v4995_v27 = vpop.f32.mrb[84].mxu0  ;;  %v4950_v62 = vadd.f32 %v4949_v26, %v4948_v21  ;;  %v5539_v28 = vpack.c.bf16 %v4295_v38, %v4294_v24  ;;  %v4296_v21 = vld [vmem:[%s7851_s10 + $0x90] sm:$0xff]  ;;  %v7931_v38 = vld [vmem:[#allocation6_spill] sm:$0xff] }
 0xb23   : > { %v4996_v18 = vpop.f32.mrb[85].mxu0  ;;  %5146 = vmatmul.mubr.msk.f32.gmra.mrb[92].mxu1 %vm2290_vm12, %v3862_v7  ;;  %v5542_v26 = vpack.c.bf16 %v4297_v14, %v4296_v21  ;;  %v4401_v7 = vld [vmem:[%s7852_s11] sm:$0xff] }
 0xb24   : > { %v3773_v57 = vadd.f32 %v3758_v34, %v3524_v31  ;;  %v4997_v41 = vadd.f32 %v4996_v18, %v4995_v27  ;;  %v4951_v12 = vpop.f32.mrb[88].mxu1  ;;  %5148 = vmatprep.mubr.msk.f32.mxu1 %vm5823_vm0, %v7900_v4  ;;  %v4402_v31 = vld [vmem:[%s7852_s11 + $0x8] sm:$0xff]  ;;  %v4404_v27 = vld [vmem:[%s7852_s11 + $0x18] sm:$0xff] }
 0xb25   : > { %v4952_v11 = vpop.f32.mrb[89].mxu1  ;;  %v5545_v34 = vpack.c.bf16 %v4402_v31, %v4401_v7  ;;  %v5812_v18 = vld [vmem:[%s7842_s1 + $0x8] sm:$0xff] }
 0xb26   : > { %v3863_v43 = vmul.f32 %v3851_v0, %v3773_v57  ;;  %v3763_v61 = vadd.f32 %v4997_v41, %v4950_v62  ;;  %v4998_v9 = vpop.f32.mrb[86].mxu0  ;;  %v4953_v46 = vadd.f32 %v4952_v11, %v4951_v12  ;;  %v7927_v57 = vld [vmem:[#allocation5_spill] sm:$0xff]  ;;  %v7932_v31 = vld [vmem:[#allocation3_spill] sm:$0xff] }
 0xb27   : > { %v4999_v49 = vpop.f32.mrb[87].mxu0  ;;  %5546 = vmatpush3.bf16.msra.mxu1 %v5545_v34  ;;  %v3986_v41 = vrot.slane %v5812_v18, %v7927_v57 }
 0xb28   : > { %v3774_v60 = vadd.f32 %v3763_v61, %v3525_v17  ;;  %v5000_v33 = vadd.f32 %v4999_v49, %v4998_v9  ;;  %5149 = vmatmul.mubr.msk.f32.gmra.mrb[94].mxu1 %vm2290_vm12, %v3863_v43  ;;  %5547 = vmatprep.subr.bf16.mxu1 %v7901_v15 }
 0xb29   : > { %5151 = vmatprep.mubr.msk.f32.mxu1 %vm5823_vm0, %v7900_v4 }
 0xb2a   : > { %v3864_v25 = vmul.f32 %v3853_v47, %v3774_v60  ;;  %v3768_v5 = vadd.f32 %v5000_v33, %v4953_v46 }
 0xb2c   : > { %v3775_v3 = vadd.f32 %v3768_v5, %v3526_v10  ;;  %5152 = vmatmul.mubr.msk.f32.gmra.mrb[96].mxu1 %vm2290_vm12, %v3864_v25 }
 0xb2d   : > { %5154 = vmatprep.mubr.msk.f32.mxu1 %vm5823_vm0, %v7900_v4 }
 0xb2e   : > { %v3865_v36 = vmul.f32 %v3855_v40, %v3775_v3 }
 0xb30   : > { %5155 = vmatmul.mubr.msk.f32.gmra.mrb[98].mxu1 %vm2290_vm12, %v3865_v36  ;;  %vm4486_vm12 = vcmp.eq.s32.totalorder %v7925_v54, %v4485_v48 }
 0xb31   : > { %5220 = vmatprep.mubr.msk.f32.mxu1 %vm5823_vm0, %v7900_v4 }
 0xbf1   : > { %v3955_v56 = vpop.f32.mrb[90].mxu1 }
 0xbf2   : > { %v5144_v50 = vpop.f32.mrb[91].mxu1  ;;  %5166 = vmatmul.mubr.msk.f32.vlgmr.msra.gmra.mrb[88].mxu0 %vm1110_vm5, %v3955_v56 }
 0xbf3   : > { %5522 = vmatpush3.bf16.msra.mxu0 %v5521_v20  ;;  %5176 = vmatprep.mubr.msk.f32.mxu0 %vm5823_vm0, %v7900_v4 }
 0xbf4   : > { %5523 = vmatprep.subr.bf16.mxu0 %v7901_v15 }
 0xbf6   : > { %v3960_v39 = vpop.f32.mrb[92].mxu1 }
 0xbf7   : > { %5525 = vmatpush3.bf16.msra.mxu0 %v5524_v35  ;;  %v5147_v8 = vpop.f32.mrb[93].mxu1  ;;  %v7928_v35 = vmov -1.0  }
 0xbf8   : > { %5526 = vmatprep.subr.bf16.mxu0 %v7901_v15 }
 0xbfa   : > { %5177 = vmatmul.mubr.msk.f32.vlgmr.msra.gmra.mrb[88].mxu0 %vm1110_vm5, %v3960_v39 }
 0xbfb   : > { %v3965_v29 = vpop.f32.mrb[94].mxu1  ;;  %5528 = vmatpush3.bf16.msra.mxu0 %v5527_v51  ;;  %5187 = vmatprep.mubr.msk.f32.mxu0 %vm5823_vm0, %v7900_v4 }
 0xbfc   : > { %v5150_v2 = vpop.f32.mrb[95].mxu1  ;;  %5529 = vmatprep.subr.bf16.mxu0 %v7901_v15 }
 0xbff   : > { %v3970_v44 = vpop.f32.mrb[96].mxu1  ;;  %5531 = vmatpush3.bf16.msra.mxu0 %v5530_v23  ;;  %v7930_v23 = vsub.s32 1, %v7925_v54 }
 0xc00   : > { %v5153_v42 = vpop.f32.mrb[97].mxu1  ;;  %5532 = vmatprep.subr.bf16.mxu0 %v7901_v15 }
 0xc01   : > { %v4408_v2 = vrot.slane %v5812_v18, %v7930_v23 }
 0xc02   : > { %5188 = vmatmul.mubr.msk.f32.vlgmr.msra.gmra.mrb[88].mxu0 %vm1110_vm5, %v3965_v29  ;;  %v5828_v29 = vmov 1.0  }
 0xc03   : > { %v3975_v45 = vpop.f32.mrb[98].mxu1  ;;  %5534 = vmatpush3.bf16.msra.mxu0 %v5533_v6  ;;  %5198 = vmatprep.mubr.msk.f32.mxu0 %vm5823_vm0, %v7900_v4 }
 0xc04   : > { %v5156_v59 = vpop.f32.mrb[99].mxu1  ;;  %5535 = vmatprep.subr.bf16.mxu0 %v7901_v15 }
 0xc07   : > { %5537 = vmatpush3.bf16.msra.mxu0 %v5536_v58 }
 0xc08   : > { %5538 = vmatprep.subr.bf16.mxu0 %v7901_v15 }
 0xc0a   : > { %5199 = vmatmul.mubr.msk.f32.vlgmr.msra.gmra.mrb[88].mxu0 %vm1110_vm5, %v3970_v44 }
 0xc0b   : > { %5540 = vmatpush3.bf16.msra.mxu0 %v5539_v28  ;;  %5209 = vmatprep.mubr.msk.f32.mxu0 %vm5823_vm0, %v7900_v4  ;;  %v4403_v4 = vld [vmem:[%s7852_s11 + $0x10] sm:$0xff] }
 0xc0c   : > { %5541 = vmatprep.subr.bf16.mxu0 %v7901_v15  ;;  %v5548_v62 = vpack.c.bf16 %v4404_v27, %v4403_v4  ;;  %v7933_v4 = vld [vmem:[#allocation2_spill] sm:$0xff] }
 0xc0e   : > { %5549 = vmatpush3.bf16.msra.mxu1 %v5548_v62 }
 0xc0f   : > { %5543 = vmatpush3.bf16.msra.mxu0 %v5542_v26  ;;  %5223 = vmatprep.subr.msk.mxu1 %vm4486_vm12, %v5828_v29 }
 0xc12   : > { %5210 = vmatmul.mubr.msk.f32.vlgmr.msra.gmra.mrb[88].mxu0 %vm1110_vm5, %v3975_v45 }
 0xce5   : > { %v4367_v12 = vpop.f32.mrb[88].mxu0 }
 0xce6   : > { %v5550_v0 = vadd.f32 %v4367_v12, %v3986_v41  ;;  %v5211_v11 = vpop.f32.mrb[89].mxu0 }
 0xce8   : > { %v4373_v15 = vmul.f32 0.70710677, %v5550_v0  ;;  %v4372_v39 = vmul.f32 0.5, %v5550_v0 }
 0xcea   : > { %v4376_v43 = vand.u32 2147483647, %v4373_v15  ;;  %vm4374_vm0 = vcmp.ge.f32.partialorder %v4373_v15, 0.0 }
 0xceb   : > { %v4375_v22 = vsel %vm4374_vm0, 1.0, %v7928_v35 }
 0xcec   : > { %v4377_v17 = vmul.f32 0.3275911, %v4376_v43  ;;  %v4392_v49 = vsub.f32 0.0, %v4376_v43 }
 0xcee   : > { %v4378_v61 = vadd.f32 1.0, %v4377_v17  ;;  %v4393_v47 = vmul.f32 %v4392_v49, %v4376_v43 }
 0xcf0   : > { %5804 = vrcp.f32 %v4378_v61  ;;  %v4394_v5 = vmul.f32 1.442695, %v4393_v47 }
 0xcf2   : > { %5806 = vpow2.f32 %v4394_v5 }
 0xcf3   : > { %5808 = vrcp.f32 %v4604_v30 }
 0xcfa   : > { %v5805_v9 = vpop.eup %5804 }
 0xcfb   : > { %v4380_v46 = vmul.f32 %v5805_v9, %v4378_v61 }
 0xcfc   : > { %v5807_v52 = vpop.eup %5806 }
 0xcfd   : > { %v4381_v60 = vsub.f32 2.0, %v4380_v46  ;;  %v5809_v13 = vpop.eup %5808 }
 0xcfe   : > { %v4606_v45 = vmul.f32 %v5809_v13, %v4604_v30 }
 0xcff   : > { %v4382_v33 = vmul.f32 %v5805_v9, %v4381_v60 }
 0xd00   : > { %v4607_v58 = vsub.f32 2.0, %v4606_v45 }
 0xd01   : > { %v4383_v25 = vmul.f32 1.0614054, %v4382_v33 }
 0xd02   : > { %v4608_v59 = vmul.f32 %v5809_v13, %v4607_v58 }
 0xd03   : > { %v4384_v10 = vadd.f32 -1.4531521, %v4383_v25 }
 0xd04   : > { %v4612_v54 = vrot.slane %v4608_v59, %v7927_v57 }
 0xd05   : > { %v4385_v3 = vmul.f32 %v4384_v10, %v4382_v33 }
 0xd07   : > { %v4386_v40 = vadd.f32 1.4214138, %v4385_v3 }
 0xd09   : > { %v4387_v36 = vmul.f32 %v4386_v40, %v4382_v33 }
 0xd0b   : > { %v4388_v37 = vadd.f32 -0.28449672, %v4387_v36 }
 0xd0d   : > { %v4389_v55 = vmul.f32 %v4388_v37, %v4382_v33 }
 0xd0f   : > { %v4390_v20 = vadd.f32 0.2548296, %v4389_v55 }
 0xd11   : > { %v4391_v1 = vmul.f32 %v4390_v20, %v4382_v33 }
 0xd13   : > { %v4396_v56 = vmul.f32 %v5807_v52, %v4391_v1 }
 0xd15   : > { %v4397_v50 = vsub.f32 1.0, %v4396_v56 }
 0xd17   : > { %v4398_v16 = vmul.f32 %v4397_v50, %v4375_v22 }
 0xd19   : > { %v4399_v51 = vadd.f32 1.0, %v4398_v16 }
 0xd1b   : > { %v4400_v8 = vmul.f32 %v4399_v51, %v4372_v39 }
 0xd1d   : > { %5221 = vmatmul.mubr.msk.f32.vlgmr.msra.gmra.mrb[100].mxu1 %vm1110_vm5, %v4400_v8 }
 0xd1e   : > { %5224 = vmatpush3.msk.msra.mxu1 %vm4486_vm12, %v5828_v29 }
 0xdf0   : > { %v4478_v32 = vpop.f32.mrb[100].mxu1 }
 0xdf1   : > { %v4479_v53 = vadd.f32 %v4478_v32, %v4408_v2  ;;  %v5222_v44 = vpop.f32.mrb[101].mxu1 }
 0xdf3   : > { %4489 = vxpose.xlu1.b32.start.end [1/1] (short) (narrow) %v4479_v53, 16 }
 0xe73   : > { %v4505_v6 = vpop.trf.xlu1 }
 0xe74   : > { %5225 = vmatprep.mubr.msk.f32.mxu1 %vm455_vm2, %v4505_v6 }
 0xe77   : > { %v4506_v42 = vpop.trf.xlu1 }
 0xe78   : > { %5226 = vmatmul.mubr.msk.f32.vlgmr.msra.gmra.mrb[102].mxu1 %vm455_vm2, %v4506_v42 }
 0xf4b   : > { %v5227_v24 = vpop.f32.mrb[102].mxu1 }
 0xf4c   : > { %v4603_v28 = vsub.f32 %v5227_v24, %v7931_v38  ;;  %v4593_v21 = vpop.f32.mrb[103].mxu1 }
 0xf4d   : > { %v4602_v14 = vsub.f32 %v4593_v21, %v7931_v38 }
 0xf4e   : > { %v4614_v26 = vmul.f32 %v4612_v54, %v4603_v28 }
 0xf4f   : > { %v4613_v7 = vmul.f32 %v4612_v54, %v4602_v14 }
 0xf50   : > { %v4616_v34 = vmul.f32 %v4614_v26, %v7932_v31 }
 0xf51   : > { %v4615_v19 = vmul.f32 %v4613_v7, %v7932_v31 }
 0xf52   : > { %v4618_v27 = vadd.f32 %v4616_v34, %v7933_v4 }
 0xf53   : > { %v4617_v62 = vadd.f32 %v4615_v19, %v7933_v4 }
 0xf54   : > { %4620 = vst.msk [vmem:[%s420_s19 + $0x8] sm:$0xff] %vm450_vm1, %v4618_v27 }
 0xf55   : > { %4623 = vrot.lane.b32.xlu0 %v4617_v62, %s5829_s20  ;;  %4619 = vst.msk [vmem:[%s420_s19] sm:$0xff] %vm450_vm1, %v4617_v62 }
 0xf59   : > { %4625 = vrot.lane.b32.xlu0 %v4618_v27, %s5829_s20 }
 0xfc7   : > { %v4624_v18 = vpop.permute.xlu0 %4623 }
 0xfc8   : > { %4801 = vst.msk [vmem:[%s420_s19 + $0x10] sm:$0xff] %vm450_vm1, %v4624_v18 }
 0xfcb   : > { %v4626_v57 = vpop.permute.xlu0 %4625 }
 0xfcc   : > { %4802 = vst.msk [vmem:[%s420_s19 + $0x18] sm:$0xff] %vm450_vm1, %v4626_v57 }
 0xfcd PF: > { %s22_s21 = sadd.s32 1, %s5819_s21  }
 0xfce   : > { %p19_p4 = scmp.ge.s32.totalorder %s22_s21, 4  }
 0xfd0   :  { %21 = sbr.rel (!%p19_p4) target bundleno = 1 (0x1), region = 100 }

</bundles_post_ra>
